<compile_context>
chip_gen: v6e
topology: v6e:2x2x1
jax: 0.10.0
libtpu: 0.0.40
codegen_flags: <defaults>
</compile_context>

<pallas_src>
import jax
import jax.numpy as jnp
from jax import lax
from jax.experimental import pallas as pl
from jax.experimental.pallas import tpu as pltpu


def _emb_group_kernel(idx_ref, tab_ref, out_ref):
    # idx_ref: (GP, B_tile, G)     int32 -- indices for the GP feature groups of this step
    # tab_ref: (GP, G*V, G*D)      bf16  -- block-diagonal grouped embedding tables
    # out_ref: (B_tile, GP*G*D)    f32   -- concatenated embeddings (lane-dense, 128-aligned)
    gp, bt, g = idx_ref.shape
    _, gv, gd = tab_ref.shape
    v = gv // g

    # Hoisted: one iota shared by every compare of this step.
    iota_v = lax.broadcasted_iota(jnp.int32, (bt, v), 1)          # (B_tile, V)

    for p in range(gp):                       # static unroll over groups of this step
        idx_p = idx_ref[p]                    # (B_tile, G) -- loaded once per group
        acc = jnp.zeros((bt, gd), jnp.float32)
        for f in range(g):                    # static unroll over features of the group
            # One (B_tile, V) one-hot at a time (never the full (B_tile, G*V) slab).
            onehot_f = (iota_v == idx_p[:, f:f + 1]).astype(tab_ref.dtype)
            # Rows f*V:(f+1)*V of the block-diagonal table only populate columns
            # [f*D, (f+1)*D), so accumulating the (V, G*D)-wide dot reproduces the
            # concatenated PyTorch layout directly.
            acc = acc + jnp.dot(
                onehot_f,
                tab_ref[p, f * v:(f + 1) * v, :],
                preferred_element_type=jnp.float32,
            )
        # Single unmasked, 128-lane-aligned store per group.
        out_ref[:, p * gd:(p + 1) * gd] = acc.astype(out_ref.dtype)


def _pick_block_b(batch):
    """Default batch tile: up to 512 rows (amortize per-step overhead), multiple of 8,
    preferring a tile that evenly divides the (8-rounded) batch so no padding / no
    post-kernel slice copy is needed."""
    b8 = -(-batch // 8) * 8
    best = min(512, b8)
    cand = best
    while cand >= 128 and b8 % cand != 0:
        cand -= 8
    if cand >= 128 and b8 % cand == 0:
        return cand
    return best


def embedding_forward(x, grouped_tables, *, group_size, block_b=None, groups_per_step=None):
    """x: (B, F) integer indices; grouped_tables: (NG, G*V, G*D) block-diagonal tables.

    Returns (B, F * D) float32, matching torch.cat([emb_i(x[:, i])], dim=1).
    """
    B, F = x.shape
    NG, GV, GD = grouped_tables.shape
    G = group_size
    V = GV // G
    D = GD // G
    F_pad = NG * G
    assert F <= F_pad

    if groups_per_step is None:
        # 256-lane output slabs (2 groups/step) when possible -> matches v6e/v7x 2x256 MXU.
        groups_per_step = 2 if NG % 2 == 0 else 1
    GP = groups_per_step
    assert NG % GP == 0

    if block_b is None:
        block_b = _pick_block_b(B)
    assert block_b % 8 == 0 and block_b > 0
    B_pad = -(-B // block_b) * block_b

    x_p = x.astype(jnp.int32)
    if F_pad > F:
        x_p = jnp.pad(x_p, ((0, 0), (0, F_pad - F)))
    if B_pad > B:
        x_p = jnp.pad(x_p, ((0, B_pad - B), (0, 0)))
    # (B_pad, F_pad) -> (NG, B_pad, G): group-major, one small index DMA per group-step.
    idx = jnp.transpose(x_p.reshape(B_pad, NG, G), (1, 0, 2))

    nb = B_pad // block_b
    ngs = NG // GP

    # Per-step VMEM footprint (double-buffered table/out/idx + accumulator/one-hot temps).
    itemsize = grouped_tables.dtype.itemsize
    tab_bytes = GP * GV * GD * itemsize
    out_bytes = block_b * GP * GD * 4
    idx_bytes = GP * block_b * 128 * 4          # G lanes padded up to 128 in VMEM
    est = 2 * (tab_bytes + out_bytes + idx_bytes) + 3 * block_b * GD * 4
    cp_kwargs = dict(
        # Both axes independent (each output block written exactly once); on v7x the
        # batch axis (nb) is what the two TensorCores shard.
        dimension_semantics=("parallel", "parallel"),
    )
    if est > 12 * 1024 * 1024:
        # v5e's default scoped-VMEM limit is only 16 MiB; raise it for big batch tiles
        # (48 MiB stays under v7x's 64 MiB physical VMEM per TensorCore).
        cp_kwargs["vmem_limit_bytes"] = 48 * 1024 * 1024

    out = pl.pallas_call(
        _emb_group_kernel,
        out_shape=jax.ShapeDtypeStruct((B_pad, F_pad * D), jnp.float32),
        grid_spec=pltpu.PrefetchScalarGridSpec(
            num_scalar_prefetch=0,
            # Batch is the inner axis so the grouped table block stays resident across
            # batch tiles (fetched once per group-step).
            grid=(ngs, nb),
            in_specs=[
                pl.BlockSpec((GP, block_b, G), lambda gs, b: (gs, b, 0)),   # indices
                pl.BlockSpec((GP, GV, GD), lambda gs, b: (gs, 0, 0)),       # block-diag tables
            ],
            out_specs=pl.BlockSpec((block_b, GP * GD), lambda gs, b: (b, gs)),
        ),
        compiler_params=pltpu.CompilerParams(**cp_kwargs),
    )(idx, grouped_tables)

    # Drop batch / feature padding only when padding was actually applied (the slice
    # otherwise forces an extra full read+write of the output in HBM).
    if B_pad != B or F_pad != F:
        out = out[:B, : F * D]
    return out


def make_params(num_features, embedding_dim, key, *, group_size=8, vocab_pad=128,
                table_dtype=jnp.bfloat16):
    """Deterministic nn.Embedding-style init (N(0,1), rounded to `table_dtype`).

    Returns:
      grouped: (NG, G*V, G*D) block-diagonal grouped tables in `table_dtype` (kernel operand)
      stacked: (F, V, D) float32 view of the same (rounded) weights, zero-padded per
               feature, for the pure-JAX reference.

    NOTE: the block-diagonal layout inflates the table by G in HBM/VMEM and the matmul
    does G redundant MACs against zero blocks.  Fine at V=128 / D=16; if vocab_pad or
    embedding_dim grow, reduce group_size so G*V stays ~512-1024.
    """
    F = len(num_features)
    D = embedding_dim
    G = group_size
    V = vocab_pad
    assert max(num_features) <= V
    NG = -(-F // G)

    tables = []
    for vocab in num_features:
        key, sub = jax.random.split(key)
        w = jax.random.normal(sub, (vocab, D), dtype=jnp.float32).astype(table_dtype)
        tables.append(jnp.pad(w, ((0, V - vocab), (0, 0))))
    stacked = jnp.stack(tables, axis=0).astype(jnp.float32)  # (F, V, D) reference copy

    # Pad feature count up to a multiple of G with all-zero dummy tables.
    while len(tables) < NG * G:
        tables.append(jnp.zeros((V, D), table_dtype))

    groups = []
    for g in range(NG):
        blk = jnp.zeros((G * V, G * D), table_dtype)
        for f in range(G):
            t = tables[g * G + f]
            blk = blk.at[f * V:(f + 1) * V, f * D:(f + 1) * D].set(t)
        groups.append(blk)
    grouped = jnp.stack(groups, axis=0)  # (NG, G*V, G*D)
    return grouped, stacked


if __name__ == "__main__":
    # Deterministic example: 32 categorical features (4 groups of 8 -> 2 group-steps of
    # 2 groups each, i.e. 256-lane output slabs), embedding_dim=16, batch=256 split into
    # two 128-row tiles (exercises both grid axes).
    num_features = [11, 7, 19, 33, 5, 28, 64, 100, 13, 2, 50, 77, 9, 17, 120, 31,
                    23, 3, 41, 66, 90, 12, 8, 55, 37, 29, 101, 14, 6, 48, 73, 127]
    embedding_dim = 16
    batch = 256
    group_size = 8
    F = len(num_features)

    key = jax.random.PRNGKey(0)
    key, kp, kx = jax.random.split(key, 3)
    grouped_tables, stacked_tables = make_params(
        num_features, embedding_dim, kp, group_size=group_size
    )

    # Random valid indices per feature, shape (B, F).
    cols = []
    for vocab in num_features:
        kx, sub = jax.random.split(kx)
        cols.append(jax.random.randint(sub, (batch,), 0, vocab, dtype=jnp.int32))
    x = jnp.stack(cols, axis=1)  # (B, F) int32

    out = embedding_forward(x, grouped_tables, group_size=group_size, block_b=128)
    out = jax.block_until_ready(out)

    # Pure-JAX reference: gather per feature, concat along dim=1 (PyTorch semantics).
    # Exact match expected: the one-hot matmul copies a single bf16-rounded row and
    # accumulates in f32.
    expected = jnp.concatenate(
        [stacked_tables[i][x[:, i]] for i in range(F)], axis=1
    )
    assert out.shape == (batch, F * embedding_dim), out.shape
    assert jnp.allclose(out, expected, atol=1e-6, rtol=1e-6)

    print("KERNEL_OK")
</pallas_src>

<mosaic_0001>
module attributes {stable_mosaic.version = 11 : i64} {
  func.func @_emb_group_kernel(%arg0: i32, %arg1: i32, %arg2: memref<2x128x8xi32, #tpu.memory_space<vmem>>, %arg3: memref<2x1024x128xbf16, #tpu.memory_space<vmem>>, %arg4: memref<128x256xf32, #tpu.memory_space<vmem>>) attributes {dimension_semantics = [#tpu.dimension_semantics<parallel>, #tpu.dimension_semantics<parallel>], iteration_bounds = array<i64: 2, 2>, scalar_prefetch = 0 : i64, scratch_operands = 0 : i64, tpu.core_type = #tpu.core_type<tc>, window_params = [{transform_indices = @transform_0, window_bounds = array<i64: 2, 128, 8>}, {transform_indices = @transform_1, window_bounds = array<i64: 2, 1024, 128>}, {transform_indices = @transform_2, window_bounds = array<i64: 128, 256>}]} {
    %0 = tpu.iota {dimensions = array<i32: 1>} : vector<128x128xi32>
    %c0 = arith.constant 0 : index
    %c0_0 = arith.constant 0 : index
    %c0_1 = arith.constant 0 : index
    %1 = vector.load %arg2[%c0, %c0_0, %c0_1] : memref<2x128x8xi32, #tpu.memory_space<vmem>>, vector<1x128x8xi32>
    %2 = vector.shape_cast %1 : vector<1x128x8xi32> to vector<128x8xi32>
    %cst = arith.constant 0.000000e+00 : f32
    %3 = vector.broadcast %cst : f32 to vector<128x128xf32>
    %4 = vector.extract_strided_slice %2 {offsets = [0, 0], sizes = [128, 1], strides = [1, 1]} : vector<128x8xi32> to vector<128x1xi32>
    %5 = vector.broadcast %4 : vector<128x1xi32> to vector<128x128xi32>
    %6 = arith.cmpi eq, %0, %5 : vector<128x128xi32>
    %7 = arith.extui %6 : vector<128x128xi1> to vector<128x128xi32>
    %8 = arith.sitofp %7 : vector<128x128xi32> to vector<128x128xf32>
    %9 = arith.truncf %8 : vector<128x128xf32> to vector<128x128xbf16>
    %c0_2 = arith.constant 0 : index
    %c0_3 = arith.constant 0 : index
    %c0_4 = arith.constant 0 : index
    %10 = vector.load %arg3[%c0_2, %c0_3, %c0_4] : memref<2x1024x128xbf16, #tpu.memory_space<vmem>>, vector<1x128x128xbf16>
    %11 = vector.shape_cast %10 : vector<1x128x128xbf16> to vector<128x128xbf16>
    %cst_5 = arith.constant dense<0.000000e+00> : vector<128x128xf32>
    %12 = tpu.matmul %9, %11, %cst_5 {dimension_numbers = #tpu.dot_dimension_numbers<[1], [0], [0], [1], [0, 0, 1, 1], [], []>} : vector<128x128xbf16>, vector<128x128xbf16>, vector<128x128xf32> -> vector<128x128xf32>
    %13 = arith.addf %3, %12 : vector<128x128xf32>
    %14 = vector.extract_strided_slice %2 {offsets = [0, 1], sizes = [128, 1], strides = [1, 1]} : vector<128x8xi32> to vector<128x1xi32>
    %15 = vector.broadcast %14 : vector<128x1xi32> to vector<128x128xi32>
    %16 = arith.cmpi eq, %0, %15 : vector<128x128xi32>
    %17 = arith.extui %16 : vector<128x128xi1> to vector<128x128xi32>
    %18 = arith.sitofp %17 : vector<128x128xi32> to vector<128x128xf32>
    %19 = arith.truncf %18 : vector<128x128xf32> to vector<128x128xbf16>
    %c0_6 = arith.constant 0 : index
    %c128 = arith.constant 128 : index
    %c0_7 = arith.constant 0 : index
    %20 = vector.load %arg3[%c0_6, %c128, %c0_7] : memref<2x1024x128xbf16, #tpu.memory_space<vmem>>, vector<1x128x128xbf16>
    %21 = vector.shape_cast %20 : vector<1x128x128xbf16> to vector<128x128xbf16>
    %cst_8 = arith.constant dense<0.000000e+00> : vector<128x128xf32>
    %22 = tpu.matmul %19, %21, %cst_8 {dimension_numbers = #tpu.dot_dimension_numbers<[1], [0], [0], [1], [0, 0, 1, 1], [], []>} : vector<128x128xbf16>, vector<128x128xbf16>, vector<128x128xf32> -> vector<128x128xf32>
    %23 = arith.addf %13, %22 : vector<128x128xf32>
    %24 = vector.extract_strided_slice %2 {offsets = [0, 2], sizes = [128, 1], strides = [1, 1]} : vector<128x8xi32> to vector<128x1xi32>
    %25 = vector.broadcast %24 : vector<128x1xi32> to vector<128x128xi32>
    %26 = arith.cmpi eq, %0, %25 : vector<128x128xi32>
    %27 = arith.extui %26 : vector<128x128xi1> to vector<128x128xi32>
    %28 = arith.sitofp %27 : vector<128x128xi32> to vector<128x128xf32>
    %29 = arith.truncf %28 : vector<128x128xf32> to vector<128x128xbf16>
    %c0_9 = arith.constant 0 : index
    %c256 = arith.constant 256 : index
    %c0_10 = arith.constant 0 : index
    %30 = vector.load %arg3[%c0_9, %c256, %c0_10] : memref<2x1024x128xbf16, #tpu.memory_space<vmem>>, vector<1x128x128xbf16>
    %31 = vector.shape_cast %30 : vector<1x128x128xbf16> to vector<128x128xbf16>
    %cst_11 = arith.constant dense<0.000000e+00> : vector<128x128xf32>
    %32 = tpu.matmul %29, %31, %cst_11 {dimension_numbers = #tpu.dot_dimension_numbers<[1], [0], [0], [1], [0, 0, 1, 1], [], []>} : vector<128x128xbf16>, vector<128x128xbf16>, vector<128x128xf32> -> vector<128x128xf32>
    %33 = arith.addf %23, %32 : vector<128x128xf32>
    %34 = vector.extract_strided_slice %2 {offsets = [0, 3], sizes = [128, 1], strides = [1, 1]} : vector<128x8xi32> to vector<128x1xi32>
    %35 = vector.broadcast %34 : vector<128x1xi32> to vector<128x128xi32>
    %36 = arith.cmpi eq, %0, %35 : vector<128x128xi32>
    %37 = arith.extui %36 : vector<128x128xi1> to vector<128x128xi32>
    %38 = arith.sitofp %37 : vector<128x128xi32> to vector<128x128xf32>
    %39 = arith.truncf %38 : vector<128x128xf32> to vector<128x128xbf16>
    %c0_12 = arith.constant 0 : index
    %c384 = arith.constant 384 : index
    %c0_13 = arith.constant 0 : index
    %40 = vector.load %arg3[%c0_12, %c384, %c0_13] : memref<2x1024x128xbf16, #tpu.memory_space<vmem>>, vector<1x128x128xbf16>
    %41 = vector.shape_cast %40 : vector<1x128x128xbf16> to vector<128x128xbf16>
    %cst_14 = arith.constant dense<0.000000e+00> : vector<128x128xf32>
    %42 = tpu.matmul %39, %41, %cst_14 {dimension_numbers = #tpu.dot_dimension_numbers<[1], [0], [0], [1], [0, 0, 1, 1], [], []>} : vector<128x128xbf16>, vector<128x128xbf16>, vector<128x128xf32> -> vector<128x128xf32>
    %43 = arith.addf %33, %42 : vector<128x128xf32>
    %44 = vector.extract_strided_slice %2 {offsets = [0, 4], sizes = [128, 1], strides = [1, 1]} : vector<128x8xi32> to vector<128x1xi32>
    %45 = vector.broadcast %44 : vector<128x1xi32> to vector<128x128xi32>
    %46 = arith.cmpi eq, %0, %45 : vector<128x128xi32>
    %47 = arith.extui %46 : vector<128x128xi1> to vector<128x128xi32>
    %48 = arith.sitofp %47 : vector<128x128xi32> to vector<128x128xf32>
    %49 = arith.truncf %48 : vector<128x128xf32> to vector<128x128xbf16>
    %c0_15 = arith.constant 0 : index
    %c512 = arith.constant 512 : index
    %c0_16 = arith.constant 0 : index
    %50 = vector.load %arg3[%c0_15, %c512, %c0_16] : memref<2x1024x128xbf16, #tpu.memory_space<vmem>>, vector<1x128x128xbf16>
    %51 = vector.shape_cast %50 : vector<1x128x128xbf16> to vector<128x128xbf16>
    %cst_17 = arith.constant dense<0.000000e+00> : vector<128x128xf32>
    %52 = tpu.matmul %49, %51, %cst_17 {dimension_numbers = #tpu.dot_dimension_numbers<[1], [0], [0], [1], [0, 0, 1, 1], [], []>} : vector<128x128xbf16>, vector<128x128xbf16>, vector<128x128xf32> -> vector<128x128xf32>
    %53 = arith.addf %43, %52 : vector<128x128xf32>
    %54 = vector.extract_strided_slice %2 {offsets = [0, 5], sizes = [128, 1], strides = [1, 1]} : vector<128x8xi32> to vector<128x1xi32>
    %55 = vector.broadcast %54 : vector<128x1xi32> to vector<128x128xi32>
    %56 = arith.cmpi eq, %0, %55 : vector<128x128xi32>
    %57 = arith.extui %56 : vector<128x128xi1> to vector<128x128xi32>
    %58 = arith.sitofp %57 : vector<128x128xi32> to vector<128x128xf32>
    %59 = arith.truncf %58 : vector<128x128xf32> to vector<128x128xbf16>
    %c0_18 = arith.constant 0 : index
    %c640 = arith.constant 640 : index
    %c0_19 = arith.constant 0 : index
    %60 = vector.load %arg3[%c0_18, %c640, %c0_19] : memref<2x1024x128xbf16, #tpu.memory_space<vmem>>, vector<1x128x128xbf16>
    %61 = vector.shape_cast %60 : vector<1x128x128xbf16> to vector<128x128xbf16>
    %cst_20 = arith.constant dense<0.000000e+00> : vector<128x128xf32>
    %62 = tpu.matmul %59, %61, %cst_20 {dimension_numbers = #tpu.dot_dimension_numbers<[1], [0], [0], [1], [0, 0, 1, 1], [], []>} : vector<128x128xbf16>, vector<128x128xbf16>, vector<128x128xf32> -> vector<128x128xf32>
    %63 = arith.addf %53, %62 : vector<128x128xf32>
    %64 = vector.extract_strided_slice %2 {offsets = [0, 6], sizes = [128, 1], strides = [1, 1]} : vector<128x8xi32> to vector<128x1xi32>
    %65 = vector.broadcast %64 : vector<128x1xi32> to vector<128x128xi32>
    %66 = arith.cmpi eq, %0, %65 : vector<128x128xi32>
    %67 = arith.extui %66 : vector<128x128xi1> to vector<128x128xi32>
    %68 = arith.sitofp %67 : vector<128x128xi32> to vector<128x128xf32>
    %69 = arith.truncf %68 : vector<128x128xf32> to vector<128x128xbf16>
    %c0_21 = arith.constant 0 : index
    %c768 = arith.constant 768 : index
    %c0_22 = arith.constant 0 : index
    %70 = vector.load %arg3[%c0_21, %c768, %c0_22] : memref<2x1024x128xbf16, #tpu.memory_space<vmem>>, vector<1x128x128xbf16>
    %71 = vector.shape_cast %70 : vector<1x128x128xbf16> to vector<128x128xbf16>
    %cst_23 = arith.constant dense<0.000000e+00> : vector<128x128xf32>
    %72 = tpu.matmul %69, %71, %cst_23 {dimension_numbers = #tpu.dot_dimension_numbers<[1], [0], [0], [1], [0, 0, 1, 1], [], []>} : vector<128x128xbf16>, vector<128x128xbf16>, vector<128x128xf32> -> vector<128x128xf32>
    %73 = arith.addf %63, %72 : vector<128x128xf32>
    %74 = vector.extract_strided_slice %2 {offsets = [0, 7], sizes = [128, 1], strides = [1, 1]} : vector<128x8xi32> to vector<128x1xi32>
    %75 = vector.broadcast %74 : vector<128x1xi32> to vector<128x128xi32>
    %76 = arith.cmpi eq, %0, %75 : vector<128x128xi32>
    %77 = arith.extui %76 : vector<128x128xi1> to vector<128x128xi32>
    %78 = arith.sitofp %77 : vector<128x128xi32> to vector<128x128xf32>
    %79 = arith.truncf %78 : vector<128x128xf32> to vector<128x128xbf16>
    %c0_24 = arith.constant 0 : index
    %c896 = arith.constant 896 : index
    %c0_25 = arith.constant 0 : index
    %80 = vector.load %arg3[%c0_24, %c896, %c0_25] : memref<2x1024x128xbf16, #tpu.memory_space<vmem>>, vector<1x128x128xbf16>
    %81 = vector.shape_cast %80 : vector<1x128x128xbf16> to vector<128x128xbf16>
    %cst_26 = arith.constant dense<0.000000e+00> : vector<128x128xf32>
    %82 = tpu.matmul %79, %81, %cst_26 {dimension_numbers = #tpu.dot_dimension_numbers<[1], [0], [0], [1], [0, 0, 1, 1], [], []>} : vector<128x128xbf16>, vector<128x128xbf16>, vector<128x128xf32> -> vector<128x128xf32>
    %83 = arith.addf %73, %82 : vector<128x128xf32>
    %c0_27 = arith.constant 0 : index
    %c0_28 = arith.constant 0 : index
    %84 = vector.load %arg4[%c0_27, %c0_28] : memref<128x256xf32, #tpu.memory_space<vmem>>, vector<128x128xf32>
    tpu.vector_store %arg4[%c0_27, %c0_28], %83 {strides = array<i32>} : memref<128x256xf32, #tpu.memory_space<vmem>>, vector<128x128xf32>,
    %c1 = arith.constant 1 : index
    %c0_29 = arith.constant 0 : index
    %c0_30 = arith.constant 0 : index
    %85 = vector.load %arg2[%c1, %c0_29, %c0_30] : memref<2x128x8xi32, #tpu.memory_space<vmem>>, vector<1x128x8xi32>
    %86 = vector.shape_cast %85 : vector<1x128x8xi32> to vector<128x8xi32>
    %cst_31 = arith.constant 0.000000e+00 : f32
    %87 = vector.broadcast %cst_31 : f32 to vector<128x128xf32>
    %88 = vector.extract_strided_slice %86 {offsets = [0, 0], sizes = [128, 1], strides = [1, 1]} : vector<128x8xi32> to vector<128x1xi32>
    %89 = vector.broadcast %88 : vector<128x1xi32> to vector<128x128xi32>
    %90 = arith.cmpi eq, %0, %89 : vector<128x128xi32>
    %91 = arith.extui %90 : vector<128x128xi1> to vector<128x128xi32>
    %92 = arith.sitofp %91 : vector<128x128xi32> to vector<128x128xf32>
    %93 = arith.truncf %92 : vector<128x128xf32> to vector<128x128xbf16>
    %c1_32 = arith.constant 1 : index
    %c0_33 = arith.constant 0 : index
    %c0_34 = arith.constant 0 : index
    %94 = vector.load %arg3[%c1_32, %c0_33, %c0_34] : memref<2x1024x128xbf16, #tpu.memory_space<vmem>>, vector<1x128x128xbf16>
    %95 = vector.shape_cast %94 : vector<1x128x128xbf16> to vector<128x128xbf16>
    %cst_35 = arith.constant dense<0.000000e+00> : vector<128x128xf32>
    %96 = tpu.matmul %93, %95, %cst_35 {dimension_numbers = #tpu.dot_dimension_numbers<[1], [0], [0], [1], [0, 0, 1, 1], [], []>} : vector<128x128xbf16>, vector<128x128xbf16>, vector<128x128xf32> -> vector<128x128xf32>
    %97 = arith.addf %87, %96 : vector<128x128xf32>
    %98 = vector.extract_strided_slice %86 {offsets = [0, 1], sizes = [128, 1], strides = [1, 1]} : vector<128x8xi32> to vector<128x1xi32>
    %99 = vector.broadcast %98 : vector<128x1xi32> to vector<128x128xi32>
    %100 = arith.cmpi eq, %0, %99 : vector<128x128xi32>
    %101 = arith.extui %100 : vector<128x128xi1> to vector<128x128xi32>
    %102 = arith.sitofp %101 : vector<128x128xi32> to vector<128x128xf32>
    %103 = arith.truncf %102 : vector<128x128xf32> to vector<128x128xbf16>
    %c1_36 = arith.constant 1 : index
    %c128_37 = arith.constant 128 : index
    %c0_38 = arith.constant 0 : index
    %104 = vector.load %arg3[%c1_36, %c128_37, %c0_38] : memref<2x1024x128xbf16, #tpu.memory_space<vmem>>, vector<1x128x128xbf16>
    %105 = vector.shape_cast %104 : vector<1x128x128xbf16> to vector<128x128xbf16>
    %cst_39 = arith.constant dense<0.000000e+00> : vector<128x128xf32>
    %106 = tpu.matmul %103, %105, %cst_39 {dimension_numbers = #tpu.dot_dimension_numbers<[1], [0], [0], [1], [0, 0, 1, 1], [], []>} : vector<128x128xbf16>, vector<128x128xbf16>, vector<128x128xf32> -> vector<128x128xf32>
    %107 = arith.addf %97, %106 : vector<128x128xf32>
    %108 = vector.extract_strided_slice %86 {offsets = [0, 2], sizes = [128, 1], strides = [1, 1]} : vector<128x8xi32> to vector<128x1xi32>
    %109 = vector.broadcast %108 : vector<128x1xi32> to vector<128x128xi32>
    %110 = arith.cmpi eq, %0, %109 : vector<128x128xi32>
    %111 = arith.extui %110 : vector<128x128xi1> to vector<128x128xi32>
    %112 = arith.sitofp %111 : vector<128x128xi32> to vector<128x128xf32>
    %113 = arith.truncf %112 : vector<128x128xf32> to vector<128x128xbf16>
    %c1_40 = arith.constant 1 : index
    %c256_41 = arith.constant 256 : index
    %c0_42 = arith.constant 0 : index
    %114 = vector.load %arg3[%c1_40, %c256_41, %c0_42] : memref<2x1024x128xbf16, #tpu.memory_space<vmem>>, vector<1x128x128xbf16>
    %115 = vector.shape_cast %114 : vector<1x128x128xbf16> to vector<128x128xbf16>
    %cst_43 = arith.constant dense<0.000000e+00> : vector<128x128xf32>
    %116 = tpu.matmul %113, %115, %cst_43 {dimension_numbers = #tpu.dot_dimension_numbers<[1], [0], [0], [1], [0, 0, 1, 1], [], []>} : vector<128x128xbf16>, vector<128x128xbf16>, vector<128x128xf32> -> vector<128x128xf32>
    %117 = arith.addf %107, %116 : vector<128x128xf32>
    %118 = vector.extract_strided_slice %86 {offsets = [0, 3], sizes = [128, 1], strides = [1, 1]} : vector<128x8xi32> to vector<128x1xi32>
    %119 = vector.broadcast %118 : vector<128x1xi32> to vector<128x128xi32>
    %120 = arith.cmpi eq, %0, %119 : vector<128x128xi32>
    %121 = arith.extui %120 : vector<128x128xi1> to vector<128x128xi32>
    %122 = arith.sitofp %121 : vector<128x128xi32> to vector<128x128xf32>
    %123 = arith.truncf %122 : vector<128x128xf32> to vector<128x128xbf16>
    %c1_44 = arith.constant 1 : index
    %c384_45 = arith.constant 384 : index
    %c0_46 = arith.constant 0 : index
    %124 = vector.load %arg3[%c1_44, %c384_45, %c0_46] : memref<2x1024x128xbf16, #tpu.memory_space<vmem>>, vector<1x128x128xbf16>
    %125 = vector.shape_cast %124 : vector<1x128x128xbf16> to vector<128x128xbf16>
    %cst_47 = arith.constant dense<0.000000e+00> : vector<128x128xf32>
    %126 = tpu.matmul %123, %125, %cst_47 {dimension_numbers = #tpu.dot_dimension_numbers<[1], [0], [0], [1], [0, 0, 1, 1], [], []>} : vector<128x128xbf16>, vector<128x128xbf16>, vector<128x128xf32> -> vector<128x128xf32>
    %127 = arith.addf %117, %126 : vector<128x128xf32>
    %128 = vector.extract_strided_slice %86 {offsets = [0, 4], sizes = [128, 1], strides = [1, 1]} : vector<128x8xi32> to vector<128x1xi32>
    %129 = vector.broadcast %128 : vector<128x1xi32> to vector<128x128xi32>
    %130 = arith.cmpi eq, %0, %129 : vector<128x128xi32>
    %131 = arith.extui %130 : vector<128x128xi1> to vector<128x128xi32>
    %132 = arith.sitofp %131 : vector<128x128xi32> to vector<128x128xf32>
    %133 = arith.truncf %132 : vector<128x128xf32> to vector<128x128xbf16>
    %c1_48 = arith.constant 1 : index
    %c512_49 = arith.constant 512 : index
    %c0_50 = arith.constant 0 : index
    %134 = vector.load %arg3[%c1_48, %c512_49, %c0_50] : memref<2x1024x128xbf16, #tpu.memory_space<vmem>>, vector<1x128x128xbf16>
    %135 = vector.shape_cast %134 : vector<1x128x128xbf16> to vector<128x128xbf16>
    %cst_51 = arith.constant dense<0.000000e+00> : vector<128x128xf32>
    %136 = tpu.matmul %133, %135, %cst_51 {dimension_numbers = #tpu.dot_dimension_numbers<[1], [0], [0], [1], [0, 0, 1, 1], [], []>} : vector<128x128xbf16>, vector<128x128xbf16>, vector<128x128xf32> -> vector<128x128xf32>
    %137 = arith.addf %127, %136 : vector<128x128xf32>
    %138 = vector.extract_strided_slice %86 {offsets = [0, 5], sizes = [128, 1], strides = [1, 1]} : vector<128x8xi32> to vector<128x1xi32>
    %139 = vector.broadcast %138 : vector<128x1xi32> to vector<128x128xi32>
    %140 = arith.cmpi eq, %0, %139 : vector<128x128xi32>
    %141 = arith.extui %140 : vector<128x128xi1> to vector<128x128xi32>
    %142 = arith.sitofp %141 : vector<128x128xi32> to vector<128x128xf32>
    %143 = arith.truncf %142 : vector<128x128xf32> to vector<128x128xbf16>
    %c1_52 = arith.constant 1 : index
    %c640_53 = arith.constant 640 : index
    %c0_54 = arith.constant 0 : index
    %144 = vector.load %arg3[%c1_52, %c640_53, %c0_54] : memref<2x1024x128xbf16, #tpu.memory_space<vmem>>, vector<1x128x128xbf16>
    %145 = vector.shape_cast %144 : vector<1x128x128xbf16> to vector<128x128xbf16>
    %cst_55 = arith.constant dense<0.000000e+00> : vector<128x128xf32>
    %146 = tpu.matmul %143, %145, %cst_55 {dimension_numbers = #tpu.dot_dimension_numbers<[1], [0], [0], [1], [0, 0, 1, 1], [], []>} : vector<128x128xbf16>, vector<128x128xbf16>, vector<128x128xf32> -> vector<128x128xf32>
    %147 = arith.addf %137, %146 : vector<128x128xf32>
    %148 = vector.extract_strided_slice %86 {offsets = [0, 6], sizes = [128, 1], strides = [1, 1]} : vector<128x8xi32> to vector<128x1xi32>
    %149 = vector.broadcast %148 : vector<128x1xi32> to vector<128x128xi32>
    %150 = arith.cmpi eq, %0, %149 : vector<128x128xi32>
    %151 = arith.extui %150 : vector<128x128xi1> to vector<128x128xi32>
    %152 = arith.sitofp %151 : vector<128x128xi32> to vector<128x128xf32>
    %153 = arith.truncf %152 : vector<128x128xf32> to vector<128x128xbf16>
    %c1_56 = arith.constant 1 : index
    %c768_57 = arith.constant 768 : index
    %c0_58 = arith.constant 0 : index
    %154 = vector.load %arg3[%c1_56, %c768_57, %c0_58] : memref<2x1024x128xbf16, #tpu.memory_space<vmem>>, vector<1x128x128xbf16>
    %155 = vector.shape_cast %154 : vector<1x128x128xbf16> to vector<128x128xbf16>
    %cst_59 = arith.constant dense<0.000000e+00> : vector<128x128xf32>
    %156 = tpu.matmul %153, %155, %cst_59 {dimension_numbers = #tpu.dot_dimension_numbers<[1], [0], [0], [1], [0, 0, 1, 1], [], []>} : vector<128x128xbf16>, vector<128x128xbf16>, vector<128x128xf32> -> vector<128x128xf32>
    %157 = arith.addf %147, %156 : vector<128x128xf32>
    %158 = vector.extract_strided_slice %86 {offsets = [0, 7], sizes = [128, 1], strides = [1, 1]} : vector<128x8xi32> to vector<128x1xi32>
    %159 = vector.broadcast %158 : vector<128x1xi32> to vector<128x128xi32>
    %160 = arith.cmpi eq, %0, %159 : vector<128x128xi32>
    %161 = arith.extui %160 : vector<128x128xi1> to vector<128x128xi32>
    %162 = arith.sitofp %161 : vector<128x128xi32> to vector<128x128xf32>
    %163 = arith.truncf %162 : vector<128x128xf32> to vector<128x128xbf16>
    %c1_60 = arith.constant 1 : index
    %c896_61 = arith.constant 896 : index
    %c0_62 = arith.constant 0 : index
    %164 = vector.load %arg3[%c1_60, %c896_61, %c0_62] : memref<2x1024x128xbf16, #tpu.memory_space<vmem>>, vector<1x128x128xbf16>
    %165 = vector.shape_cast %164 : vector<1x128x128xbf16> to vector<128x128xbf16>
    %cst_63 = arith.constant dense<0.000000e+00> : vector<128x128xf32>
    %166 = tpu.matmul %163, %165, %cst_63 {dimension_numbers = #tpu.dot_dimension_numbers<[1], [0], [0], [1], [0, 0, 1, 1], [], []>} : vector<128x128xbf16>, vector<128x128xbf16>, vector<128x128xf32> -> vector<128x128xf32>
    %167 = arith.addf %157, %166 : vector<128x128xf32>
    %c0_64 = arith.constant 0 : index
    %c128_65 = arith.constant 128 : index
    %168 = vector.load %arg4[%c0_64, %c128_65] : memref<128x256xf32, #tpu.memory_space<vmem>>, vector<128x128xf32>
    tpu.vector_store %arg4[%c0_64, %c128_65], %167 {strides = array<i32>} : memref<128x256xf32, #tpu.memory_space<vmem>>, vector<128x128xf32>,
    return
  }
  func.func @transform_0(%arg0: i32, %arg1: i32) -> (i32, i32, i32) {
    %c0_i32 = arith.constant 0 : i32
    %c0_i32_0 = arith.constant 0 : i32
    return %arg0, %arg1, %c0_i32 : i32, i32, i32
  }
  func.func @transform_1(%arg0: i32, %arg1: i32) -> (i32, i32, i32) {
    %c0_i32 = arith.constant 0 : i32
    %c0_i32_0 = arith.constant 0 : i32
    %c0_i32_1 = arith.constant 0 : i32
    return %arg0, %c0_i32, %c0_i32_0 : i32, i32, i32
  }
  func.func @transform_2(%arg0: i32, %arg1: i32) -> (i32, i32) {
    %c0_i32 = arith.constant 0 : i32
    return %arg1, %arg0 : i32, i32
  }
}

</mosaic_0001>

<bundles_post_ra>
// kernel: tpu_custom_call.1
= control target key start
LH: loop header
LB: loop body
LE: loop exit
PB: predicated region body
PF: predicated region fallthrough
CT: control target
= control target key end

     0   :  { %s9272_s0 = inlined_call_operand.vmem [shape: s32[4,256,8], index: 0, kind: input, shape index: {}]   ;;  %s9273_s1 = inlined_call_operand.hbm [shape: bf16[4,1024,128], index: 1, kind: input, shape index: {}]   ;;  %s9274_s2 = inlined_call_operand.hbm [shape: f32[256,512], index: 2, kind: output, shape index: {}]  }
   0x1   :  { %9296 = sst [smem:[#allocation63_spill]] %s9272_s0 }
   0x2   :  { %7 = vsyncpa [#allocation4], 0 }
   0x3   :  { %9 = vsyncpa [#allocation4 + $0x1], 0 }
   0x4   :  { %10 = vsyncpa [#allocation5], 0 }
   0x5   :  { %12 = vsyncpa [#allocation5 + $0x1], 0  ;;  %s7065_s9 = smov 0   ;;  %s7067_s10 = smov 0  }
   0x6   :  { %s7069_s11 = smov 0   ;;  %s7071_s12 = smov 0  }
   0x7   :  { %s7073_s13 = smov 0   ;;  %s7075_s14 = smov 0  }
   0x8   :  { %s7077_s15 = smov 0   ;;  %s7079_s16 = smov 0  }
   0x9   :  { %s7081_s17 = smov 0   ;;  %s7083_s18 = smov 0  }
   0xa   :  { %s7085_s19 = smov 0  }
   0xb LB: > { %s4993_s20 = sadd.s32 4294967295, %s7032_s19   ;;  %s4994_s21 = sadd.s32 4294967294, %s7032_s19   ;;  %s7032_s19 = sphi %s7085_s19, %s18_s19   ;;  %s7028_s18 = sphi %s7083_s18, %s9462_s18   ;;  %s7024_s17 = sphi %s7081_s17, %s9461_s17   ;;  %s7020_s16 = sphi %s7079_s16, %s9460_s16   ;;  %s7016_s15 = sphi %s7077_s15, %s9459_s15   ;;  %s7012_s14 = sphi %s7075_s14, %s9458_s14   ;;  %s7008_s13 = sphi %s7073_s13, %s9457_s13   ;;  %s7004_s12 = sphi %s7071_s12, %s9456_s12   ;;  %s7000_s11 = sphi %s7069_s11, %s9455_s11   ;;  %s6996_s10 = sphi %s7067_s10, %s9454_s10   ;;  %s6992_s9 = sphi %s7065_s9, %s9453_s9  }
   0xc   : > { %s27_s22 = sadd.s32 1, %s7024_s17  ;;  %s30_s23 = sadd.s32 1, %s7028_s18 }
   0xd   : > { %p28_p0 = scmp.ge.s32.totalorder %s27_s22, 2  ;;  %s39_s24 = sadd.s32 1, %s7012_s14 }
   0xe   : > { %p46_p1 = scmp.ne.s32.totalorder %s7012_s14, %s7008_s13  ;;  %p47_p2 = scmp.eq.s32.totalorder %s7032_s19, 0 }
   0xf   : > { %s9464_s22 = smov (%p28_p0, %s27_s22), 0  ;;  %s9466_s23 = smov (!%p28_p0, %s30_s23), %s7028_s18 }
  0x10   : > { %9297 = sst [smem:[#allocation9_spill]] %s9464_s22  ;;  %s35_s25 = ssub.s32 %s7024_s17, %s9464_s22 }
  0x11   : > { %p7136_p3 = por %p47_p2, %p46_p1  ;;  %p32_p4 = scmp.ge.s32.totalorder %s9466_s23, 2 }
  0x12   : > { %s65_s27 = sadd.s32 1, %s7004_s12  ;;  %p72_p5 = scmp.ne.s32.totalorder %s7004_s12, %s7000_s11 }
  0x13   : > { %p78_p6 = scmp.ne.s32.totalorder %s7000_s11, %s6996_s10  ;;  %s9468_s23 = smov (%p32_p4, %s9466_s23), 0 }
  0x14   : > { %9299 = sst [smem:[#allocation10_spill]] %s9468_s23  ;;  %p7147_p7 = por %p72_p5, %p47_p2 }
  0x15   : > { %p79_p8 = scmp.eq.s32.totalorder %s4993_s20, 0  ;;  %s34_s29 = ssub.s32 %s7028_s18, %s9468_s23 }
  0x16   : > { %p104_p9 = scmp.eq.s32.totalorder %s4993_s20, 3  ;;  %s36_s30 = sor.u32 %s35_s25, %s34_s29 }
  0x17   : > { %p63_p10 = scmp.eq.s32.totalorder %s34_s29, 0  ;;  %p37_p11 = scmp.eq.s32.totalorder %s36_s30, 0 }
  0x18   : > { %p7153_p12 = por %p79_p8, %p78_p6  ;;  %p7166_p13 = por %p104_p9, %p46_p1 }
  0x19   : > { %s7158_s4 = scalar_select %p63_p10, %s7004_s12, %s65_s27  }
  0x1a   : > { %s7161_s5 = scalar_select %p37_p11, %s7012_s14, %s39_s24  }
  0x1b   : > { %p109_p0 = scmp.ne.s32.totalorder %s7008_s13, %s6992_s9  ;;  %p110_p2 = scmp.eq.s32.totalorder %s4994_s21, 3 }
  0x1c   : > { %p4996_p5 = scmp.ge.s32.totalorder %s7032_s19, 4 }
  0x1d   : > { %p7172_p4 = por %p110_p2, %p109_p0 }
  0x1e   : > { %126 = sbr.rel (%p4996_p5) target bundleno = 77 (0x4d), region = 16 }
  0x23   : > { %129 = sbr.rel (!%p7136_p3) target bundleno = 61 (0x3d), region = 20  ;;  %s131_s8 = sand.u32 (%p7136_p3), 1, %s7012_s14  }
  0x24   : > { %s4999_s10 = sshll.u32 (%p7136_p3), %s7024_s17, 4  ;;  %s4997_s20 = sshll.u32 (%p7136_p3), %s131_s8, 8 }
  0x25   : > { %s5801_s24 = sshll.u32 (%p7136_p3), %s7028_s18, 6  ;;  %s9304_s0 = sld [smem:[#allocation63_spill]] (%p7136_p3) }
  0x26   : > { %s137_s25 = sadd.s32 (%p7136_p3), %s5801_s24, %s4999_s10  ;;  %s7190_s26 = scalar_lea.vmem (%p7136_p3), [#allocation2], %s4997_s20 }
  0x27   : > { %s5001_s27 = sshll.u32 (%p7136_p3), %s137_s25, 3 }
  0x2b   : > { %s7185_s30 = scalar_lea.vmem %s9304_s0, %s5001_s27 }
  0x2c   : > { %v230_v0 = vld [vmem:[%s7185_s30] sm:$0xff]  ;;  %v232_v1 = vld [vmem:[%s7185_s30 + $0x8] sm:$0xff]  ;;  %v234_v2 = vld [vmem:[%s7185_s30 + $0x10] sm:$0xff] }
  0x2d   : > { %231 = vst [vmem:[%s7190_s26] sm:$0xff] %v230_v0  ;;  %233 = vst [vmem:[%s7190_s26 + $0x8] sm:$0xff] %v232_v1  ;;  %v236_v3 = vld [vmem:[%s7185_s30 + $0x18] sm:$0xff]  ;;  %v238_v4 = vld [vmem:[%s7185_s30 + $0x20] sm:$0xff] }
  0x2e   : > { %235 = vst [vmem:[%s7190_s26 + $0x10] sm:$0xff] %v234_v2  ;;  %v240_v5 = vld [vmem:[%s7185_s30 + $0x28] sm:$0xff]  ;;  %237 = vst [vmem:[%s7190_s26 + $0x18] sm:$0xff] %v236_v3  ;;  %v242_v6 = vld [vmem:[%s7185_s30 + $0x30] sm:$0xff] }
  0x2f   : > { %239 = vst [vmem:[%s7190_s26 + $0x20] sm:$0xff] %v238_v4  ;;  %241 = vst [vmem:[%s7190_s26 + $0x28] sm:$0xff] %v240_v5  ;;  %v244_v7 = vld [vmem:[%s7185_s30 + $0x38] sm:$0xff]  ;;  %v246_v8 = vld [vmem:[%s7185_s30 + $0x40] sm:$0xff] }
  0x30   : > { %243 = vst [vmem:[%s7190_s26 + $0x30] sm:$0xff] %v242_v6  ;;  %245 = vst [vmem:[%s7190_s26 + $0x38] sm:$0xff] %v244_v7  ;;  %v248_v9 = vld [vmem:[%s7185_s30 + $0x48] sm:$0xff]  ;;  %v250_v10 = vld [vmem:[%s7185_s30 + $0x50] sm:$0xff] }
  0x31   : > { %247 = vst [vmem:[%s7190_s26 + $0x40] sm:$0xff] %v246_v8  ;;  %v252_v11 = vld [vmem:[%s7185_s30 + $0x58] sm:$0xff]  ;;  %249 = vst [vmem:[%s7190_s26 + $0x48] sm:$0xff] %v248_v9  ;;  %v254_v12 = vld [vmem:[%s7185_s30 + $0x60] sm:$0xff] }
  0x32   : > { %251 = vst [vmem:[%s7190_s26 + $0x50] sm:$0xff] %v250_v10  ;;  %253 = vst [vmem:[%s7190_s26 + $0x58] sm:$0xff] %v252_v11  ;;  %v256_v13 = vld [vmem:[%s7185_s30 + $0x68] sm:$0xff]  ;;  %v258_v14 = vld [vmem:[%s7185_s30 + $0x70] sm:$0xff] }
  0x33   : > { %255 = vst [vmem:[%s7190_s26 + $0x60] sm:$0xff] %v254_v12  ;;  %257 = vst [vmem:[%s7190_s26 + $0x68] sm:$0xff] %v256_v13  ;;  %v260_v15 = vld [vmem:[%s7185_s30 + $0x78] sm:$0xff]  ;;  %v262_v16 = vld [vmem:[%s7185_s30 + $0x100] sm:$0xff] }
  0x34   : > { %259 = vst [vmem:[%s7190_s26 + $0x70] sm:$0xff] %v258_v14  ;;  %v264_v17 = vld [vmem:[%s7185_s30 + $0x108] sm:$0xff]  ;;  %261 = vst [vmem:[%s7190_s26 + $0x78] sm:$0xff] %v260_v15  ;;  %v266_v18 = vld [vmem:[%s7185_s30 + $0x110] sm:$0xff] }
  0x35   : > { %263 = vst [vmem:[%s7190_s26 + $0x80] sm:$0xff] %v262_v16  ;;  %265 = vst [vmem:[%s7190_s26 + $0x88] sm:$0xff] %v264_v17  ;;  %v268_v19 = vld [vmem:[%s7185_s30 + $0x118] sm:$0xff]  ;;  %v270_v20 = vld [vmem:[%s7185_s30 + $0x120] sm:$0xff] }
  0x36   : > { %267 = vst [vmem:[%s7190_s26 + $0x90] sm:$0xff] %v266_v18  ;;  %269 = vst [vmem:[%s7190_s26 + $0x98] sm:$0xff] %v268_v19  ;;  %v272_v21 = vld [vmem:[%s7185_s30 + $0x128] sm:$0xff]  ;;  %v274_v22 = vld [vmem:[%s7185_s30 + $0x130] sm:$0xff] }
  0x37   : > { %271 = vst [vmem:[%s7190_s26 + $0xa0] sm:$0xff] %v270_v20  ;;  %v276_v23 = vld [vmem:[%s7185_s30 + $0x138] sm:$0xff]  ;;  %273 = vst [vmem:[%s7190_s26 + $0xa8] sm:$0xff] %v272_v21  ;;  %v278_v24 = vld [vmem:[%s7185_s30 + $0x140] sm:$0xff] }
  0x38   : > { %275 = vst [vmem:[%s7190_s26 + $0xb0] sm:$0xff] %v274_v22  ;;  %277 = vst [vmem:[%s7190_s26 + $0xb8] sm:$0xff] %v276_v23  ;;  %v280_v25 = vld [vmem:[%s7185_s30 + $0x148] sm:$0xff]  ;;  %v282_v26 = vld [vmem:[%s7185_s30 + $0x150] sm:$0xff] }
  0x39   : > { %279 = vst [vmem:[%s7190_s26 + $0xc0] sm:$0xff] %v278_v24  ;;  %281 = vst [vmem:[%s7190_s26 + $0xc8] sm:$0xff] %v280_v25  ;;  %v284_v27 = vld [vmem:[%s7185_s30 + $0x158] sm:$0xff]  ;;  %v286_v28 = vld [vmem:[%s7185_s30 + $0x160] sm:$0xff] }
  0x3a   : > { %283 = vst [vmem:[%s7190_s26 + $0xd0] sm:$0xff] %v282_v26  ;;  %v288_v29 = vld [vmem:[%s7185_s30 + $0x168] sm:$0xff]  ;;  %285 = vst [vmem:[%s7190_s26 + $0xd8] sm:$0xff] %v284_v27  ;;  %v290_v30 = vld [vmem:[%s7185_s30 + $0x170] sm:$0xff] }
  0x3b   : > { %287 = vst [vmem:[%s7190_s26 + $0xe0] sm:$0xff] %v286_v28  ;;  %289 = vst [vmem:[%s7190_s26 + $0xe8] sm:$0xff] %v288_v29  ;;  %v292_v31 = vld [vmem:[%s7185_s30 + $0x178] sm:$0xff] }
  0x3c   : > { %291 = vst [vmem:[%s7190_s26 + $0xf0] sm:$0xff] %v290_v30  ;;  %293 = vst [vmem:[%s7190_s26 + $0xf8] sm:$0xff] %v292_v31 }
  0x3d PF: > { %s300_s8 = sand.u32 1, %s7004_s12   ;;  %s5803_s10 = sshll.u32 %s7028_s18, 14 }
  0x3e   : > { %s5002_s20 = sshll.u32 %s300_s8, 10  ;;  %s311_s27 = scalar_lea.hbm %s9273_s1, %s5803_s10 }
  0x3f   : > { %s304_s21 = scalar_lea.vmem [#allocation3], %s5002_s20  ;;  %s301_s0 = scalar_lea.sflag [#allocation4], %s300_s8 }
  0x40   : > { %s312_s29 = sshll.u32 %s304_s21, 4  ;;  %s7034_s30 = smov [#allocation3]   ;;  %s313_s29 = int_to_ptr.vmem [resolvable:$true] %s312_s29 }
  0x41   : > { %s6898_s23 = scalar_lea.vmem %s313_s29, 16384  ;;  %s6902_s26 = sshll.u32 %s7034_s30, 4  ;;  %s6903_s26 = int_to_ptr.vmem [resolvable:$false] %s6902_s26 }
  0x42   : > { %p6899_p1 = scmp.ne.s32.totalorder %s313_s29, %s6898_s23  ;;  %s6904_s22 = scalar_lea.vmem %s6903_s26, 32768 }
  0x43   : > { %p6905_p8 = scmp.lt.s32.totalorder %s313_s29, %s6903_s26  ;;  %p6906_p9 = scmp.lt.s32.totalorder %s6904_s22, %s6898_s23 }
  0x44   : > { %p6900_p3 = pnand %p6899_p1, %p7147_p7 }
  0x45   : > { %p6907_p10 = por %p6906_p9, %p6905_p8 }
  0x46   : > { %p6901_p6 = pneg %p6900_p3 }
  0x48   : > { %p6908_p11 = pnand %p6907_p10, %p6901_p6 }
  0x4a   : > { %6911 = shalt.err (!%p6908_p11)
}
  0x4b   : > { %s7035_s24 = smov 64   ;;  %s7036_s10 = smov 4  }
  0x4c   : > { %6573 = dma.hbm_to_vmem [thread:$0]  (%p7147_p7), %s311_s27, 16384, %s313_s29, %s301_s0, %s7035_s24, %s7035_s24, %s7036_s10  }
  0x4d PF: > { %p5006_p0 = scmp.ge.s32.totalorder %s7032_s19, 1  ;;  %p320_p2 = scmp.lt.s32.totalorder %s7032_s19, 5 }
  0x4f   : > { %p321_p5 = pnand %p5006_p0, %p320_p2 }
  0x51   : > { %324 = sbr.rel (%p321_p5) target bundleno = 1040 (0x410), region = 62 }
  0x56   : > { %s327_s22 = sand.u32 1, %s7008_s13   ;;  %s333_s23 = sand.u32 1, %s7000_s11  }
  0x57   : > { %s7268_s8 = sshll.u32 %s327_s22, 8  ;;  %s5008_s20 = sshll.u32 %s333_s23, 10 }
  0x58   : > { %s7271_s28 = scalar_lea.vmem [#allocation2], %s7268_s8  ;;  %s334_s0 = scalar_lea.sflag [#allocation4], %s333_s23 }
  0x59   : > { %s7273_s25 = scalar_lea.vmem [#allocation3], %s5008_s20 }
  0x5a   : > { %6983 = dma.done.wait (%p7153_p12), %s334_s0, 16384  }
  0x5b   : > { %6985 = vsyncadd (%p7153_p12), %s334_s0, 4294950912  ;;  %v9291_v32 = vmov 1   ;;  %v7038_v33 = vmov 0   ;;  %v7282_v34 = vld [vmem:[%s7271_s28 + $0x10] sm:$0xff]  ;;  %v7285_v35 = vld [vmem:[%s7271_s28] sm:$0xff]  ;;  %v9289_v52 = vmov 2   ;;  %v368_v13 = vlaneseq }
  0x5c   : > { %6685 = vset.pattern.permute.xlu0 %v9291_v32  ;;  %6684 = vset.pattern.permute.xlu1 %v7038_v33  ;;  %v7290_v36 = vld [vmem:[%s7271_s28 + $0x18] sm:$0xff]  ;;  %v7295_v37 = vld [vmem:[%s7271_s28 + $0x28] sm:$0xff]  ;;  %v6732_v39 = vld [vmem:[%s7273_s25 + $0x70] sm:$0xff]   ;;  %v9285_v60 = vmov 3   ;;  %v9283_v61 = vmov 4   ;;  %v9281_v63 = vmov 5  }
  0x5d   : > { %393 = vperm.xlu1 %6684, %v7282_v34   ;;  %507 = vperm.xlu0 %6685, %v7285_v35   ;;  %v6731_v38 = vld [vmem:[%s7273_s25 + $0x78] sm:$0xff]   ;;  %v6733_v41 = vld [vmem:[%s7273_s25 + $0x68] sm:$0xff]   ;;  %v6734_v43 = vld [vmem:[%s7273_s25 + $0x60] sm:$0xff]   ;;  %v7449_v16 = vand.u32 127, %v368_v13  ;;  %v9279_v18 = vmov 6   ;;  %s8873_s3 = scalar_lea.vmem [#allocation6], %s7268_s8 }
  0x5e   : > { %v7300_v40 = vld [vmem:[%s7271_s28 + $0x38] sm:$0xff]  ;;  %6061 = vmatprep.subr.bf16.mxu0 %v6731_v38  ;;  %v7306_v42 = vld [vmem:[%s7271_s28 + $0x48] sm:$0xff]  ;;  %v6736_v47 = vld [vmem:[%s7273_s25 + $0x50] sm:$0xff]   ;;  %v9287_v20 = vmov 1.0|1.0   ;;  %s5796_s27 = sshll.u32 %s7020_s16, 1 }
  0x5f   : > { %6062 = vmatpush3.bf16.msra.mxu0 %v6731_v38  ;;  %v7312_v44 = vld [vmem:[%s7271_s28 + $0x58] sm:$0xff]  ;;  %v7318_v46 = vld [vmem:[%s7271_s28 + $0x68] sm:$0xff]  ;;  %v6738_v51 = vld [vmem:[%s7273_s25 + $0x40] sm:$0xff]   ;;  %s5804_s21 = sshll.u32 %s7016_s15, 6  ;;  %s4885_s15 = sshll.u32 %s8873_s3, 4  ;;  %s9206_s15 = int_to_ptr.vmem [resolvable:$true] %s4885_s15 }
  0x60   : > { %6063 = vmatprep.subr.bf16.mxu0 %v6732_v39  ;;  %v6735_v45 = vld [vmem:[%s7273_s25 + $0x58] sm:$0xff]   ;;  %v6737_v49 = vld [vmem:[%s7273_s25 + $0x48] sm:$0xff]   ;;  %v7338_v53 = vld [vmem:[%s7271_s28 + $0x20] sm:$0xff]  ;;  %s4882_s29 = sadd.s32 %s5804_s21, %s5796_s27  ;;  %s9212_s10 = scalar_lea.sflag [#allocation5], %s327_s22 }
  0x61   : > { %396 = vperm.xlu1 %6684, %v7290_v36   ;;  %516 = vperm.xlu0 %6685, %v7290_v36   ;;  %v7324_v48 = vld [vmem:[%s7271_s28 + $0x78] sm:$0xff]  ;;  %v7332_v50 = vld [vmem:[%s7271_s28 + $0x8] sm:$0xff]  ;;  %v7343_v54 = vld [vmem:[%s7271_s28 + $0x30] sm:$0xff]  ;;  %s5798_s30 = sshll.u32 %s4882_s29, 7  ;;  %s6912_s23 = scalar_lea.vmem %s9206_s15, 4096 }
  0x62   : > { %v7348_v55 = vld [vmem:[%s7273_s25 + $0xb8] sm:$0xff]   ;;  %v7354_v56 = vld [vmem:[%s7271_s28 + $0x40] sm:$0xff]  ;;  %v7359_v57 = vld [vmem:[%s7271_s28 + $0x50] sm:$0xff]  ;;  %s9204_s24 = scalar_lea.hbm %s9274_s2, %s5798_s30  ;;  %p6913_p7 = scmp.ne.s32.totalorder %s9206_s15, %s6912_s23 }
  0x63   : > { %6064 = vmatpush3.bf16.msra.mxu0 %v6732_v39  ;;  %v7364_v58 = vld [vmem:[%s7271_s28 + $0x60] sm:$0xff]  ;;  %v7369_v59 = vld [vmem:[%s7271_s28 + $0x70] sm:$0xff]  ;;  %v6741_v26 = vld [vmem:[%s7273_s25 + $0xa8] sm:$0xff]   ;;  %s7046_s8 = smov [#allocation6]  }
  0x64   : > { %6065 = vmatprep.subr.bf16.mxu0 %v6733_v41  ;;  %v6740_v23 = vld [vmem:[%s7273_s25 + $0xb0] sm:$0xff]   ;;  %v6742_v29 = vld [vmem:[%s7273_s25 + $0xa0] sm:$0xff]   ;;  %v6743_v38 = vld [vmem:[%s7273_s25 + $0x98] sm:$0xff]   ;;  %p6914_p12 = pnand %p6913_p7, %p7166_p13  ;;  %s6916_s20 = sshll.u32 %s7046_s8, 4  ;;  %s6917_s20 = int_to_ptr.vmem [resolvable:$false] %s6916_s20 }
  0x65   : > { %402 = vperm.xlu1 %6684, %v7295_v37   ;;  %522 = vperm.xlu0 %6685, %v7295_v37   ;;  %p6919_p3 = scmp.lt.s32.totalorder %s9206_s15, %s6917_s20 }
  0x66   : > { %p6915_p1 = pneg %p6914_p12 }
  0x67   : > { %6066 = vmatpush3.bf16.msra.mxu0 %v6733_v41 }
  0x68   : > { %6067 = vmatprep.subr.bf16.mxu0 %v6734_v43 }
  0x69   : > { %408 = vperm.xlu1 %6684, %v7300_v40   ;;  %528 = vperm.xlu0 %6685, %v7300_v40  }
  0x6b   : > { %6068 = vmatpush3.bf16.msra.mxu0 %v6734_v43  ;;  %v6744_v43 = vld [vmem:[%s7273_s25 + $0x90] sm:$0xff]  }
  0x6c   : > { %6069 = vmatprep.subr.bf16.mxu0 %v6735_v45 }
  0x6d   : > { %414 = vperm.xlu1 %6684, %v7306_v42   ;;  %534 = vperm.xlu0 %6685, %v7306_v42  }
  0x6f   : > { %6070 = vmatpush3.bf16.msra.mxu0 %v6735_v45 }
  0x70   : > { %6071 = vmatprep.subr.bf16.mxu0 %v6736_v47 }
  0x71   : > { %420 = vperm.xlu1 %6684, %v7312_v44   ;;  %540 = vperm.xlu0 %6685, %v7312_v44  }
  0x73   : > { %6072 = vmatpush3.bf16.msra.mxu0 %v6736_v47 }
  0x74   : > { %6073 = vmatprep.subr.bf16.mxu0 %v6737_v49 }
  0x75   : > { %426 = vperm.xlu1 %6684, %v7318_v46   ;;  %546 = vperm.xlu0 %6685, %v7318_v46  }
  0x77   : > { %6074 = vmatpush3.bf16.msra.mxu0 %v6737_v49 }
  0x78   : > { %6075 = vmatprep.subr.bf16.mxu0 %v6738_v51 }
  0x79   : > { %432 = vperm.xlu1 %6684, %v7324_v48   ;;  %552 = vperm.xlu0 %6685, %v7324_v48  }
  0x7b   : > { %6076 = vmatpush3.bf16.msra.mxu0 %v6738_v51  ;;  %v9277_v51 = vmov 7  }
  0x7c   : > { %6125 = vmatprep.subr.bf16.mxu0 %v7348_v55 }
  0x7d   : > { %6686 = vset.pattern.permute.xlu1 %v9291_v32  ;;  %6688 = vset.pattern.permute.xlu0 %v9289_v52 }
  0x7e   : > { %510 = vperm.xlu1 %6686, %v7332_v50   ;;  %920 = vperm.xlu0 %6688, %v7332_v50  }
  0x82   : > { %513 = vperm.xlu1 %6686, %v7282_v34   ;;  %929 = vperm.xlu0 %6688, %v7338_v53  }
  0x86   : > { %519 = vperm.xlu1 %6686, %v7338_v53   ;;  %935 = vperm.xlu0 %6688, %v7343_v54  }
  0x8a   : > { %525 = vperm.xlu1 %6686, %v7343_v54   ;;  %941 = vperm.xlu0 %6688, %v7354_v56  }
  0x8e   : > { %531 = vperm.xlu1 %6686, %v7354_v56   ;;  %947 = vperm.xlu0 %6688, %v7359_v57  }
  0x92   : > { %537 = vperm.xlu1 %6686, %v7359_v57   ;;  %953 = vperm.xlu0 %6688, %v7364_v58  }
  0x96   : > { %543 = vperm.xlu1 %6686, %v7364_v58   ;;  %959 = vperm.xlu0 %6688, %v7369_v59  }
  0x9a   : > { %549 = vperm.xlu1 %6686, %v7369_v59   ;;  %6689 = vset.pattern.permute.xlu0 %v9285_v60 }
  0x9b   : > { %1198 = vperm.xlu0 %6689, %v7285_v35  }
  0x9e   : > { %6687 = vset.pattern.permute.xlu1 %v9289_v52 }
  0x9f   : > { %917 = vperm.xlu1 %6687, %v7285_v35   ;;  %1207 = vperm.xlu0 %6689, %v7290_v36  }
  0xa3   : > { %923 = vperm.xlu1 %6687, %v7282_v34   ;;  %1213 = vperm.xlu0 %6689, %v7295_v37  }
  0xa7   : > { %926 = vperm.xlu1 %6687, %v7290_v36   ;;  %1219 = vperm.xlu0 %6689, %v7300_v40  }
  0xab   : > { %932 = vperm.xlu1 %6687, %v7295_v37   ;;  %1225 = vperm.xlu0 %6689, %v7306_v42  }
  0xaf   : > { %938 = vperm.xlu1 %6687, %v7300_v40   ;;  %1231 = vperm.xlu0 %6689, %v7312_v44  }
  0xb3   : > { %944 = vperm.xlu1 %6687, %v7306_v42   ;;  %1237 = vperm.xlu0 %6689, %v7318_v46  }
  0xb7   : > { %950 = vperm.xlu1 %6687, %v7312_v44   ;;  %1243 = vperm.xlu0 %6689, %v7324_v48  }
  0xbb   : > { %956 = vperm.xlu1 %6687, %v7318_v46   ;;  %6692 = vset.pattern.permute.xlu0 %v9283_v61 }
  0xbc   : > { %1482 = vperm.xlu0 %6692, %v7332_v50  }
  0xbf   : > { %962 = vperm.xlu1 %6687, %v7324_v48  }
  0xc0   : > { %1491 = vperm.xlu0 %6692, %v7338_v53  }
  0xc3   : > { %6690 = vset.pattern.permute.xlu1 %v9285_v60 }
  0xc4   : > { %1201 = vperm.xlu1 %6690, %v7332_v50   ;;  %1497 = vperm.xlu0 %6692, %v7343_v54  }
  0xc8   : > { %1204 = vperm.xlu1 %6690, %v7282_v34   ;;  %1503 = vperm.xlu0 %6692, %v7354_v56  }
  0xcc   : > { %1210 = vperm.xlu1 %6690, %v7338_v53   ;;  %1509 = vperm.xlu0 %6692, %v7359_v57  }
  0xd0   : > { %1216 = vperm.xlu1 %6690, %v7343_v54   ;;  %1515 = vperm.xlu0 %6692, %v7364_v58  }
  0xd4   : > { %1222 = vperm.xlu1 %6690, %v7354_v56   ;;  %1521 = vperm.xlu0 %6692, %v7369_v59  }
  0xd8   : > { %v7407_v62 = vpop.permute.xlu1 %393  ;;  %1228 = vperm.xlu1 %6690, %v7359_v57   ;;  %6693 = vset.pattern.permute.xlu0 %v9281_v63  ;;  %v508_v0 = vpop.permute.xlu0 %507 }
  0xd9   : > { %1760 = vperm.xlu0 %6693, %v7285_v35   ;;  %vm554_vm0 = vcmp.eq.s32.totalorder %v7449_v16, %v508_v0  ;;  %v6746_v0 = vld [vmem:[%s7273_s25 + $0x80] sm:$0xff]  }
  0xdc   : > { %v7412_v1 = vpop.permute.xlu1 %396  ;;  %1234 = vperm.xlu1 %6690, %v7364_v58   ;;  %v517_v2 = vpop.permute.xlu0 %516 }
  0xdd   : > { %1769 = vperm.xlu0 %6693, %v7290_v36   ;;  %vm557_vm3 = vcmp.eq.s32.totalorder %v7449_v16, %v517_v2  ;;  %v6758_v2 = vld [vmem:[%s7273_s25 + $0x38] sm:$0xff]  }
  0xde   : > { %6093 = vmatprep.subr.bf16.mxu1 %v6758_v2 }
  0xdf   : > { %6094 = vmatpush3.bf16.msra.mxu1 %v6758_v2  ;;  %v6863_v2 = vld [vmem:[%s7271_s28 + $0x38] sm:$0xff] }
  0xe0   : > { %v7416_v3 = vpop.permute.xlu1 %402  ;;  %1240 = vperm.xlu1 %6690, %v7369_v59   ;;  %v523_v4 = vpop.permute.xlu0 %522 }
  0xe1   : > { %1775 = vperm.xlu0 %6693, %v7295_v37   ;;  %vm559_vm6 = vcmp.eq.s32.totalorder %v7449_v16, %v523_v4 }
  0xe4   : > { %v7420_v5 = vpop.permute.xlu1 %408  ;;  %6691 = vset.pattern.permute.xlu1 %v9283_v61  ;;  %v529_v6 = vpop.permute.xlu0 %528  ;;  %v7799_v61 = vld [vmem:[%s7271_s28 + $0xe8] sm:$0xff] }
  0xe5   : > { %1479 = vperm.xlu1 %6691, %v7285_v35   ;;  %1781 = vperm.xlu0 %6693, %v7300_v40   ;;  %vm561_vm9 = vcmp.eq.s32.totalorder %v7449_v16, %v529_v6 }
  0xe8   : > { %v7425_v7 = vpop.permute.xlu1 %414  ;;  %v7427_v8 = vpop.permute.xlu0 %534 }
  0xe9   : > { %1485 = vperm.xlu1 %6691, %v7282_v34   ;;  %1787 = vperm.xlu0 %6693, %v7306_v42   ;;  %vm563_vm12 = vcmp.eq.s32.totalorder %v7449_v16, %v7427_v8  ;;  %v6747_v8 = vld [vmem:[%s7273_s25 + $0x138] sm:$0xff]  }
  0xec   : > { %v7431_v9 = vpop.permute.xlu1 %420  ;;  %v7433_v10 = vpop.permute.xlu0 %540 }
  0xed   : > { %1488 = vperm.xlu1 %6691, %v7290_v36   ;;  %1793 = vperm.xlu0 %6693, %v7312_v44   ;;  %vm565_vm15 = vcmp.eq.s32.totalorder %v7449_v16, %v7433_v10 }
  0xf0   : > { %v7437_v11 = vpop.permute.xlu1 %426  ;;  %v7439_v12 = vpop.permute.xlu0 %546 }
  0xf1   : > { %1494 = vperm.xlu1 %6691, %v7295_v37   ;;  %1799 = vperm.xlu0 %6693, %v7318_v46  }
  0xf4   : > { %v7443_v14 = vpop.permute.xlu1 %432  ;;  %v7445_v15 = vpop.permute.xlu0 %552 }
  0xf5   : > { %1500 = vperm.xlu1 %6691, %v7300_v40   ;;  %1805 = vperm.xlu0 %6693, %v7324_v48  }
  0xf9   : > { %v511_v17 = vpop.permute.xlu1 %510  ;;  %1506 = vperm.xlu1 %6691, %v7306_v42   ;;  %6696 = vset.pattern.permute.xlu0 %v9279_v18  ;;  %v7454_v19 = vpop.permute.xlu0 %920 }
  0xfa   : > { %2044 = vperm.xlu0 %6696, %v7332_v50   ;;  %vm555_vm1 = vcmp.eq.s32.totalorder %v7449_v16, %v511_v17  ;;  %v6748_v17 = vld [vmem:[%s7273_s25 + $0x130] sm:$0xff]  }
  0xfb   : > { %vm5050_vm2 = vmpackc.low %vm555_vm1, %vm554_vm0 }
  0xfc   : > { %6077 = vmatprep.mubr.msk.bf16.mxu0 %vm5050_vm2, %v9287_v20  ;;  %vm567_vm2 = vcmp.eq.s32.totalorder %v7449_v16, %v7439_v12 }
  0xfd   : > { %v514_v21 = vpop.permute.xlu1 %513  ;;  %1512 = vperm.xlu1 %6691, %v7312_v44   ;;  %v7461_v22 = vpop.permute.xlu0 %929 }
  0xfe   : > { %vm556_vm4 = vcmp.eq.s32.totalorder %v7449_v16, %v514_v21  ;;  %2053 = vperm.xlu0 %6696, %v7338_v53  }
  0xff   : > { %vm5052_vm5 = vmpackc.low %vm557_vm3, %vm556_vm4 }
 0x100   : > { %6078 = vmatmul.mubr.msk.bf16.vlgmr.msra.gmra.mxu0 %vm5052_vm5, %v9287_v20  ;;  %vm569_vm5 = vcmp.eq.s32.totalorder %v7449_v16, %v7445_v15 }
 0x101   : > { %v520_v24 = vpop.permute.xlu1 %519  ;;  %1518 = vperm.xlu1 %6691, %v7318_v46   ;;  %6126 = vmatpush3.bf16.msra.mxu0 %v7348_v55  ;;  %v7470_v25 = vpop.permute.xlu0 %935 }
 0x102   : > { %vm558_vm7 = vcmp.eq.s32.totalorder %v7449_v16, %v520_v24  ;;  %2059 = vperm.xlu0 %6696, %v7343_v54   ;;  %6127 = vmatprep.subr.bf16.mxu0 %v6740_v23 }
 0x103   : > { %vm5054_vm8 = vmpackc.low %vm559_vm6, %vm558_vm7 }
 0x104   : > { %6081 = vmatprep.mubr.msk.bf16.mxu0 %vm5054_vm8, %v9287_v20  ;;  %vm965_vm8 = vcmp.eq.s32.totalorder %v7449_v16, %v7454_v19 }
 0x105   : > { %v526_v27 = vpop.permute.xlu1 %525  ;;  %1524 = vperm.xlu1 %6691, %v7324_v48   ;;  %6128 = vmatpush3.bf16.msra.mxu0 %v6740_v23  ;;  %v7478_v28 = vpop.permute.xlu0 %941 }
 0x106   : > { %vm560_vm10 = vcmp.eq.s32.totalorder %v7449_v16, %v526_v27  ;;  %2065 = vperm.xlu0 %6696, %v7354_v56   ;;  %6129 = vmatprep.subr.bf16.mxu0 %v6741_v26 }
 0x107   : > { %vm5056_vm11 = vmpackc.low %vm561_vm9, %vm560_vm10 }
 0x108   : > { %6082 = vmatmul.mubr.msk.bf16.gmra.mxu0 %vm5056_vm11, %v9287_v20 }
 0x109   : > { %v532_v30 = vpop.permute.xlu1 %531  ;;  %6694 = vset.pattern.permute.xlu1 %v9281_v63  ;;  %6130 = vmatpush3.bf16.msra.mxu0 %v6741_v26  ;;  %v7487_v31 = vpop.permute.xlu0 %947  ;;  %v6768_v26 = vld [vmem:[%s7273_s25 + $0x10] sm:$0xff]  }
 0x10a   : > { %vm562_vm13 = vcmp.eq.s32.totalorder %v7449_v16, %v532_v30  ;;  %1763 = vperm.xlu1 %6694, %v7332_v50   ;;  %2071 = vperm.xlu0 %6696, %v7359_v57   ;;  %v6769_v30 = vld [vmem:[%s7273_s25 + $0x8] sm:$0xff]  }
 0x10b   : > { %vm5058_vm14 = vmpackc.low %vm563_vm12, %vm562_vm13  ;;  %6131 = vmatprep.subr.bf16.mxu0 %v6742_v29 }
 0x10c   : > { %6085 = vmatprep.mubr.msk.bf16.mxu0 %vm5058_vm14, %v9287_v20  ;;  %vm968_vm14 = vcmp.eq.s32.totalorder %v7449_v16, %v7461_v22  ;;  %v6766_v22 = vld [vmem:[%s7273_s25 + $0x18] sm:$0xff]  }
 0x10d   : > { %v538_v39 = vpop.permute.xlu1 %537  ;;  %6132 = vmatpush3.bf16.msra.mxu0 %v6742_v29  ;;  %v7496_v41 = vpop.permute.xlu0 %953 }
 0x10e   : > { %vm564_vm0 = vcmp.eq.s32.totalorder %v7449_v16, %v538_v39  ;;  %1766 = vperm.xlu1 %6694, %v7282_v34   ;;  %2077 = vperm.xlu0 %6696, %v7364_v58   ;;  %v6745_v34 = vld [vmem:[%s7273_s25 + $0x88] sm:$0xff]  }
 0x10f   : > { %vm5060_vm1 = vmpackc.low %vm565_vm15, %vm564_vm0  ;;  %6133 = vmatprep.subr.bf16.mxu0 %v6743_v38 }
 0x110   : > { %6086 = vmatmul.mubr.msk.bf16.gmra.mxu0 %vm5060_vm1, %v9287_v20  ;;  %vm970_vm1 = vcmp.eq.s32.totalorder %v7449_v16, %v7470_v25  ;;  %v6750_v25 = vld [vmem:[%s7273_s25 + $0x120] sm:$0xff]  }
 0x111   : > { %v544_v45 = vpop.permute.xlu1 %543  ;;  %6134 = vmatpush3.bf16.msra.mxu0 %v6743_v38  ;;  %v7505_v47 = vpop.permute.xlu0 %959 }
 0x112   : > { %vm566_vm3 = vcmp.eq.s32.totalorder %v7449_v16, %v544_v45  ;;  %1772 = vperm.xlu1 %6694, %v7338_v53   ;;  %2083 = vperm.xlu0 %6696, %v7369_v59  }
 0x113   : > { %vm5062_vm4 = vmpackc.low %vm567_vm2, %vm566_vm3  ;;  %6135 = vmatprep.subr.bf16.mxu0 %v6744_v43 }
 0x114   : > { %6089 = vmatprep.mubr.msk.bf16.mxu0 %vm5062_vm4, %v9287_v20  ;;  %vm972_vm4 = vcmp.eq.s32.totalorder %v7449_v16, %v7478_v28  ;;  %v6751_v28 = vld [vmem:[%s7273_s25 + $0x118] sm:$0xff]  }
 0x115   : > { %v550_v49 = vpop.permute.xlu1 %549  ;;  %6136 = vmatpush3.bf16.msra.mxu0 %v6744_v43  ;;  %v6770_v43 = vld [vmem:[%s7273_s25] sm:$0xff]  }
 0x116   : > { %vm568_vm6 = vcmp.eq.s32.totalorder %v7449_v16, %v550_v49  ;;  %1778 = vperm.xlu1 %6694, %v7343_v54   ;;  %6697 = vset.pattern.permute.xlu0 %v9277_v51  ;;  %v7517_v55 = vpop.permute.xlu0 %1198  ;;  %v6753_v49 = vld [vmem:[%s7273_s25 + $0x108] sm:$0xff]  }
 0x117   : > { %vm5064_vm7 = vmpackc.low %vm569_vm5, %vm568_vm6  ;;  %2322 = vperm.xlu0 %6697, %v7285_v35   ;;  %6137 = vmatprep.subr.bf16.mxu0 %v6745_v34  ;;  %v6760_v35 = vld [vmem:[%s7273_s25 + $0x30] sm:$0xff]  }
 0x118   : > { %6090 = vmatmul.mubr.msk.bf16.gmra.mxu0 %vm5064_vm7, %v9287_v20  ;;  %6095 = vmatprep.subr.bf16.mxu1 %v6760_v35  ;;  %vm974_vm7 = vcmp.eq.s32.totalorder %v7449_v16, %v7487_v31  ;;  %v6752_v31 = vld [vmem:[%s7273_s25 + $0x110] sm:$0xff]  }
 0x119   : > { %6138 = vmatpush3.bf16.msra.mxu0 %v6745_v34  ;;  %6096 = vmatpush3.bf16.msra.mxu1 %v6760_v35  ;;  %v6862_v34 = vld [vmem:[%s7271_s28 + $0x28] sm:$0xff] }
 0x11a   : > { %1784 = vperm.xlu1 %6694, %v7354_v56   ;;  %v918_v4 = vpop.permute.xlu1 %917  ;;  %v7526_v6 = vpop.permute.xlu0 %1207  ;;  %6139 = vmatprep.subr.bf16.mxu0 %v6746_v0 }
 0x11b   : > { %vm964_vm9 = vcmp.eq.s32.totalorder %v7449_v16, %v918_v4  ;;  %2331 = vperm.xlu0 %6697, %v7290_v36   ;;  %v6762_v36 = vld [vmem:[%s7273_s25 + $0x28] sm:$0xff]  }
 0x11c   : > { %vm5114_vm10 = vmpackc.low %vm965_vm8, %vm964_vm9  ;;  %6097 = vmatprep.subr.bf16.mxu1 %v6762_v36 }
 0x11d   : > { %6141 = vmatprep.mubr.msk.bf16.mxu0 %vm5114_vm10, %v9287_v20  ;;  %6140 = vmatpush3.bf16.msra.mxu0 %v6746_v0  ;;  %vm976_vm10 = vcmp.eq.s32.totalorder %v7449_v16, %v7496_v41  ;;  %v7603_v41 = vld [vmem:[%s7273_s25 + $0xf8] sm:$0xff]  }
 0x11e   : > { %1790 = vperm.xlu1 %6694, %v7359_v57   ;;  %v924_v10 = vpop.permute.xlu1 %923  ;;  %v7534_v12 = vpop.permute.xlu0 %1213  ;;  %6189 = vmatprep.subr.bf16.mxu0 %v6747_v8 }
 0x11f   : > { %2337 = vperm.xlu0 %6697, %v7295_v37   ;;  %vm966_vm11 = vcmp.eq.s32.totalorder %v7449_v16, %v924_v10  ;;  %6098 = vmatpush3.bf16.msra.mxu1 %v6762_v36  ;;  %v6764_v37 = vld [vmem:[%s7273_s25 + $0x20] sm:$0xff]   ;;  %v7619_v36 = vld [vmem:[%s7273_s25 + $0x1b8] sm:$0xff]  }
 0x120   : > { %6099 = vmatprep.subr.bf16.mxu1 %v6764_v37 }
 0x122   : > { %1796 = vperm.xlu1 %6694, %v7364_v58   ;;  %v927_v13 = vpop.permute.xlu1 %926  ;;  %v7539_v15 = vpop.permute.xlu0 %1219 }
 0x123   : > { %vm967_vm12 = vcmp.eq.s32.totalorder %v7449_v16, %v927_v13  ;;  %2343 = vperm.xlu0 %6697, %v7300_v40   ;;  %v6749_v40 = vld [vmem:[%s7273_s25 + $0x128] sm:$0xff]   ;;  %6100 = vmatpush3.bf16.msra.mxu1 %v6764_v37 }
 0x124   : > { %vm5116_vm13 = vmpackc.low %vm967_vm12, %vm966_vm11  ;;  %6101 = vmatprep.subr.bf16.mxu1 %v6766_v22  ;;  %v6866_v37 = vld [vmem:[%s7271_s28 + $0x68] sm:$0xff] }
 0x125   : > { %6142 = vmatmul.mubr.msk.bf16.vlgmr.msra.gmra.mxu0 %vm5116_vm13, %v9287_v20  ;;  %vm978_vm13 = vcmp.eq.s32.totalorder %v7449_v16, %v7505_v47  ;;  %v6864_v47 = vld [vmem:[%s7271_s28 + $0x48] sm:$0xff] }
 0x126   : > { %1802 = vperm.xlu1 %6694, %v7369_v59   ;;  %v933_v19 = vpop.permute.xlu1 %932  ;;  %v7550_v21 = vpop.permute.xlu0 %1225  ;;  %6190 = vmatpush3.bf16.msra.mxu0 %v6747_v8  ;;  %v6754_v8 = vld [vmem:[%s7273_s25 + $0x100] sm:$0xff]  }
 0x127   : > { %vm969_vm15 = vcmp.eq.s32.totalorder %v7449_v16, %v933_v19  ;;  %2349 = vperm.xlu0 %6697, %v7306_v42   ;;  %6191 = vmatprep.subr.bf16.mxu0 %v6748_v17  ;;  %v6859_v42 = vld [vmem:[%s7271_s28] sm:$0xff] }
 0x128   : > { %vm5118_vm0 = vmpackc.low %vm969_vm15, %vm968_vm14  ;;  %6102 = vmatpush3.bf16.msra.mxu1 %v6766_v22 }
 0x129   : > { %6145 = vmatprep.mubr.msk.bf16.mxu0 %vm5118_vm0, %v9287_v20  ;;  %6103 = vmatprep.subr.bf16.mxu1 %v6768_v26 }
 0x12a   : > { %6695 = vset.pattern.permute.xlu1 %v9279_v18  ;;  %v939_v23 = vpop.permute.xlu1 %938  ;;  %v7560_v24 = vpop.permute.xlu0 %1231  ;;  %6192 = vmatpush3.bf16.msra.mxu0 %v6748_v17  ;;  %v6787_v18 = vld [vmem:[%s7273_s25 + $0x278] sm:$0xff]  }
 0x12b   : > { %vm971_vm2 = vcmp.eq.s32.totalorder %v7449_v16, %v939_v23  ;;  %2041 = vperm.xlu1 %6695, %v6859_v42   ;;  %2355 = vperm.xlu0 %6697, %v7312_v44   ;;  %v7574_v44 = vld [vmem:[%s7271_s28 + $0x10] sm:$0xff] }
 0x12c   : > { %vm5120_vm3 = vmpackc.low %vm971_vm2, %vm970_vm1  ;;  %6193 = vmatprep.subr.bf16.mxu0 %v6749_v40  ;;  %6104 = vmatpush3.bf16.msra.mxu1 %v6768_v26  ;;  %v6868_v26 = vld [vmem:[%s7271_s28 + $0x8] sm:$0xff] }
 0x12d   : > { %6146 = vmatmul.mubr.msk.bf16.gmra.mxu0 %vm5120_vm3, %v9287_v20  ;;  %6105 = vmatprep.subr.bf16.mxu1 %v6769_v30 }
 0x12e   : > { %v945_v27 = vpop.permute.xlu1 %944  ;;  %v7570_v29 = vpop.permute.xlu0 %1237  ;;  %6194 = vmatpush3.bf16.msra.mxu0 %v6749_v40 }
 0x12f   : > { %vm973_vm5 = vcmp.eq.s32.totalorder %v7449_v16, %v945_v27  ;;  %2047 = vperm.xlu1 %6695, %v7574_v44   ;;  %2361 = vperm.xlu0 %6697, %v7318_v46   ;;  %v6861_v46 = vld [vmem:[%s7271_s28 + $0x18] sm:$0xff] }
 0x130   : > { %vm5122_vm6 = vmpackc.low %vm973_vm5, %vm972_vm4  ;;  %6195 = vmatprep.subr.bf16.mxu0 %v6750_v25  ;;  %6106 = vmatpush3.bf16.msra.mxu1 %v6769_v30  ;;  %v7655_v30 = vld [vmem:[%s7271_s28 + $0x88] sm:$0xff] }
 0x131   : > { %6149 = vmatprep.mubr.msk.bf16.mxu0 %vm5122_vm6, %v9287_v20  ;;  %6107 = vmatprep.subr.bf16.mxu1 %v6770_v43 }
 0x132   : > { %v951_v38 = vpop.permute.xlu1 %950  ;;  %v7583_v39 = vpop.permute.xlu0 %1243  ;;  %6196 = vmatpush3.bf16.msra.mxu0 %v6750_v25 }
 0x133   : > { %vm975_vm8 = vcmp.eq.s32.totalorder %v7449_v16, %v951_v38  ;;  %2050 = vperm.xlu1 %6695, %v6861_v46   ;;  %2367 = vperm.xlu0 %6697, %v7324_v48   ;;  %v6869_v46 = vld [vmem:[%s7271_s28 + $0x20] sm:$0xff] }
 0x134   : > { %vm5124_vm9 = vmpackc.low %vm975_vm8, %vm974_vm7  ;;  %6197 = vmatprep.subr.bf16.mxu0 %v6751_v28  ;;  %6108 = vmatpush3.bf16.msra.mxu1 %v6770_v43  ;;  %v7664_v43 = vld [vmem:[%s7271_s28 + $0xa0] sm:$0xff] }
 0x135   : > { %6150 = vmatmul.mubr.msk.bf16.gmra.mxu0 %vm5124_vm9, %v9287_v20  ;;  %6157 = vmatprep.subr.bf16.mxu1 %v7603_v41 }
 0x136   : > { %v957_v45 = vpop.permute.xlu1 %956  ;;  %6198 = vmatpush3.bf16.msra.mxu0 %v6751_v28 }
 0x137   : > { %vm977_vm11 = vcmp.eq.s32.totalorder %v7449_v16, %v957_v45  ;;  %2056 = vperm.xlu1 %6695, %v6862_v34   ;;  %6699 = vset.pattern.permute.xlu0 %v7038_v33  ;;  %v7596_v48 = vpop.permute.xlu0 %1482  ;;  %v7673_v34 = vld [vmem:[%s7271_s28 + $0xb0] sm:$0xff] }
 0x138   : > { %vm5126_vm12 = vmpackc.low %vm977_vm11, %vm976_vm10  ;;  %387 = vperm.xlu0 %6699, %v6859_v42   ;;  %6199 = vmatprep.subr.bf16.mxu0 %v6752_v31  ;;  %vm1527_vm0 = vcmp.eq.s32.totalorder %v7449_v16, %v7596_v48 }
 0x139   : > { %6153 = vmatprep.mubr.msk.bf16.mxu0 %vm5126_vm12, %v9287_v20 }
 0x13a   : > { %v963_v0 = vpop.permute.xlu1 %962  ;;  %6200 = vmatpush3.bf16.msra.mxu0 %v6752_v31 }
 0x13b   : > { %vm979_vm14 = vcmp.eq.s32.totalorder %v7449_v16, %v963_v0  ;;  %2062 = vperm.xlu1 %6695, %v6863_v2   ;;  %v7607_v4 = vpop.permute.xlu0 %1491  ;;  %6201 = vmatprep.subr.bf16.mxu0 %v6753_v49 }
 0x13c   : > { %vm5128_vm15 = vmpackc.low %vm979_vm14, %vm978_vm13  ;;  %390 = vperm.xlu0 %6699, %v7332_v50   ;;  %v6865_v50 = vld [vmem:[%s7271_s28 + $0x58] sm:$0xff]  ;;  %vm1530_vm6 = vcmp.eq.s32.totalorder %v7449_v16, %v7607_v4  ;;  %v6757_v4 = vld [vmem:[%s7273_s25 + $0x1a8] sm:$0xff]  }
 0x13d   : > { %6154 = vmatmul.mubr.msk.bf16.gmra.mxu0 %vm5128_vm15, %v9287_v20 }
 0x13e   : > { %6202 = vmatpush3.bf16.msra.mxu0 %v6753_v49 }
 0x13f   : > { %2068 = vperm.xlu1 %6695, %v6864_v47   ;;  %v7614_v35 = vpop.permute.xlu1 %1201  ;;  %v7616_v10 = vpop.permute.xlu0 %1497  ;;  %6203 = vmatprep.subr.bf16.mxu0 %v6754_v8 }
 0x140   : > { %399 = vperm.xlu0 %6699, %v7338_v53   ;;  %v6867_v53 = vld [vmem:[%s7271_s28 + $0x78] sm:$0xff]  ;;  %vm1532_vm9 = vcmp.eq.s32.totalorder %v7449_v16, %v7616_v10 }
 0x142   : > { %6204 = vmatpush3.bf16.msra.mxu0 %v6754_v8 }
 0x143   : > { %2074 = vperm.xlu1 %6695, %v6865_v50   ;;  %v7623_v13 = vpop.permute.xlu1 %1204  ;;  %v7625_v17 = vpop.permute.xlu0 %1503  ;;  %6253 = vmatprep.subr.bf16.mxu0 %v7619_v36  ;;  %v6756_v50 = vld [vmem:[%s7273_s25 + $0x1b0] sm:$0xff]  }
 0x144   : > { %405 = vperm.xlu0 %6699, %v7343_v54   ;;  %vm1534_vm12 = vcmp.eq.s32.totalorder %v7449_v16, %v7625_v17  ;;  %v6761_v17 = vld [vmem:[%s7273_s25 + $0x198] sm:$0xff]  }
 0x147   : > { %2080 = vperm.xlu1 %6695, %v6866_v37   ;;  %v7630_v19 = vpop.permute.xlu1 %1210  ;;  %v7632_v40 = vpop.permute.xlu0 %1509 }
 0x148   : > { %411 = vperm.xlu0 %6699, %v7354_v56   ;;  %vm1536_vm15 = vcmp.eq.s32.totalorder %v7449_v16, %v7632_v40  ;;  %v6763_v40 = vld [vmem:[%s7273_s25 + $0x190] sm:$0xff]  }
 0x14b   : > { %2086 = vperm.xlu1 %6695, %v6867_v53   ;;  %v7636_v22 = vpop.permute.xlu1 %1216  ;;  %v7638_v23 = vpop.permute.xlu0 %1515  ;;  %v7712_v53 = vld [vmem:[%s7271_s28 + $0xf0] sm:$0xff] }
 0x14c   : > { %417 = vperm.xlu0 %6699, %v7359_v57  }
 0x14f   : > { %6698 = vset.pattern.permute.xlu1 %v9277_v51  ;;  %v7642_v42 = vpop.permute.xlu1 %1222  ;;  %v7644_v25 = vpop.permute.xlu0 %1521  ;;  %v7789_v51 = vld [vmem:[%s7271_s28 + $0xd8] sm:$0xff] }
 0x150   : > { %2325 = vperm.xlu1 %6698, %v6868_v26   ;;  %423 = vperm.xlu0 %6699, %v7364_v58   ;;  %v7716_v26 = vld [vmem:[%s7271_s28 + $0x80] sm:$0xff] }
 0x153   : > { %v7648_v27 = vpop.permute.xlu1 %1228 }
 0x154   : > { %2328 = vperm.xlu1 %6698, %v7574_v44   ;;  %429 = vperm.xlu0 %6699, %v7369_v59   ;;  %v7652_v28 = vpop.permute.xlu0 %1760 }
 0x157   : > { %v7657_v38 = vpop.permute.xlu1 %1234 }
 0x158   : > { %2334 = vperm.xlu1 %6698, %v6869_v46   ;;  %v7660_v31 = vpop.permute.xlu0 %1769  ;;  %2639 = vperm.xlu0 %6699, %v7655_v30  }
 0x15b   : > { %v7666_v45 = vpop.permute.xlu1 %1240 }
 0x15c   : > { %2340 = vperm.xlu1 %6698, %v7343_v54   ;;  %v7669_v44 = vpop.permute.xlu0 %1775  ;;  %2648 = vperm.xlu0 %6699, %v7664_v43   ;;  %v7683_v54 = vld [vmem:[%s7271_s28 + $0xc0] sm:$0xff] }
 0x160   : > { %2346 = vperm.xlu1 %6698, %v7354_v56   ;;  %v1480_v49 = vpop.permute.xlu1 %1479  ;;  %v7678_v0 = vpop.permute.xlu0 %1781  ;;  %2654 = vperm.xlu0 %6699, %v7673_v34   ;;  %v7691_v56 = vld [vmem:[%s7271_s28 + $0xd0] sm:$0xff] }
 0x161   : > { %vm1526_vm1 = vcmp.eq.s32.totalorder %v7449_v16, %v1480_v49 }
 0x162   : > { %vm5194_vm2 = vmpackc.low %vm1527_vm0, %vm1526_vm1 }
 0x163   : > { %6205 = vmatprep.mubr.msk.bf16.mxu0 %vm5194_vm2, %v9287_v20  ;;  %vm1538_vm2 = vcmp.eq.s32.totalorder %v7449_v16, %v7638_v23  ;;  %v6765_v23 = vld [vmem:[%s7273_s25 + $0x188] sm:$0xff]  }
 0x164   : > { %2352 = vperm.xlu1 %6698, %v7359_v57   ;;  %v1486_v2 = vpop.permute.xlu1 %1485  ;;  %v7687_v48 = vpop.permute.xlu0 %1787  ;;  %2660 = vperm.xlu0 %6699, %v7683_v54   ;;  %v7700_v57 = vld [vmem:[%s7271_s28 + $0xe0] sm:$0xff] }
 0x165   : > { %9305 = vst [vmem:[#allocation11_spill] sm:$0xff] %v7687_v48  ;;  %vm1528_vm3 = vcmp.eq.s32.totalorder %v7449_v16, %v1486_v2  ;;  %v7742_v2 = vld [vmem:[%s7271_s28 + $0x98] sm:$0xff] }
 0x168   : > { %2358 = vperm.xlu1 %6698, %v7364_v58   ;;  %v1489_v8 = vpop.permute.xlu1 %1488  ;;  %v7694_v47 = vpop.permute.xlu0 %1793  ;;  %2666 = vperm.xlu0 %6699, %v7691_v56  }
 0x169   : > { %9306 = vst [vmem:[#allocation12_spill] sm:$0xff] %v7694_v47  ;;  %vm1529_vm4 = vcmp.eq.s32.totalorder %v7449_v16, %v1489_v8 }
 0x16a   : > { %vm5196_vm5 = vmpackc.low %vm1529_vm4, %vm1528_vm3 }
 0x16b   : > { %6206 = vmatmul.mubr.msk.bf16.vlgmr.msra.gmra.mxu0 %vm5196_vm5, %v9287_v20  ;;  %vm1540_vm5 = vcmp.eq.s32.totalorder %v7449_v16, %v7644_v25  ;;  %v6767_v25 = vld [vmem:[%s7273_s25 + $0x180] sm:$0xff]  }
 0x16c   : > { %2364 = vperm.xlu1 %6698, %v7369_v59   ;;  %v1495_v58 = vpop.permute.xlu1 %1494  ;;  %v7707_v37 = vpop.permute.xlu0 %1799  ;;  %2672 = vperm.xlu0 %6699, %v7700_v57  }
 0x16d   : > { %9307 = vst [vmem:[#allocation13_spill] sm:$0xff] %v7707_v37  ;;  %vm1531_vm7 = vcmp.eq.s32.totalorder %v7449_v16, %v1495_v58  ;;  %6254 = vmatpush3.bf16.msra.mxu0 %v7619_v36  ;;  %v7729_v36 = vld [vmem:[%s7271_s28 + $0x90] sm:$0xff]  ;;  %v7754_v58 = vld [vmem:[%s7271_s28 + $0xa8] sm:$0xff]  ;;  %v9313_v37 = vmov 2  }
 0x16e   : > { %vm5198_vm8 = vmpackc.low %vm1531_vm7, %vm1530_vm6  ;;  %6255 = vmatprep.subr.bf16.mxu0 %v6756_v50 }
 0x16f   : > { %6209 = vmatprep.mubr.msk.bf16.mxu0 %vm5198_vm8, %v9287_v20 }
 0x170   : > { %6700 = vset.pattern.permute.xlu1 %v7038_v33  ;;  %v1501_v59 = vpop.permute.xlu1 %1500  ;;  %v7723_v46 = vpop.permute.xlu0 %1805  ;;  %2678 = vperm.xlu0 %6699, %v7712_v53   ;;  %v6759_v33 = vld [vmem:[%s7273_s25 + $0x1a0] sm:$0xff]  }
 0x171   : > { %9308 = vst [vmem:[#allocation14_spill] sm:$0xff] %v7723_v46  ;;  %vm1533_vm10 = vcmp.eq.s32.totalorder %v7449_v16, %v1501_v59  ;;  %2636 = vperm.xlu1 %6700, %v7716_v26   ;;  %6256 = vmatpush3.bf16.msra.mxu0 %v6756_v50 }
 0x172   : > { %vm5200_vm11 = vmpackc.low %vm1533_vm10, %vm1532_vm9  ;;  %6257 = vmatprep.subr.bf16.mxu0 %v6757_v4 }
 0x173   : > { %6210 = vmatmul.mubr.msk.bf16.gmra.mxu0 %vm5200_vm11, %v9287_v20 }
 0x174   : > { %v1507_v10 = vpop.permute.xlu1 %1506  ;;  %6701 = vset.pattern.permute.xlu0 %v9291_v32 }
 0x175   : > { %vm1535_vm13 = vcmp.eq.s32.totalorder %v7449_v16, %v1507_v10  ;;  %2642 = vperm.xlu1 %6700, %v7729_v36   ;;  %v7738_v49 = vpop.permute.xlu0 %2044  ;;  %2757 = vperm.xlu0 %6701, %v7716_v26  }
 0x176   : > { %vm5202_vm14 = vmpackc.low %vm1535_vm13, %vm1534_vm12  ;;  %6258 = vmatpush3.bf16.msra.mxu0 %v6757_v4  ;;  %vm2089_vm8 = vcmp.eq.s32.totalorder %v7449_v16, %v7738_v49 }
 0x177   : > { %6213 = vmatprep.mubr.msk.bf16.mxu0 %vm5202_vm14, %v9287_v20  ;;  %6259 = vmatprep.subr.bf16.mxu0 %v6759_v33 }
 0x178   : > { %v1513_v8 = vpop.permute.xlu1 %1512 }
 0x179   : > { %vm1537_vm0 = vcmp.eq.s32.totalorder %v7449_v16, %v1513_v8  ;;  %2645 = vperm.xlu1 %6700, %v7742_v2   ;;  %v7750_v50 = vpop.permute.xlu0 %2053  ;;  %2766 = vperm.xlu0 %6701, %v7742_v2  }
 0x17a   : > { %vm5204_vm1 = vmpackc.low %vm1537_vm0, %vm1536_vm15  ;;  %6260 = vmatpush3.bf16.msra.mxu0 %v6759_v33  ;;  %v7766_v33 = vld [vmem:[%s7271_s28 + $0xb8] sm:$0xff]  ;;  %vm2092_vm14 = vcmp.eq.s32.totalorder %v7449_v16, %v7750_v50 }
 0x17b   : > { %6214 = vmatmul.mubr.msk.bf16.gmra.mxu0 %vm5204_vm1, %v9287_v20  ;;  %6261 = vmatprep.subr.bf16.mxu0 %v6761_v17 }
 0x17c   : > { %v1519_v4 = vpop.permute.xlu1 %1518 }
 0x17d   : > { %vm1539_vm3 = vcmp.eq.s32.totalorder %v7449_v16, %v1519_v4  ;;  %2651 = vperm.xlu1 %6700, %v7754_v58   ;;  %v7762_v59 = vpop.permute.xlu0 %2059  ;;  %2772 = vperm.xlu0 %6701, %v7754_v58  }
 0x17e   : > { %vm5206_vm4 = vmpackc.low %vm1539_vm3, %vm1538_vm2  ;;  %6262 = vmatpush3.bf16.msra.mxu0 %v6761_v17  ;;  %v7778_v17 = vld [vmem:[%s7271_s28 + $0xc8] sm:$0xff]  ;;  %vm2094_vm1 = vcmp.eq.s32.totalorder %v7449_v16, %v7762_v59  ;;  %vm437_vm3 = vcmp.eq.s32.totalorder %v7449_v16, %v7412_v1  ;;  %v6772_v1 = vld [vmem:[%s7273_s25 + $0xf0] sm:$0xff]  }
 0x17f   : > { %6217 = vmatprep.mubr.msk.bf16.mxu0 %vm5206_vm4, %v9287_v20  ;;  %6263 = vmatprep.subr.bf16.mxu0 %v6763_v40 }
 0x180   : > { %v1525_v10 = vpop.permute.xlu1 %1524 }
 0x181   : > { %vm1541_vm6 = vcmp.eq.s32.totalorder %v7449_v16, %v1525_v10  ;;  %2657 = vperm.xlu1 %6700, %v7766_v33   ;;  %v7774_v8 = vpop.permute.xlu0 %2065  ;;  %2778 = vperm.xlu0 %6701, %v7766_v33  }
 0x182   : > { %vm5208_vm7 = vmpackc.low %vm1541_vm6, %vm1540_vm5  ;;  %6264 = vmatpush3.bf16.msra.mxu0 %v6763_v40 }
 0x183   : > { %6218 = vmatmul.mubr.msk.bf16.gmra.mxu0 %vm5208_vm7, %v9287_v20  ;;  %6265 = vmatprep.subr.bf16.mxu0 %v6765_v23  ;;  %vm436_vm7 = vcmp.eq.s32.totalorder %v7449_v16, %v7407_v62 }
 0x185   : > { %2663 = vperm.xlu1 %6700, %v7778_v17   ;;  %v7783_v4 = vpop.permute.xlu1 %1763  ;;  %v7785_v10 = vpop.permute.xlu0 %2071  ;;  %2784 = vperm.xlu0 %6701, %v7778_v17  }
 0x186   : > { %6266 = vmatpush3.bf16.msra.mxu0 %v6765_v23  ;;  %v7808_v23 = vld [vmem:[%s7271_s28 + $0xf8] sm:$0xff] }
 0x187   : > { %6267 = vmatprep.subr.bf16.mxu0 %v6767_v25 }
 0x189   : > { %2669 = vperm.xlu1 %6700, %v7789_v51   ;;  %v7793_v40 = vpop.permute.xlu1 %1766  ;;  %v7795_v63 = vpop.permute.xlu0 %2077  ;;  %2790 = vperm.xlu0 %6701, %v7789_v51  }
 0x18a   : > { %6268 = vmatpush3.bf16.msra.mxu0 %v6767_v25  ;;  %v9311_v25 = vmov 1  }
 0x18b   : > { %6317 = vmatprep.subr.bf16.mxu0 %v6787_v18 }
 0x18d   : > { %2675 = vperm.xlu1 %6700, %v7799_v61   ;;  %v7802_v60 = vpop.permute.xlu1 %1772  ;;  %v7804_v20 = vpop.permute.xlu0 %2083  ;;  %2796 = vperm.xlu0 %6701, %v7799_v61  }
 0x191   : > { %2681 = vperm.xlu1 %6700, %v7808_v23   ;;  %v7811_v52 = vpop.permute.xlu1 %1778  ;;  %2802 = vperm.xlu0 %6701, %v7808_v23  }
 0x192   : > { %9309 = vst [vmem:[#allocation15_spill] sm:$0xff] %v7811_v52  ;;  %v7814_v32 = vpop.permute.xlu0 %2322 }
 0x193   : > { %9310 = vst [vmem:[#allocation16_spill] sm:$0xff] %v7814_v32 }
 0x195   : > { %6702 = vset.pattern.permute.xlu1 %v9311_v25  ;;  %v7817_v46 = vpop.permute.xlu1 %1784  ;;  %6704 = vset.pattern.permute.xlu0 %v9313_v37 }
 0x196   : > { %9312 = vst [vmem:[#allocation17_spill] sm:$0xff] %v7817_v46  ;;  %2760 = vperm.xlu1 %6702, %v7655_v30   ;;  %v7821_v47 = vpop.permute.xlu0 %2331  ;;  %3170 = vperm.xlu0 %6704, %v7655_v30  }
 0x197   : > { %9314 = vst [vmem:[#allocation18_spill] sm:$0xff] %v7821_v47 }
 0x199   : > { %v7824_v48 = vpop.permute.xlu1 %1790 }
 0x19a   : > { %9315 = vst [vmem:[#allocation19_spill] sm:$0xff] %v7824_v48  ;;  %2763 = vperm.xlu1 %6702, %v7729_v36   ;;  %v7827_v52 = vpop.permute.xlu0 %2337  ;;  %3179 = vperm.xlu0 %6704, %v7664_v43  }
 0x19b   : > { %9316 = vst [vmem:[#allocation20_spill] sm:$0xff] %v7827_v52 }
 0x19d   : > { %v7830_v32 = vpop.permute.xlu1 %1796 }
 0x19e   : > { %9317 = vst [vmem:[#allocation21_spill] sm:$0xff] %v7830_v32  ;;  %2769 = vperm.xlu1 %6702, %v7664_v43   ;;  %v7833_v25 = vpop.permute.xlu0 %2343  ;;  %3185 = vperm.xlu0 %6704, %v7673_v34  }
 0x19f   : > { %9318 = vst [vmem:[#allocation22_spill] sm:$0xff] %v7833_v25  ;;  %v9322_v25 = vmov 1.0|1.0  }
 0x1a1   : > { %v7836_v46 = vpop.permute.xlu1 %1802 }
 0x1a2   : > { %9319 = vst [vmem:[#allocation23_spill] sm:$0xff] %v7836_v46  ;;  %2775 = vperm.xlu1 %6702, %v7673_v34   ;;  %v7839_v47 = vpop.permute.xlu0 %2349  ;;  %3188 = vperm.xlu0 %6704, %v7766_v33  }
 0x1a3   : > { %9320 = vst [vmem:[#allocation24_spill] sm:$0xff] %v7839_v47 }
 0x1a6   : > { %2781 = vperm.xlu1 %6702, %v7683_v54   ;;  %v2042_v52 = vpop.permute.xlu1 %2041  ;;  %v7845_v32 = vpop.permute.xlu0 %2355  ;;  %3194 = vperm.xlu0 %6704, %v7778_v17  }
 0x1a7   : > { %9321 = vst [vmem:[#allocation25_spill] sm:$0xff] %v7845_v32  ;;  %vm2088_vm9 = vcmp.eq.s32.totalorder %v7449_v16, %v2042_v52  ;;  %v9325_v32 = vmov 3   ;;  %v6789_v52 = vld [vmem:[%s7273_s25 + $0x270] sm:$0xff]  }
 0x1a8   : > { %vm5274_vm10 = vmpackc.low %vm2089_vm8, %vm2088_vm9  ;;  %vm2096_vm8 = vcmp.eq.s32.totalorder %v7449_v16, %v7774_v8  ;;  %v6774_v8 = vld [vmem:[%s7273_s25 + $0xe0] sm:$0xff]  }
 0x1a9   : > { %6269 = vmatprep.mubr.msk.bf16.mxu0 %vm5274_vm10, %v9322_v25  ;;  %vm5076_vm10 = vmpackc.low %vm437_vm3, %vm436_vm7 }
 0x1aa   : > { %2787 = vperm.xlu1 %6702, %v7691_v56   ;;  %v2048_v47 = vpop.permute.xlu1 %2047  ;;  %v7851_v46 = vpop.permute.xlu0 %2361  ;;  %3206 = vperm.xlu0 %6704, %v7799_v61  }
 0x1ab   : > { %9323 = vst [vmem:[#allocation26_spill] sm:$0xff] %v7851_v46  ;;  %vm2090_vm11 = vcmp.eq.s32.totalorder %v7449_v16, %v2048_v47  ;;  %v6791_v47 = vld [vmem:[%s7273_s25 + $0x268] sm:$0xff]  }
 0x1ae   : > { %2793 = vperm.xlu1 %6702, %v7700_v57   ;;  %v2051_v49 = vpop.permute.xlu1 %2050  ;;  %v7855_v48 = vpop.permute.xlu0 %2367  ;;  %6709 = vset.pattern.permute.xlu0 %v9325_v32 }
 0x1af   : > { %9324 = vst [vmem:[#allocation27_spill] sm:$0xff] %v7855_v48  ;;  %vm2091_vm12 = vcmp.eq.s32.totalorder %v7449_v16, %v2051_v49  ;;  %3451 = vperm.xlu0 %6709, %v7655_v30   ;;  %v6797_v49 = vld [vmem:[%s7273_s25 + $0x250] sm:$0xff]  }
 0x1b0   : > { %vm5276_vm13 = vmpackc.low %vm2091_vm12, %vm2090_vm11  ;;  %vm439_vm12 = vcmp.eq.s32.totalorder %v7449_v16, %v7416_v3  ;;  %v6795_v3 = vld [vmem:[%s7273_s25 + $0x258] sm:$0xff]  }
 0x1b1   : > { %6270 = vmatmul.mubr.msk.bf16.vlgmr.msra.gmra.mxu0 %vm5276_vm13, %v9322_v25 }
 0x1b2   : > { %2799 = vperm.xlu1 %6702, %v7712_v53   ;;  %v2057_v46 = vpop.permute.xlu1 %2056  ;;  %6318 = vmatpush3.bf16.msra.mxu0 %v6787_v18 }
 0x1b3   : > { %vm2093_vm15 = vcmp.eq.s32.totalorder %v7449_v16, %v2057_v46  ;;  %v388_v48 = vpop.permute.xlu0 %387  ;;  %3466 = vperm.xlu0 %6709, %v7673_v34   ;;  %6319 = vmatprep.subr.bf16.mxu0 %v6789_v52  ;;  %v6773_v46 = vld [vmem:[%s7273_s25 + $0xe8] sm:$0xff]  }
 0x1b4   : > { %vm5278_vm0 = vmpackc.low %vm2093_vm15, %vm2092_vm14  ;;  %vm434_vm2 = vcmp.eq.s32.totalorder %v7449_v16, %v388_v48  ;;  %v6793_v48 = vld [vmem:[%s7273_s25 + $0x260] sm:$0xff]   ;;  %vm2098_vm15 = vcmp.eq.s32.totalorder %v7449_v16, %v7785_v10 }
 0x1b5   : > { %6273 = vmatprep.mubr.msk.bf16.mxu0 %vm5278_vm0, %v9322_v25 }
 0x1b6   : > { %6703 = vset.pattern.permute.xlu1 %v9313_v37  ;;  %v2063_v50 = vpop.permute.xlu1 %2062  ;;  %6320 = vmatpush3.bf16.msra.mxu0 %v6789_v52 }
 0x1b7   : > { %vm2095_vm4 = vcmp.eq.s32.totalorder %v7449_v16, %v2063_v50  ;;  %3167 = vperm.xlu1 %6703, %v7716_v26   ;;  %v391_v18 = vpop.permute.xlu0 %390  ;;  %3472 = vperm.xlu0 %6709, %v7683_v54   ;;  %v9326_v50 = vmov 4  }
 0x1b8   : > { %vm5280_vm5 = vmpackc.low %vm2095_vm4, %vm2094_vm1  ;;  %vm435_vm6 = vcmp.eq.s32.totalorder %v7449_v16, %v391_v18  ;;  %6321 = vmatprep.subr.bf16.mxu0 %v6791_v47 }
 0x1b9   : > { %6274 = vmatmul.mubr.msk.bf16.gmra.mxu0 %vm5280_vm5, %v9322_v25  ;;  %vm5074_vm9 = vmpackc.low %vm435_vm6, %vm434_vm2  ;;  %vm441_vm2 = vcmp.eq.s32.totalorder %v7449_v16, %v7420_v5  ;;  %vm2100_vm5 = vcmp.eq.s32.totalorder %v7449_v16, %v7795_v63  ;;  %v6775_v63 = vld [vmem:[%s7273_s25 + $0xd8] sm:$0xff]  }
 0x1ba   : > { %v2069_v34 = vpop.permute.xlu1 %2068  ;;  %6109 = vmatprep.mubr.msk.bf16.mxu1 %vm5074_vm9, %v9322_v25  ;;  %6322 = vmatpush3.bf16.msra.mxu0 %v6791_v47  ;;  %v6799_v47 = vld [vmem:[%s7273_s25 + $0x248] sm:$0xff]  }
 0x1bb   : > { %vm2097_vm11 = vcmp.eq.s32.totalorder %v7449_v16, %v2069_v34  ;;  %3173 = vperm.xlu1 %6703, %v7729_v36   ;;  %6110 = vmatmul.mubr.msk.bf16.vlgmr.msra.gmra.mxu1 %vm5076_vm10, %v9322_v25  ;;  %v400_v62 = vpop.permute.xlu0 %399  ;;  %v6801_v34 = vld [vmem:[%s7273_s25 + $0x240] sm:$0xff]  }
 0x1bc   : > { %vm5282_vm13 = vmpackc.low %vm2097_vm11, %vm2096_vm8  ;;  %vm438_vm14 = vcmp.eq.s32.totalorder %v7449_v16, %v400_v62  ;;  %6158 = vmatpush3.bf16.msra.mxu1 %v7603_v41  ;;  %3481 = vperm.xlu0 %6709, %v7789_v51   ;;  %vm443_vm8 = vcmp.eq.s32.totalorder %v7449_v16, %v7425_v7  ;;  %vm2102_vm11 = vcmp.eq.s32.totalorder %v7449_v16, %v7804_v20  ;;  %v6776_v20 = vld [vmem:[%s7273_s25 + $0xd0] sm:$0xff]  }
 0x1bd   : > { %vm5078_vm0 = vmpackc.low %vm439_vm12, %vm438_vm14  ;;  %6277 = vmatprep.mubr.msk.bf16.mxu0 %vm5282_vm13, %v9322_v25  ;;  %6159 = vmatprep.subr.bf16.mxu1 %v6772_v1  ;;  %vm445_vm14 = vcmp.eq.s32.totalorder %v7449_v16, %v7431_v9 }
 0x1be   : > { %v2075_v59 = vpop.permute.xlu1 %2074  ;;  %6113 = vmatprep.mubr.msk.bf16.mxu1 %vm5078_vm0, %v9322_v25  ;;  %6323 = vmatprep.subr.bf16.mxu0 %v6793_v48 }
 0x1bf   : > { %vm2099_vm1 = vcmp.eq.s32.totalorder %v7449_v16, %v2075_v59  ;;  %3176 = vperm.xlu1 %6703, %v7742_v2   ;;  %v406_v41 = vpop.permute.xlu0 %405  ;;  %6324 = vmatpush3.bf16.msra.mxu0 %v6793_v48 }
 0x1c0   : > { %vm5284_vm3 = vmpackc.low %vm2099_vm1, %vm2098_vm15  ;;  %vm440_vm4 = vcmp.eq.s32.totalorder %v7449_v16, %v406_v41  ;;  %6160 = vmatpush3.bf16.msra.mxu1 %v6772_v1  ;;  %3484 = vperm.xlu0 %6709, %v7700_v57   ;;  %v6777_v1 = vld [vmem:[%s7273_s25 + $0xc8] sm:$0xff]   ;;  %v9327_v41 = vmov 5  }
 0x1c1   : > { %vm5080_vm6 = vmpackc.low %vm441_vm2, %vm440_vm4  ;;  %6278 = vmatmul.mubr.msk.bf16.gmra.mxu0 %vm5284_vm3, %v9322_v25  ;;  %6161 = vmatprep.subr.bf16.mxu1 %v6773_v46  ;;  %vm447_vm3 = vcmp.eq.s32.totalorder %v7449_v16, %v7437_v11  ;;  %v6778_v11 = vld [vmem:[%s7273_s25 + $0xc0] sm:$0xff]  }
 0x1c2   : > { %v2081_v10 = vpop.permute.xlu1 %2080  ;;  %6325 = vmatprep.subr.bf16.mxu0 %v6795_v3 }
 0x1c3   : > { %vm2101_vm7 = vcmp.eq.s32.totalorder %v7449_v16, %v2081_v10  ;;  %3182 = vperm.xlu1 %6703, %v7754_v58   ;;  %6114 = vmatmul.mubr.msk.bf16.gmra.mxu1 %vm5080_vm6, %v9322_v25  ;;  %v412_v5 = vpop.permute.xlu0 %411  ;;  %vm449_vm6 = vcmp.eq.s32.totalorder %v7449_v16, %v7443_v14  ;;  %v6779_v14 = vld [vmem:[%s7273_s25 + $0x178] sm:$0xff]  }
 0x1c4   : > { %vm5286_vm9 = vmpackc.low %vm2101_vm7, %vm2100_vm5  ;;  %vm442_vm10 = vcmp.eq.s32.totalorder %v7449_v16, %v412_v5  ;;  %6162 = vmatpush3.bf16.msra.mxu1 %v6773_v46  ;;  %3493 = vperm.xlu0 %6709, %v7808_v23   ;;  %vm1245_vm7 = vcmp.eq.s32.totalorder %v7449_v16, %v7517_v55  ;;  %v7959_v46 = vld [vmem:[%s7273_s25 + $0x2b8] sm:$0xff]  }
 0x1c5   : > { %vm5082_vm12 = vmpackc.low %vm443_vm8, %vm442_vm10  ;;  %6281 = vmatprep.mubr.msk.bf16.mxu0 %vm5286_vm9, %v9322_v25  ;;  %6163 = vmatprep.subr.bf16.mxu1 %v6774_v8  ;;  %vm1246_vm8 = vcmp.eq.s32.totalorder %v7449_v16, %v7614_v35 }
 0x1c6   : > { %v2087_v52 = vpop.permute.xlu1 %2086  ;;  %6117 = vmatprep.mubr.msk.bf16.mxu1 %vm5082_vm12, %v9322_v25  ;;  %6326 = vmatpush3.bf16.msra.mxu0 %v6795_v3  ;;  %vm5154_vm10 = vmpackc.low %vm1246_vm8, %vm1245_vm7  ;;  %vm1247_vm12 = vcmp.eq.s32.totalorder %v7449_v16, %v7623_v13  ;;  %vm1256_vm7 = vcmp.eq.s32.totalorder %v7449_v16, %v7560_v24  ;;  %vm1255_vm8 = vcmp.eq.s32.totalorder %v7449_v16, %v7648_v27  ;;  %v6784_v24 = vld [vmem:[%s7273_s25 + $0x150] sm:$0xff]  }
 0x1c7   : > { %vm2103_vm13 = vcmp.eq.s32.totalorder %v7449_v16, %v2087_v52  ;;  %6705 = vset.pattern.permute.xlu1 %v9325_v32  ;;  %v418_v7 = vpop.permute.xlu0 %417  ;;  %6327 = vmatprep.subr.bf16.mxu0 %v6797_v49 }
 0x1c8   : > { %vm5288_vm15 = vmpackc.low %vm2103_vm13, %vm2102_vm11  ;;  %vm444_vm0 = vcmp.eq.s32.totalorder %v7449_v16, %v418_v7  ;;  %3448 = vperm.xlu1 %6705, %v7716_v26   ;;  %6164 = vmatpush3.bf16.msra.mxu1 %v6774_v8  ;;  %vm1248_vm11 = vcmp.eq.s32.totalorder %v7449_v16, %v7526_v6  ;;  %vm1250_vm13 = vcmp.eq.s32.totalorder %v7449_v16, %v7534_v12  ;;  %v6780_v6 = vld [vmem:[%s7273_s25 + $0x170] sm:$0xff]   ;;  %v7990_v8 = vpop.f32.mrf.mxu0 }
 0x1c9   : > { %vm5084_vm1 = vmpackc.low %vm445_vm14, %vm444_vm0  ;;  %6282 = vmatmul.mubr.msk.bf16.gmra.mxu0 %vm5288_vm15, %v9322_v25  ;;  %6165 = vmatprep.subr.bf16.mxu1 %v6775_v63  ;;  %vm1249_vm14 = vcmp.eq.s32.totalorder %v7449_v16, %v7630_v19  ;;  %v6781_v19 = vld [vmem:[%s7273_s25 + $0x168] sm:$0xff]  }
 0x1ca   : > { %6712 = vset.pattern.permute.xlu0 %v9326_v50  ;;  %6328 = vmatpush3.bf16.msra.mxu0 %v6797_v49  ;;  %vm5156_vm15 = vmpackc.low %vm1248_vm11, %vm1247_vm12  ;;  %v8008_v5 = vpop.f32.mrf.mxu0  ;;  %v6783_v49 = vld [vmem:[%s7273_s25 + $0x158] sm:$0xff]  }
 0x1cb   : > { %v7935_v18 = vpop.permute.xlu1 %2325  ;;  %6118 = vmatmul.mubr.msk.bf16.gmra.mxu1 %vm5084_vm1, %v9322_v25  ;;  %v424_v9 = vpop.permute.xlu0 %423  ;;  %3732 = vperm.xlu0 %6712, %v7655_v30   ;;  %vm5158_vm0 = vmpackc.low %vm1250_vm13, %vm1249_vm14  ;;  %vm1252_vm1 = vcmp.eq.s32.totalorder %v7449_v16, %v7539_v15  ;;  %v6782_v15 = vld [vmem:[%s7273_s25 + $0x160] sm:$0xff]   ;;  %vm1260_vm13 = vcmp.eq.s32.totalorder %v7449_v16, %v7583_v39  ;;  %vm1259_vm14 = vcmp.eq.s32.totalorder %v7449_v16, %v7666_v45 }
 0x1cc   : > { %vm446_vm2 = vcmp.eq.s32.totalorder %v7449_v16, %v424_v9  ;;  %3454 = vperm.xlu1 %6705, %v7729_v36   ;;  %6166 = vmatpush3.bf16.msra.mxu1 %v6775_v63  ;;  %vm5164_vm11 = vmpackc.low %vm1256_vm7, %vm1255_vm8  ;;  %v6786_v39 = vld [vmem:[%s7273_s25 + $0x140] sm:$0xff]  }
 0x1cd   : > { %6167 = vmatprep.subr.bf16.mxu1 %v6776_v20  ;;  %6329 = vmatprep.subr.bf16.mxu0 %v6799_v47  ;;  %vm5086_vm4 = vmpackc.low %vm447_vm3, %vm446_vm2  ;;  %vm1251_vm2 = vcmp.eq.s32.totalorder %v7449_v16, %v7636_v22  ;;  %vm1254_vm3 = vcmp.eq.s32.totalorder %v7449_v16, %v7550_v21 }
 0x1ce   : > { %6330 = vmatpush3.bf16.msra.mxu0 %v6799_v47  ;;  %6121 = vmatprep.mubr.msk.bf16.mxu1 %vm5086_vm4, %v9322_v25  ;;  %vm1253_vm4 = vcmp.eq.s32.totalorder %v7449_v16, %v7642_v42  ;;  %v8019_v42 = vpop.f32.mrf.mxu0  ;;  %v9329_v47 = vld [vmem:[#allocation15_spill] sm:$0xff] }
 0x1cf   : > { %v7946_v48 = vpop.permute.xlu1 %2328  ;;  %v430_v62 = vpop.permute.xlu0 %429  ;;  %3744 = vperm.xlu0 %6712, %v7754_v58   ;;  %6331 = vmatprep.subr.bf16.mxu0 %v6801_v34 }
 0x1d0   : > { %vm448_vm5 = vcmp.eq.s32.totalorder %v7449_v16, %v430_v62  ;;  %3457 = vperm.xlu1 %6705, %v7742_v2   ;;  %6168 = vmatpush3.bf16.msra.mxu1 %v6776_v20  ;;  %v8035_v52 = vpop.f32.mrf.mxu0  ;;  %v9331_v62 = vld [vmem:[#allocation17_spill] sm:$0xff] }
 0x1d1   : > { %6169 = vmatprep.subr.bf16.mxu1 %v6777_v1  ;;  %vm5088_vm9 = vmpackc.low %vm449_vm6, %vm448_vm5 }
 0x1d2   : > { %6332 = vmatpush3.bf16.msra.mxu0 %v6801_v34  ;;  %vm5160_vm5 = vmpackc.low %vm1252_vm1, %vm1251_vm2  ;;  %v9330_v34 = vld [vmem:[#allocation11_spill] sm:$0xff] }
 0x1d3   : > { %v7961_v59 = vpop.permute.xlu1 %2334  ;;  %6122 = vmatmul.mubr.msk.bf16.gmra.mxu1 %vm5088_vm9, %v9322_v25  ;;  %v7964_v3 = vpop.permute.xlu0 %2639  ;;  %3756 = vperm.xlu0 %6712, %v7778_v17   ;;  %vm5162_vm6 = vmpackc.low %vm1254_vm3, %vm1253_vm4  ;;  %vm1258_vm9 = vcmp.eq.s32.totalorder %v7449_v16, %v7570_v29  ;;  %vm1810_vm3 = vcmp.eq.s32.totalorder %v7449_v16, %v7660_v31  ;;  %vm1809_vm4 = vcmp.eq.s32.totalorder %v7449_v16, %v7793_v40  ;;  %v9328_v40 = vmov 6  }
 0x1d4   : > { %3460 = vperm.xlu1 %6705, %v7664_v43   ;;  %6170 = vmatpush3.bf16.msra.mxu1 %v6777_v1  ;;  %v8043_v29 = vpop.f32.mrf.mxu0  ;;  %vm5168_vm1 = vmpackc.low %vm1260_vm13, %vm1259_vm14 }
 0x1d5   : > { %6173 = vmatprep.mubr.msk.bf16.mxu1 %vm5154_vm10, %v9322_v25  ;;  %6171 = vmatprep.subr.bf16.mxu1 %v6778_v11  ;;  %vm1257_vm10 = vcmp.eq.s32.totalorder %v7449_v16, %v7657_v38  ;;  %v6785_v38 = vld [vmem:[%s7273_s25 + $0x148] sm:$0xff]   ;;  %vm5236_vm7 = vmpackc.low %vm1810_vm3, %vm1809_vm4 }
 0x1d6   : > { %6381 = vmatprep.subr.bf16.mxu0 %v7959_v46  ;;  %vm5166_vm12 = vmpackc.low %vm1258_vm9, %vm1257_vm10  ;;  %v8062_v7 = vpop.f32.mrf.mxu0  ;;  %vm1814_vm9 = vcmp.eq.s32.totalorder %v7449_v16, %v7678_v0  ;;  %vm1813_vm10 = vcmp.eq.s32.totalorder %v7449_v16, %v9329_v47  ;;  %v6794_v0 = vld [vmem:[%s7273_s25 + $0x1e0] sm:$0xff]  }
 0x1d7   : > { %v7975_v55 = vpop.permute.xlu1 %2340  ;;  %v7977_v35 = vpop.permute.xlu0 %2648  ;;  %3768 = vperm.xlu0 %6712, %v7799_v61   ;;  %vm5240_vm13 = vmpackc.low %vm1814_vm9, %vm1813_vm10  ;;  %vm2370_vm9 = vcmp.eq.s32.totalorder %v7449_v16, %v7935_v18 }
 0x1d8   : > { %3463 = vperm.xlu1 %6705, %v7754_v58   ;;  %6172 = vmatpush3.bf16.msra.mxu1 %v6778_v11 }
 0x1d9   : > { %6221 = vmatprep.subr.bf16.mxu1 %v6779_v14 }
 0x1db   : > { %v7986_v13 = vpop.permute.xlu1 %2346  ;;  %6174 = vmatmul.mubr.msk.bf16.vlgmr.msra.gmra.mxu1 %vm5156_vm15, %v9322_v25  ;;  %6719 = vset.pattern.permute.xlu0 %v9327_v41  ;;  %v7994_v12 = vpop.permute.xlu0 %2654  ;;  %vm1807_vm15 = vcmp.eq.s32.totalorder %v7449_v16, %v7652_v28 }
 0x1dc   : > { %3469 = vperm.xlu1 %6705, %v7766_v33   ;;  %6177 = vmatprep.mubr.msk.bf16.mxu1 %vm5158_vm0, %v9322_v25  ;;  %vm1808_vm0 = vcmp.eq.s32.totalorder %v7449_v16, %v7783_v4  ;;  %v8070_v28 = vpop.f32.mrf.mxu0 }
 0x1dd   : > { %6222 = vmatpush3.bf16.msra.mxu1 %v6779_v14  ;;  %4010 = vperm.xlu0 %6719, %v7716_v26   ;;  %vm5234_vm2 = vmpackc.low %vm1808_vm0, %vm1807_vm15  ;;  %v6796_v14 = vld [vmem:[%s7273_s25 + $0x1d8] sm:$0xff]  }
 0x1de   : > { %6223 = vmatprep.subr.bf16.mxu1 %v6780_v6 }
 0x1df   : > { %v8002_v10 = vpop.permute.xlu1 %2352  ;;  %v8017_v21 = vpop.permute.xlu0 %2660 }
 0x1e0   : > { %6706 = vset.pattern.permute.xlu1 %v9313_v37 }
 0x1e1   : > { %6224 = vmatpush3.bf16.msra.mxu1 %v6780_v6  ;;  %3191 = vperm.xlu1 %6706, %v7683_v54  }
 0x1e2   : > { %6225 = vmatprep.subr.bf16.mxu1 %v6781_v19  ;;  %4019 = vperm.xlu0 %6719, %v7742_v2  }
 0x1e3   : > { %v8014_v22 = vpop.permute.xlu1 %2358  ;;  %6178 = vmatmul.mubr.msk.bf16.gmra.mxu1 %vm5160_vm5, %v9322_v25  ;;  %vm1812_vm5 = vcmp.eq.s32.totalorder %v7449_v16, %v7669_v44 }
 0x1e4   : > { %6181 = vmatprep.mubr.msk.bf16.mxu1 %vm5162_vm6, %v9322_v25  ;;  %vm1811_vm6 = vcmp.eq.s32.totalorder %v7449_v16, %v7802_v60  ;;  %v6792_v60 = vld [vmem:[%s7273_s25 + $0x1e8] sm:$0xff]  }
 0x1e5   : > { %6226 = vmatpush3.bf16.msra.mxu1 %v6781_v19  ;;  %3197 = vperm.xlu1 %6706, %v7691_v56   ;;  %vm5238_vm8 = vmpackc.low %vm1812_vm5, %vm1811_vm6  ;;  %v9334_v19 = vld [vmem:[#allocation19_spill] sm:$0xff] }
 0x1e6   : > { %6227 = vmatprep.subr.bf16.mxu1 %v6782_v15  ;;  %4022 = vperm.xlu0 %6719, %v7664_v43   ;;  %v8038_v43 = vpop.permute.xlu0 %2666  ;;  %vm1817_vm0 = vcmp.eq.s32.totalorder %v7449_v16, %v9334_v19  ;;  %v9345_v19 = vld [vmem:[#allocation18_spill] sm:$0xff] }
 0x1e7   : > { %v8029_v63 = vpop.permute.xlu1 %2364 }
 0x1e9   : > { %6228 = vmatpush3.bf16.msra.mxu1 %v6782_v15  ;;  %3200 = vperm.xlu1 %6706, %v7789_v51  }
 0x1ea   : > { %6229 = vmatprep.subr.bf16.mxu1 %v6783_v49  ;;  %4031 = vperm.xlu0 %6719, %v7766_v33   ;;  %v8055_v33 = vpop.permute.xlu0 %2672 }
 0x1eb   : > { %6182 = vmatmul.mubr.msk.bf16.gmra.mxu1 %vm5164_vm11, %v9322_v25  ;;  %vm1816_vm11 = vcmp.eq.s32.totalorder %v7449_v16, %v9330_v34  ;;  %v9342_v34 = vld [vmem:[#allocation16_spill] sm:$0xff] }
 0x1ec   : > { %v8045_v27 = vpop.permute.xlu1 %2636  ;;  %6185 = vmatprep.mubr.msk.bf16.mxu1 %vm5166_vm12, %v9322_v25  ;;  %vm1815_vm12 = vcmp.eq.s32.totalorder %v7449_v16, %v9331_v62 }
 0x1ed   : > { %6230 = vmatpush3.bf16.msra.mxu1 %v6783_v49  ;;  %6707 = vset.pattern.permute.xlu1 %v9325_v32  ;;  %vm5242_vm14 = vmpackc.low %vm1816_vm11, %vm1815_vm12 }
 0x1ee   : > { %3475 = vperm.xlu1 %6707, %v7778_v17   ;;  %6231 = vmatprep.subr.bf16.mxu1 %v6784_v24 }
 0x1ef   : > { %4034 = vperm.xlu0 %6719, %v7683_v54   ;;  %v8075_v54 = vpop.permute.xlu0 %2678 }
 0x1f0   : > { %v8064_v20 = vpop.permute.xlu1 %2642 }
 0x1f1   : > { %6232 = vmatpush3.bf16.msra.mxu1 %v6784_v24  ;;  %v9336_v24 = vld [vmem:[#allocation13_spill] sm:$0xff] }
 0x1f2   : > { %3478 = vperm.xlu1 %6707, %v7691_v56   ;;  %6233 = vmatprep.subr.bf16.mxu1 %v6785_v38  ;;  %v6788_v56 = vld [vmem:[%s7273_s25 + $0x1f8] sm:$0xff]  }
 0x1f3   : > { %6186 = vmatmul.mubr.msk.bf16.gmra.mxu1 %vm5168_vm1, %v9322_v25  ;;  %4043 = vperm.xlu0 %6719, %v7789_v51   ;;  %v8085_v51 = vpop.f32.mrf.mxu0  ;;  %v8095_v31 = vpop.permute.xlu0 %2757  ;;  %vm1820_vm1 = vcmp.eq.s32.totalorder %v7449_v16, %v9336_v24 }
 0x1f4   : > { %v8072_v45 = vpop.permute.xlu1 %2645  ;;  %6237 = vmatprep.mubr.msk.bf16.mxu1 %vm5234_vm2, %v9322_v25 }
 0x1f5   : > { %6234 = vmatpush3.bf16.msra.mxu1 %v6785_v38  ;;  %v9337_v38 = vld [vmem:[#allocation21_spill] sm:$0xff] }
 0x1f6   : > { %6708 = vset.pattern.permute.xlu1 %v9313_v37  ;;  %6235 = vmatprep.subr.bf16.mxu1 %v6786_v39  ;;  %v8098_v37 = vpop.f32.mrf.mxu0  ;;  %vm1819_vm2 = vcmp.eq.s32.totalorder %v7449_v16, %v9337_v38  ;;  %v9347_v38 = vld [vmem:[#allocation20_spill] sm:$0xff] }
 0x1f7   : > { %3203 = vperm.xlu1 %6708, %v7700_v57   ;;  %4046 = vperm.xlu0 %6719, %v7700_v57   ;;  %v6790_v57 = vld [vmem:[%s7273_s25 + $0x1f0] sm:$0xff]   ;;  %vm5246_vm4 = vmpackc.low %vm1820_vm1, %vm1819_vm2  ;;  %vm2371_vm1 = vcmp.eq.s32.totalorder %v7449_v16, %v7946_v48 }
 0x1f8   : > { %v8087_v4 = vpop.permute.xlu1 %2651  ;;  %v8111_v9 = vpop.f32.mrf.mxu0 }
 0x1f9   : > { %6236 = vmatpush3.bf16.msra.mxu1 %v6786_v39 }
 0x1fa   : > { %6285 = vmatprep.subr.bf16.mxu1 %v6788_v56  ;;  %v8124_v11 = vpop.f32.mrf.mxu0 }
 0x1fb   : > { %3209 = vperm.xlu1 %6708, %v7712_v53   ;;  %4055 = vperm.xlu0 %6719, %v7808_v23   ;;  %9332 = vst [vmem:[#allocation15_spill] sm:$0xff] %v8124_v11 }
 0x1fc   : > { %6238 = vmatmul.mubr.msk.bf16.vlgmr.msra.gmra.mxu1 %vm5236_vm7, %v9322_v25  ;;  %v8101_v44 = vpop.permute.xlu1 %2657  ;;  %v8139_v15 = vpop.f32.mrf.mxu0  ;;  %vm2804_vm7 = vcmp.eq.s32.totalorder %v7449_v16, %v8095_v31  ;;  %v9343_v31 = vmov 7  }
 0x1fd   : > { %6241 = vmatprep.mubr.msk.bf16.mxu1 %vm5238_vm8, %v9322_v25  ;;  %6286 = vmatpush3.bf16.msra.mxu1 %v6788_v56  ;;  %9335 = vst [vmem:[#allocation11_spill] sm:$0xff] %v8139_v15  ;;  %vm2369_vm8 = vcmp.eq.s32.totalorder %v7449_v16, %v9342_v34  ;;  %v9348_v34 = vld [vmem:[#allocation22_spill] sm:$0xff] }
 0x1fe   : > { %6287 = vmatprep.subr.bf16.mxu1 %v6790_v57  ;;  %v8150_v39 = vpop.f32.mrf.mxu0 }
 0x1ff   : > { %3212 = vperm.xlu1 %6708, %v7808_v23   ;;  %6722 = vset.pattern.permute.xlu0 %v9328_v40  ;;  %v8120_v23 = vpop.permute.xlu0 %2766  ;;  %9338 = vst [vmem:[#allocation17_spill] sm:$0xff] %v8150_v39 }
 0x200   : > { %v8113_v1 = vpop.permute.xlu1 %2663  ;;  %4294 = vperm.xlu0 %6722, %v7655_v30   ;;  %v8166_v47 = vpop.f32.mrf.mxu0 }
 0x201   : > { %6288 = vmatpush3.bf16.msra.mxu1 %v6790_v57  ;;  %v9339_v57 = vld [vmem:[#allocation14_spill] sm:$0xff] }
 0x202   : > { %6289 = vmatprep.subr.bf16.mxu1 %v6792_v60  ;;  %vm1822_vm5 = vcmp.eq.s32.totalorder %v7449_v16, %v9339_v57  ;;  %v6808_v57 = vld [vmem:[%s7273_s25 + $0x2a8] sm:$0xff]  }
 0x203   : > { %6710 = vset.pattern.permute.xlu1 %v9325_v32  ;;  %v8133_v6 = vpop.permute.xlu0 %2772  ;;  %v9333_v32 = vld [vmem:[#allocation12_spill] sm:$0xff] }
 0x204   : > { %6242 = vmatmul.mubr.msk.bf16.gmra.mxu1 %vm5240_vm13, %v9322_v25  ;;  %3487 = vperm.xlu1 %6710, %v7799_v61   ;;  %v8128_v30 = vpop.permute.xlu1 %2669  ;;  %vm1818_vm15 = vcmp.eq.s32.totalorder %v7449_v16, %v9333_v32  ;;  %9341 = vst [vmem:[#allocation12_spill] sm:$0xff] %v8166_v47  ;;  %vm5314_vm13 = vmpackc.low %vm2370_vm9, %vm2369_vm8  ;;  %v6803_v32 = vld [vmem:[%s7273_s25 + $0x238] sm:$0xff]  }
 0x205   : > { %6245 = vmatprep.mubr.msk.bf16.mxu1 %vm5242_vm14, %v9322_v25  ;;  %6290 = vmatpush3.bf16.msra.mxu1 %v6792_v60  ;;  %vm5244_vm3 = vmpackc.low %vm1818_vm15, %vm1817_vm0  ;;  %v9340_v60 = vld [vmem:[#allocation23_spill] sm:$0xff]  ;;  %vm2807_vm14 = vcmp.eq.s32.totalorder %v7449_v16, %v8120_v23  ;;  %vm2372_vm0 = vcmp.eq.s32.totalorder %v7449_v16, %v9345_v19  ;;  %v6806_v23 = vld [vmem:[%s7273_s25 + $0x2b0] sm:$0xff]  }
 0x206   : > { %6291 = vmatprep.subr.bf16.mxu1 %v6794_v0  ;;  %4306 = vperm.xlu0 %6722, %v7754_v58   ;;  %v6798_v58 = vld [vmem:[%s7273_s25 + $0x1d0] sm:$0xff]   ;;  %vm1821_vm6 = vcmp.eq.s32.totalorder %v7449_v16, %v9340_v60 }
 0x207   : > { %v8157_v56 = vpop.permute.xlu0 %2778  ;;  %vm5248_vm10 = vmpackc.low %vm1822_vm5, %vm1821_vm6  ;;  %vm2373_vm5 = vcmp.eq.s32.totalorder %v7449_v16, %v7961_v59  ;;  %v6807_v59 = vld [vmem:[%s7273_s25 + $0x228] sm:$0xff]  }
 0x208   : > { %3490 = vperm.xlu1 %6710, %v7712_v53   ;;  %v8142_v49 = vpop.permute.xlu1 %2675  ;;  %vm5316_vm6 = vmpackc.low %vm2372_vm0, %vm2371_vm1  ;;  %vm2377_vm1 = vcmp.eq.s32.totalorder %v7449_v16, %v7986_v13  ;;  %v8256_v13 = vld [vmem:[%s7271_s28 + $0xa0] sm:$0xff] }
 0x209   : > { %6292 = vmatpush3.bf16.msra.mxu1 %v6794_v0 }
 0x20a   : > { %6293 = vmatprep.subr.bf16.mxu1 %v6796_v14  ;;  %4318 = vperm.xlu0 %6722, %v7778_v17   ;;  %v6800_v17 = vld [vmem:[%s7273_s25 + $0x1c8] sm:$0xff]  }
 0x20b   : > { %v8177_v0 = vpop.permute.xlu0 %2784 }
 0x20c   : > { %6246 = vmatmul.mubr.msk.bf16.gmra.mxu1 %vm5244_vm3, %v9322_v25  ;;  %6711 = vset.pattern.permute.xlu1 %v9326_v50  ;;  %v8154_v53 = vpop.permute.xlu1 %2681  ;;  %vm2809_vm3 = vcmp.eq.s32.totalorder %v7449_v16, %v8133_v6  ;;  %v6805_v6 = vld [vmem:[%s7273_s25 + $0x230] sm:$0xff]  }
 0x20d   : > { %6249 = vmatprep.mubr.msk.bf16.mxu1 %vm5246_vm4, %v9322_v25  ;;  %6294 = vmatpush3.bf16.msra.mxu1 %v6796_v14  ;;  %v8180_v14 = vpop.f32.mrf.mxu0  ;;  %vm2374_vm4 = vcmp.eq.s32.totalorder %v7449_v16, %v9347_v38  ;;  %v6811_v38 = vld [vmem:[%s7273_s25 + $0x218] sm:$0xff]  }
 0x20e   : > { %3729 = vperm.xlu1 %6711, %v7716_v26   ;;  %6295 = vmatprep.subr.bf16.mxu1 %v6798_v58  ;;  %9344 = vst [vmem:[#allocation19_spill] sm:$0xff] %v8180_v14  ;;  %vm5318_vm9 = vmpackc.low %vm2374_vm4, %vm2373_vm5 }
 0x20f   : > { %4330 = vperm.xlu0 %6722, %v7799_v61   ;;  %v6802_v61 = vld [vmem:[%s7273_s25 + $0x1c0] sm:$0xff]   ;;  %v8196_v24 = vpop.f32.mrf.mxu0 }
 0x210   : > { %9346 = vst [vmem:[#allocation13_spill] sm:$0xff] %v8196_v24 }
 0x211   : > { %6296 = vmatpush3.bf16.msra.mxu1 %v6798_v58  ;;  %v2761_v62 = vpop.permute.xlu1 %2760  ;;  %v8208_v58 = vpop.f32.mrf.mxu0 }
 0x212   : > { %3735 = vperm.xlu1 %6711, %v7729_v36   ;;  %vm2805_vm11 = vcmp.eq.s32.totalorder %v7449_v16, %v2761_v62  ;;  %6297 = vmatprep.subr.bf16.mxu1 %v6800_v17  ;;  %v6810_v62 = vld [vmem:[%s7273_s25 + $0x2a0] sm:$0xff]  }
 0x213   : > { %vm5418_vm12 = vmpackc.low %vm2805_vm11, %vm2804_vm7  ;;  %6729 = vset.pattern.permute.xlu0 %v9343_v31  ;;  %v8229_v60 = vpop.f32.mrf.mxu0 }
 0x214   : > { %6250 = vmatmul.mubr.msk.bf16.gmra.mxu1 %vm5248_vm10, %v9322_v25  ;;  %6333 = vmatprep.mubr.msk.bf16.mxu0 %vm5418_vm12, %v9322_v25  ;;  %vm2811_vm10 = vcmp.eq.s32.totalorder %v7449_v16, %v8157_v56  ;;  %vm2376_vm12 = vcmp.eq.s32.totalorder %v7449_v16, %v9348_v34  ;;  %v8295_v34 = vld [vmem:[%s7271_s28 + $0xb8] sm:$0xff] }
 0x215   : > { %6298 = vmatpush3.bf16.msra.mxu1 %v6800_v17  ;;  %6301 = vmatprep.mubr.msk.bf16.mxu1 %vm5314_vm13, %v9322_v25  ;;  %v2764_v18 = vpop.permute.xlu1 %2763  ;;  %v8214_v17 = vld [vmem:[%s7271_s28 + $0x88] sm:$0xff]  ;;  %vm2375_vm13 = vcmp.eq.s32.totalorder %v7449_v16, %v7975_v55  ;;  %v8247_v55 = vpop.f32.mrf.mxu0 }
 0x216   : > { %3738 = vperm.xlu1 %6711, %v7742_v2   ;;  %vm2806_vm15 = vcmp.eq.s32.totalorder %v7449_v16, %v2764_v18  ;;  %6299 = vmatprep.subr.bf16.mxu1 %v6802_v61 }
 0x217   : > { %vm5420_vm2 = vmpackc.low %vm2807_vm14, %vm2806_vm15  ;;  %4572 = vperm.xlu0 %6729, %v7716_v26   ;;  %v8206_v26 = vpop.permute.xlu0 %2790  ;;  %vm2813_vm15 = vcmp.eq.s32.totalorder %v7449_v16, %v8177_v0  ;;  %v6812_v0 = vld [vmem:[%s7273_s25 + $0x298] sm:$0xff]   ;;  %v8262_v19 = vpop.f32.mrf.mxu0 }
 0x218   : > { %6334 = vmatmul.mubr.msk.bf16.vlgmr.msra.gmra.mxu0 %vm5420_vm2, %v9322_v25  ;;  %vm5320_vm2 = vmpackc.low %vm2376_vm12, %vm2375_vm13  ;;  %vm2381_vm13 = vcmp.eq.s32.totalorder %v7449_v16, %v8014_v22  ;;  %v6816_v22 = vld [vmem:[%s7273_s25 + $0x288] sm:$0xff]  }
 0x219   : > { %6300 = vmatpush3.bf16.msra.mxu1 %v6802_v61  ;;  %v2770_v48 = vpop.permute.xlu1 %2769  ;;  %6382 = vmatpush3.bf16.msra.mxu0 %v7959_v46  ;;  %v9349_v61 = vld [vmem:[#allocation24_spill] sm:$0xff] }
 0x21a   : > { %6713 = vset.pattern.permute.xlu1 %v9327_v41  ;;  %vm2808_vm7 = vcmp.eq.s32.totalorder %v7449_v16, %v2770_v48  ;;  %6349 = vmatprep.subr.bf16.mxu1 %v6803_v32  ;;  %vm2378_vm0 = vcmp.eq.s32.totalorder %v7449_v16, %v9349_v61  ;;  %v6814_v48 = vld [vmem:[%s7273_s25 + $0x290] sm:$0xff]   ;;  %v9352_v61 = vld [vmem:[#allocation27_spill] sm:$0xff] }
 0x21b   : > { %vm5422_vm8 = vmpackc.low %vm2809_vm3, %vm2808_vm7  ;;  %4013 = vperm.xlu1 %6713, %v8214_v17   ;;  %6383 = vmatprep.subr.bf16.mxu0 %v6806_v23  ;;  %v2797_v56 = vpop.permute.xlu0 %2796 }
 0x21c   : > { %6302 = vmatmul.mubr.msk.bf16.vlgmr.msra.gmra.mxu1 %vm5316_vm6, %v9322_v25  ;;  %6337 = vmatprep.mubr.msk.bf16.mxu0 %vm5422_vm8, %v9322_v25  ;;  %vm5322_vm5 = vmpackc.low %vm2378_vm0, %vm2377_vm1  ;;  %vm2815_vm6 = vcmp.eq.s32.totalorder %v7449_v16, %v8206_v26  ;;  %v8273_v26 = vld [vmem:[%s7271_s28 + $0xb0] sm:$0xff] }
 0x21d   : > { %6305 = vmatprep.mubr.msk.bf16.mxu1 %vm5318_vm9, %v9322_v25  ;;  %6350 = vmatpush3.bf16.msra.mxu1 %v6803_v32  ;;  %v2776_v46 = vpop.permute.xlu1 %2775  ;;  %vm2379_vm9 = vcmp.eq.s32.totalorder %v7449_v16, %v8002_v10 }
 0x21e   : > { %vm2810_vm11 = vcmp.eq.s32.totalorder %v7449_v16, %v2776_v46  ;;  %6351 = vmatprep.subr.bf16.mxu1 %v6805_v6  ;;  %6384 = vmatpush3.bf16.msra.mxu0 %v6806_v23  ;;  %v9350_v23 = vld [vmem:[#allocation25_spill] sm:$0xff] }
 0x21f   : > { %vm5424_vm14 = vmpackc.low %vm2811_vm10, %vm2810_vm11  ;;  %4016 = vperm.xlu1 %6713, %v7729_v36   ;;  %6385 = vmatprep.subr.bf16.mxu0 %v6808_v57  ;;  %v2803_v32 = vpop.permute.xlu0 %2802  ;;  %vm2380_vm8 = vcmp.eq.s32.totalorder %v7449_v16, %v9350_v23  ;;  %vm2817_vm11 = vcmp.eq.s32.totalorder %v7449_v16, %v2797_v56 }
 0x220   : > { %6338 = vmatmul.mubr.msk.bf16.gmra.mxu0 %vm5424_vm14, %v9322_v25  ;;  %4581 = vperm.xlu0 %6729, %v7742_v2   ;;  %v6809_v2 = vld [vmem:[%s7273_s25 + $0x220] sm:$0xff]   ;;  %vm5324_vm14 = vmpackc.low %vm2380_vm8, %vm2379_vm9  ;;  %vm2684_vm8 = vcmp.eq.s32.totalorder %v7449_v16, %v7964_v3 }
 0x221   : > { %6352 = vmatpush3.bf16.msra.mxu1 %v6805_v6  ;;  %v2782_v36 = vpop.permute.xlu1 %2781  ;;  %v9351_v6 = vld [vmem:[#allocation26_spill] sm:$0xff] }
 0x222   : > { %vm2812_vm3 = vcmp.eq.s32.totalorder %v7449_v16, %v2782_v36  ;;  %6353 = vmatprep.subr.bf16.mxu1 %v6807_v59  ;;  %6386 = vmatpush3.bf16.msra.mxu0 %v6808_v57  ;;  %vm2382_vm12 = vcmp.eq.s32.totalorder %v7449_v16, %v9351_v6  ;;  %v8285_v57 = vpop.f32.mrf.mxu0  ;;  %v6815_v36 = vld [vmem:[%s7273_s25 + $0x208] sm:$0xff]   ;;  %v6819_v6 = vld [vmem:[%s7273_s25 + $0x2f8] sm:$0xff]  }
 0x223   : > { %vm5426_vm4 = vmpackc.low %vm2813_vm15, %vm2812_vm3  ;;  %6714 = vset.pattern.permute.xlu1 %v9326_v50  ;;  %6387 = vmatprep.subr.bf16.mxu0 %v6810_v62  ;;  %v3171_v46 = vpop.permute.xlu0 %3170 }
 0x224   : > { %3741 = vperm.xlu1 %6714, %v8256_v13   ;;  %6306 = vmatmul.mubr.msk.bf16.gmra.mxu1 %vm5320_vm2, %v9322_v25  ;;  %vm5326_vm1 = vmpackc.low %vm2382_vm12, %vm2381_vm13  ;;  %vm2819_vm2 = vcmp.eq.s32.totalorder %v7449_v16, %v2803_v32  ;;  %vm3215_vm9 = vcmp.eq.s32.totalorder %v7449_v16, %v3171_v46  ;;  %v6817_v32 = vld [vmem:[%s7273_s25 + $0x200] sm:$0xff]  }
 0x225   : > { %6309 = vmatprep.mubr.msk.bf16.mxu1 %vm5322_vm5, %v9322_v25  ;;  %6341 = vmatprep.mubr.msk.bf16.mxu0 %vm5426_vm4, %v9322_v25  ;;  %v2788_v18 = vpop.permute.xlu1 %2787  ;;  %vm2384_vm4 = vcmp.eq.s32.totalorder %v7449_v16, %v9352_v61  ;;  %vm2383_vm5 = vcmp.eq.s32.totalorder %v7449_v16, %v8029_v63  ;;  %v6827_v63 = vld [vmem:[%s7273_s25 + $0x338] sm:$0xff]   ;;  %v8378_v61 = vld [vmem:[%s7271_s28 + $0xd0] sm:$0xff] }
 0x226   : > { %6354 = vmatpush3.bf16.msra.mxu1 %v6807_v59  ;;  %vm2814_vm7 = vcmp.eq.s32.totalorder %v7449_v16, %v2788_v18  ;;  %6388 = vmatpush3.bf16.msra.mxu0 %v6810_v62  ;;  %v6813_v59 = vld [vmem:[%s7273_s25 + $0x210] sm:$0xff]   ;;  %v8301_v62 = vpop.f32.mrf.mxu0  ;;  %v8320_v18 = vld [vmem:[%s7271_s28 + $0xa8] sm:$0xff] }
 0x227   : > { %vm5428_vm10 = vmpackc.low %vm2815_vm6, %vm2814_vm7  ;;  %6355 = vmatprep.subr.bf16.mxu1 %v6809_v2  ;;  %6389 = vmatprep.subr.bf16.mxu0 %v6812_v0  ;;  %vm2683_vm7 = vcmp.eq.s32.totalorder %v7449_v16, %v8045_v27 }
 0x228   : > { %3747 = vperm.xlu1 %6714, %v8273_v26   ;;  %6342 = vmatmul.mubr.msk.bf16.gmra.mxu0 %vm5428_vm10, %v9322_v25  ;;  %vm5328_vm10 = vmpackc.low %vm2384_vm4, %vm2383_vm5  ;;  %v8330_v3 = vpop.f32.mrf.mxu0 }
 0x229   : > { %v2794_v10 = vpop.permute.xlu1 %2793  ;;  %4584 = vperm.xlu0 %6729, %v8256_v13  }
 0x22a   : > { %6356 = vmatpush3.bf16.msra.mxu1 %v6809_v2  ;;  %vm2816_vm15 = vcmp.eq.s32.totalorder %v7449_v16, %v2794_v10  ;;  %6390 = vmatpush3.bf16.msra.mxu0 %v6812_v0  ;;  %v6818_v2 = vld [vmem:[%s7273_s25 + $0x280] sm:$0xff]   ;;  %v8317_v0 = vpop.permute.xlu0 %3179  ;;  %v8340_v23 = vpop.f32.mrf.mxu0 }
 0x22b   : > { %vm5430_vm0 = vmpackc.low %vm2817_vm11, %vm2816_vm15  ;;  %6357 = vmatprep.subr.bf16.mxu1 %v6811_v38  ;;  %6391 = vmatprep.subr.bf16.mxu0 %v6814_v48  ;;  %v8347_v10 = vld [vmem:[%s7271_s28 + $0xc0] sm:$0xff]  ;;  %vm2685_vm15 = vcmp.eq.s32.totalorder %v7449_v16, %v8064_v20  ;;  %v6820_v20 = vld [vmem:[%s7273_s25 + $0x2f0] sm:$0xff]  }
 0x22c   : > { %3750 = vperm.xlu1 %6714, %v8295_v34   ;;  %6310 = vmatmul.mubr.msk.bf16.gmra.mxu1 %vm5324_vm14, %v9322_v25  ;;  %vm5442_vm11 = vmpackc.low %vm2684_vm8, %vm2683_vm7  ;;  %vm2686_vm14 = vcmp.eq.s32.totalorder %v7449_v16, %v8072_v45  ;;  %v8355_v46 = vpop.f32.mrf.mxu0  ;;  %vm3218_vm7 = vcmp.eq.s32.totalorder %v7449_v16, %v8317_v0  ;;  %v6822_v0 = vld [vmem:[%s7273_s25 + $0x2e0] sm:$0xff]  }
 0x22d   : > { %6313 = vmatprep.mubr.msk.bf16.mxu1 %vm5326_vm1, %v9322_v25  ;;  %6345 = vmatprep.mubr.msk.bf16.mxu0 %vm5430_vm0, %v9322_v25  ;;  %v2800_v56 = vpop.permute.xlu1 %2799  ;;  %vm2687_vm0 = vcmp.eq.s32.totalorder %v7449_v16, %v7977_v35  ;;  %9353 = vst [vmem:[#allocation21_spill] sm:$0xff] %v8355_v46  ;;  %vm2688_vm1 = vcmp.eq.s32.totalorder %v7449_v16, %v8087_v4  ;;  %v8364_v35 = vld [vmem:[%s7271_s28 + $0xd8] sm:$0xff]  ;;  %v6853_v46 = vld [vmem:[%s7273_s25 + $0x388] sm:$0xff]  }
 0x22e   : > { %6358 = vmatpush3.bf16.msra.mxu1 %v6811_v38  ;;  %vm2818_vm3 = vcmp.eq.s32.totalorder %v7449_v16, %v2800_v56  ;;  %6392 = vmatpush3.bf16.msra.mxu0 %v6814_v48  ;;  %v3186_v48 = vpop.permute.xlu0 %3185 }
 0x22f   : > { %vm5432_vm6 = vmpackc.low %vm2819_vm2, %vm2818_vm3  ;;  %6359 = vmatprep.subr.bf16.mxu1 %v6813_v59  ;;  %6393 = vmatprep.subr.bf16.mxu0 %v6816_v22  ;;  %vm3220_vm8 = vcmp.eq.s32.totalorder %v7449_v16, %v3186_v48  ;;  %v6823_v48 = vld [vmem:[%s7273_s25 + $0x2d8] sm:$0xff]  }
 0x230   : > { %6715 = vset.pattern.permute.xlu1 %v9327_v41  ;;  %6346 = vmatmul.mubr.msk.bf16.gmra.mxu0 %vm5432_vm6, %v9322_v25  ;;  %vm5444_vm2 = vmpackc.low %vm2686_vm14, %vm2685_vm15  ;;  %vm2691_vm14 = vcmp.eq.s32.totalorder %v7449_v16, %v8017_v21  ;;  %vm2692_vm15 = vcmp.eq.s32.totalorder %v7449_v16, %v8113_v1  ;;  %v6829_v21 = vld [vmem:[%s7273_s25 + $0x328] sm:$0xff]   ;;  %v8413_v1 = vld [vmem:[%s7271_s28 + $0xf8] sm:$0xff] }
 0x231   : > { %4025 = vperm.xlu1 %6715, %v8320_v18   ;;  %4593 = vperm.xlu0 %6729, %v8295_v34   ;;  %vm5446_vm6 = vmpackc.low %vm2688_vm1, %vm2687_vm0 }
 0x232   : > { %6360 = vmatpush3.bf16.msra.mxu1 %v6813_v59  ;;  %v3168_v27 = vpop.permute.xlu1 %3167  ;;  %6394 = vmatpush3.bf16.msra.mxu0 %v6816_v22  ;;  %v3189_v4 = vpop.permute.xlu0 %3188  ;;  %v6828_v59 = vld [vmem:[%s7273_s25 + $0x330] sm:$0xff]  }
 0x233   : > { %vm3214_vm12 = vcmp.eq.s32.totalorder %v7449_v16, %v3168_v27  ;;  %6361 = vmatprep.subr.bf16.mxu1 %v6815_v36  ;;  %6395 = vmatprep.subr.bf16.mxu0 %v6818_v2  ;;  %v8372_v22 = vpop.f32.mrf.mxu0 }
 0x234   : > { %vm5498_vm13 = vmpackc.low %vm3215_vm9, %vm3214_vm12  ;;  %6314 = vmatmul.mubr.msk.bf16.gmra.mxu1 %vm5328_vm10, %v9322_v25  ;;  %9354 = vst [vmem:[#allocation14_spill] sm:$0xff] %v8372_v22  ;;  %vm3221_vm9 = vcmp.eq.s32.totalorder %v7449_v16, %v3189_v4  ;;  %vm2689_vm12 = vcmp.eq.s32.totalorder %v7449_v16, %v7994_v12 }
 0x235   : > { %4028 = vperm.xlu1 %6715, %v8273_v26   ;;  %6365 = vmatprep.mubr.msk.bf16.mxu1 %vm5442_vm11, %v9322_v25  ;;  %v8395_v27 = vpop.f32.mrf.mxu0  ;;  %vm5504_vm0 = vmpackc.low %vm3221_vm9, %vm3220_vm8  ;;  %vm2697_vm9 = vcmp.eq.s32.totalorder %v7449_v16, %v8075_v54  ;;  %v6837_v54 = vld [vmem:[%s7273_s25 + $0x308] sm:$0xff]  }
 0x236   : > { %6362 = vmatpush3.bf16.msra.mxu1 %v6815_v36  ;;  %6397 = vmatprep.mubr.msk.bf16.mxu0 %vm5498_vm13, %v9322_v25  ;;  %v3174_v38 = vpop.permute.xlu1 %3173  ;;  %v6821_v36 = vld [vmem:[%s7273_s25 + $0x2e8] sm:$0xff]   ;;  %vm2690_vm13 = vcmp.eq.s32.totalorder %v7449_v16, %v8101_v44  ;;  %9355 = vst [vmem:[#allocation23_spill] sm:$0xff] %v8395_v27  ;;  %v8405_v12 = vpop.permute.xlu0 %3194 }
 0x237   : > { %6363 = vmatprep.subr.bf16.mxu1 %v6817_v32  ;;  %6396 = vmatpush3.bf16.msra.mxu0 %v6818_v2  ;;  %vm3216_vm3 = vcmp.eq.s32.totalorder %v7449_v16, %v3174_v38  ;;  %v8387_v2 = vld [vmem:[%s7271_s28 + $0xe0] sm:$0xff]  ;;  %vm5448_vm1 = vmpackc.low %vm2690_vm13, %vm2689_vm12 }
 0x238   : > { %6445 = vmatprep.subr.bf16.mxu0 %v6827_v63  ;;  %4596 = vperm.xlu0 %6729, %v8347_v10  }
 0x239   : > { %6716 = vset.pattern.permute.xlu1 %v9326_v50 }
 0x23a   : > { %6364 = vmatpush3.bf16.msra.mxu1 %v6817_v32  ;;  %3753 = vperm.xlu1 %6716, %v8347_v10   ;;  %v3177_v45 = vpop.permute.xlu1 %3176  ;;  %v8418_v32 = vpop.f32.mrf.mxu0 }
 0x23b   : > { %vm3217_vm4 = vcmp.eq.s32.totalorder %v7449_v16, %v3177_v45  ;;  %6413 = vmatprep.subr.bf16.mxu1 %v6819_v6  ;;  %9356 = vst [vmem:[#allocation16_spill] sm:$0xff] %v8418_v32  ;;  %v8434_v45 = vpop.permute.xlu0 %3206 }
 0x23c   : > { %vm5500_vm5 = vmpackc.low %vm3217_vm4, %vm3216_vm3  ;;  %4605 = vperm.xlu0 %6729, %v8364_v35   ;;  %vm2693_vm3 = vcmp.eq.s32.totalorder %v7449_v16, %v8038_v43  ;;  %vm2694_vm4 = vcmp.eq.s32.totalorder %v7449_v16, %v8128_v30  ;;  %v6824_v43 = vld [vmem:[%s7273_s25 + $0x2d0] sm:$0xff]  }
 0x23d   : > { %6366 = vmatmul.mubr.msk.bf16.vlgmr.msra.gmra.mxu1 %vm5444_vm2, %v9322_v25  ;;  %6398 = vmatmul.mubr.msk.bf16.vlgmr.msra.gmra.mxu0 %vm5500_vm5, %v9322_v25  ;;  %vm5450_vm2 = vmpackc.low %vm2692_vm15, %vm2691_vm14  ;;  %vm2695_vm5 = vcmp.eq.s32.totalorder %v7449_v16, %v8055_v33  ;;  %v6835_v33 = vld [vmem:[%s7273_s25 + $0x310] sm:$0xff]  }
 0x23e   : > { %6369 = vmatprep.mubr.msk.bf16.mxu1 %vm5446_vm6, %v9322_v25  ;;  %6414 = vmatpush3.bf16.msra.mxu1 %v6819_v6  ;;  %v3183_v56 = vpop.permute.xlu1 %3182  ;;  %v8427_v6 = vld [vmem:[%s7271_s28 + $0xc8] sm:$0xff]  ;;  %vm2696_vm6 = vcmp.eq.s32.totalorder %v7449_v16, %v8142_v49 }
 0x23f   : > { %3759 = vperm.xlu1 %6716, %v8378_v61   ;;  %vm3219_vm10 = vcmp.eq.s32.totalorder %v7449_v16, %v3183_v56  ;;  %6415 = vmatprep.subr.bf16.mxu1 %v6820_v20  ;;  %vm5454_vm8 = vmpackc.low %vm2696_vm6, %vm2695_vm5  ;;  %v3452_v49 = vpop.permute.xlu0 %3451 }
 0x240   : > { %vm5502_vm11 = vmpackc.low %vm3219_vm10, %vm3218_vm7  ;;  %6446 = vmatpush3.bf16.msra.mxu0 %v6827_v63  ;;  %4608 = vperm.xlu0 %6729, %v8387_v2   ;;  %v6831_v63 = vld [vmem:[%s7273_s25 + $0x320] sm:$0xff]   ;;  %vm2698_vm10 = vcmp.eq.s32.totalorder %v7449_v16, %v8154_v53  ;;  %vm3496_vm12 = vcmp.eq.s32.totalorder %v7449_v16, %v3452_v49  ;;  %v8465_v53 = vld [vmem:[%s7271_s28 + $0xf0] sm:$0xff] }
 0x241   : > { %6401 = vmatprep.mubr.msk.bf16.mxu0 %vm5502_vm11, %v9322_v25  ;;  %6447 = vmatprep.subr.bf16.mxu0 %v6828_v59  ;;  %vm5452_vm7 = vmpackc.low %vm2694_vm4, %vm2693_vm3  ;;  %v6832_v49 = vld [vmem:[%s7273_s25 + $0x370] sm:$0xff]  }
 0x242   : > { %6416 = vmatpush3.bf16.msra.mxu1 %v6820_v20  ;;  %v8436_v20 = vpop.f32.mrf.mxu0  ;;  %vm5456_vm13 = vmpackc.low %vm2698_vm10, %vm2697_vm9 }
 0x243   : > { %3762 = vperm.xlu1 %6716, %v8364_v35   ;;  %v8408_v44 = vpop.permute.xlu1 %3448  ;;  %6417 = vmatprep.subr.bf16.mxu1 %v6821_v36  ;;  %9357 = vst [vmem:[#allocation18_spill] sm:$0xff] %v8436_v20 }
 0x244   : > { %6448 = vmatpush3.bf16.msra.mxu0 %v6828_v59  ;;  %4617 = vperm.xlu0 %6729, %v8413_v1   ;;  %v6833_v59 = vld [vmem:[%s7273_s25 + $0x318] sm:$0xff]   ;;  %v8446_v30 = vpop.f32.mrf.mxu0  ;;  %vm3495_vm11 = vcmp.eq.s32.totalorder %v7449_v16, %v8408_v44 }
 0x245   : > { %6370 = vmatmul.mubr.msk.bf16.gmra.mxu1 %vm5448_vm1, %v9322_v25  ;;  %6402 = vmatmul.mubr.msk.bf16.gmra.mxu0 %vm5504_vm0, %v9322_v25  ;;  %9358 = vst [vmem:[#allocation20_spill] sm:$0xff] %v8446_v30  ;;  %vm5554_vm14 = vmpackc.low %vm3496_vm12, %vm3495_vm11  ;;  %vm3223_vm1 = vcmp.eq.s32.totalorder %v7449_v16, %v8405_v12 }
 0x246   : > { %6373 = vmatprep.mubr.msk.bf16.mxu1 %vm5450_vm2, %v9322_v25  ;;  %6418 = vmatpush3.bf16.msra.mxu1 %v6821_v36  ;;  %v6825_v36 = vld [vmem:[%s7273_s25 + $0x2c8] sm:$0xff]  }
 0x247   : > { %6717 = vset.pattern.permute.xlu1 %v9327_v41  ;;  %v8423_v38 = vpop.permute.xlu1 %3454  ;;  %6419 = vmatprep.subr.bf16.mxu1 %v6822_v0 }
 0x248   : > { %4037 = vperm.xlu1 %6717, %v8427_v6   ;;  %6449 = vmatprep.subr.bf16.mxu0 %v6829_v21  ;;  %vm3497_vm2 = vcmp.eq.s32.totalorder %v7449_v16, %v8423_v38  ;;  %v3467_v38 = vpop.permute.xlu0 %3466 }
 0x249   : > { %6450 = vmatpush3.bf16.msra.mxu0 %v6829_v21  ;;  %v6826_v21 = vld [vmem:[%s7273_s25 + $0x2c0] sm:$0xff]   ;;  %vm3501_vm9 = vcmp.eq.s32.totalorder %v7449_v16, %v3467_v38 }
 0x24a   : > { %6420 = vmatpush3.bf16.msra.mxu1 %v6822_v0  ;;  %6451 = vmatprep.subr.bf16.mxu0 %v6831_v63  ;;  %v8457_v0 = vpop.f32.mrf.mxu0 }
 0x24b   : > { %v3458_v4 = vpop.permute.xlu1 %3457  ;;  %6421 = vmatprep.subr.bf16.mxu1 %v6823_v48  ;;  %9359 = vst [vmem:[#allocation22_spill] sm:$0xff] %v8457_v0  ;;  %v6885_v0 = vld [vmem:[%s7271_s28 + $0x98] sm:$0xff] }
 0x24c   : > { %4040 = vperm.xlu1 %6717, %v8378_v61   ;;  %vm3498_vm15 = vcmp.eq.s32.totalorder %v7449_v16, %v3458_v4  ;;  %v3473_v12 = vpop.permute.xlu0 %3472 }
 0x24d   : > { %6374 = vmatmul.mubr.msk.bf16.gmra.mxu1 %vm5452_vm7, %v9322_v25  ;;  %6452 = vmatpush3.bf16.msra.mxu0 %v6831_v63  ;;  %v8469_v63 = vpop.f32.mrf.mxu0  ;;  %vm5556_vm3 = vmpackc.low %vm3498_vm15, %vm3497_vm2 }
 0x24e   : > { %6377 = vmatprep.mubr.msk.bf16.mxu1 %vm5454_vm8, %v9322_v25  ;;  %6422 = vmatpush3.bf16.msra.mxu1 %v6823_v48  ;;  %9360 = vst [vmem:[#allocation24_spill] sm:$0xff] %v8469_v63  ;;  %v6830_v48 = vld [vmem:[%s7273_s25 + $0x378] sm:$0xff]  }
 0x24f   : > { %v3461_v56 = vpop.permute.xlu1 %3460  ;;  %6423 = vmatprep.subr.bf16.mxu1 %v6824_v43  ;;  %6453 = vmatprep.subr.bf16.mxu0 %v6833_v59 }
 0x250   : > { %6718 = vset.pattern.permute.xlu1 %v9326_v50  ;;  %vm3499_vm4 = vcmp.eq.s32.totalorder %v7449_v16, %v3461_v56 }
 0x251   : > { %3765 = vperm.xlu1 %6718, %v8387_v2   ;;  %6454 = vmatpush3.bf16.msra.mxu0 %v6833_v59  ;;  %v6839_v59 = vld [vmem:[%s7273_s25 + $0x300] sm:$0xff]  }
 0x252   : > { %6424 = vmatpush3.bf16.msra.mxu1 %v6824_v43  ;;  %6455 = vmatprep.subr.bf16.mxu0 %v6835_v33  ;;  %v8473_v43 = vpop.f32.mrf.mxu0 }
 0x253   : > { %v3464_v50 = vpop.permute.xlu1 %3463  ;;  %6425 = vmatprep.subr.bf16.mxu1 %v6825_v36 }
 0x254   : > { %vm3500_vm0 = vcmp.eq.s32.totalorder %v7449_v16, %v3464_v50  ;;  %v8494_v50 = vld [vmem:[%s7271_s28 + $0xe8] sm:$0xff] }
 0x255   : > { %3771 = vperm.xlu1 %6718, %v8465_v53   ;;  %6378 = vmatmul.mubr.msk.bf16.gmra.mxu1 %vm5456_vm13, %v9322_v25  ;;  %vm5558_vm5 = vmpackc.low %vm3500_vm0, %vm3499_vm4  ;;  %vm3227_vm4 = vcmp.eq.s32.totalorder %v7449_v16, %v8434_v45  ;;  %v6842_v45 = vld [vmem:[%s7273_s25 + $0x340] sm:$0xff]  }
 0x256   : > { %6426 = vmatpush3.bf16.msra.mxu1 %v6825_v36  ;;  %6429 = vmatprep.mubr.msk.bf16.mxu1 %vm5554_vm14, %v9322_v25  ;;  %v8491_v36 = vld [vmem:[%s7273_s25 + $0x3b8] sm:$0xff]   ;;  %vm3503_vm14 = vcmp.eq.s32.totalorder %v7449_v16, %v3473_v12  ;;  %v6840_v12 = vld [vmem:[%s7273_s25 + $0x350] sm:$0xff]  }
 0x257   : > { %v3470_v44 = vpop.permute.xlu1 %3469  ;;  %6427 = vmatprep.subr.bf16.mxu1 %v6826_v21  ;;  %6456 = vmatpush3.bf16.msra.mxu0 %v6835_v33  ;;  %v8483_v33 = vpop.f32.mrf.mxu0 }
 0x258   : > { %6457 = vmatprep.subr.bf16.mxu0 %v6837_v54  ;;  %vm3502_vm8 = vcmp.eq.s32.totalorder %v7449_v16, %v3470_v44  ;;  %v6836_v44 = vld [vmem:[%s7273_s25 + $0x360] sm:$0xff]  }
 0x259   : > { %3774 = vperm.xlu1 %6718, %v8413_v1   ;;  %vm5560_vm10 = vmpackc.low %vm3502_vm8, %vm3501_vm9 }
 0x25a   : > { %6428 = vmatpush3.bf16.msra.mxu1 %v6826_v21  ;;  %v6834_v21 = vld [vmem:[%s7273_s25 + $0x368] sm:$0xff]  }
 0x25b   : > { %6477 = vmatprep.subr.bf16.mxu1 %v6830_v48  ;;  %6458 = vmatpush3.bf16.msra.mxu0 %v6837_v54 }
 0x25c   : > { %v3192_v4 = vpop.permute.xlu1 %3191  ;;  %6459 = vmatprep.subr.bf16.mxu0 %v6839_v59 }
 0x25d   : > { %6720 = vset.pattern.permute.xlu1 %v9327_v41  ;;  %6430 = vmatmul.mubr.msk.bf16.vlgmr.msra.gmra.mxu1 %vm5556_vm3, %v9322_v25  ;;  %vm3222_vm6 = vcmp.eq.s32.totalorder %v7449_v16, %v3192_v4  ;;  %v8502_v41 = vpop.f32.mrf.mxu0 }
 0x25e   : > { %4049 = vperm.xlu1 %6720, %v8494_v50   ;;  %vm5506_vm7 = vmpackc.low %vm3223_vm1, %vm3222_vm6  ;;  %6433 = vmatprep.mubr.msk.bf16.mxu1 %vm5558_vm5, %v9322_v25 }
 0x25f   : > { %6405 = vmatprep.mubr.msk.bf16.mxu0 %vm5506_vm7, %v9322_v25  ;;  %6478 = vmatpush3.bf16.msra.mxu1 %v6830_v48  ;;  %v8509_v54 = vpop.f32.mrf.mxu0 }
 0x260   : > { %v3198_v56 = vpop.permute.xlu1 %3197  ;;  %6479 = vmatprep.subr.bf16.mxu1 %v6832_v49  ;;  %6460 = vmatpush3.bf16.msra.mxu0 %v6839_v59  ;;  %v6883_v59 = vld [vmem:[%s7271_s28 + $0x80] sm:$0xff] }
 0x261   : > { %6509 = vmatprep.subr.bf16.mxu0 %v8491_v36  ;;  %vm3224_vm11 = vcmp.eq.s32.totalorder %v7449_v16, %v3198_v56  ;;  %v8518_v4 = vpop.f32.mrf.mxu0  ;;  %v6838_v56 = vld [vmem:[%s7273_s25 + $0x358] sm:$0xff]  }
 0x262   : > { %4052 = vperm.xlu1 %6720, %v8465_v53  }
 0x263   : > { %6480 = vmatpush3.bf16.msra.mxu1 %v6832_v49  ;;  %v3482_v49 = vpop.permute.xlu0 %3481  ;;  %v8524_v63 = vpop.f32.mrf.mxu0 }
 0x264   : > { %v3201_v48 = vpop.permute.xlu1 %3200  ;;  %6481 = vmatprep.subr.bf16.mxu1 %v6834_v21  ;;  %9361 = vst [vmem:[#allocation25_spill] sm:$0xff] %v8524_v63  ;;  %vm3506_vm1 = vcmp.eq.s32.totalorder %v7449_v16, %v3482_v49 }
 0x265   : > { %6434 = vmatmul.mubr.msk.bf16.gmra.mxu1 %vm5560_vm10, %v9322_v25  ;;  %vm3225_vm12 = vcmp.eq.s32.totalorder %v7449_v16, %v3201_v48  ;;  %v6884_v48 = vld [vmem:[%s7271_s28 + $0x90] sm:$0xff]  ;;  %s6918_s28 = scalar_lea.vmem %s6917_s20, 8192 }
 0x266   : > { %6721 = vset.pattern.permute.xlu1 %v9328_v40  ;;  %vm5508_vm13 = vmpackc.low %vm3225_vm12, %vm3224_vm11  ;;  %p6920_p6 = scmp.lt.s32.totalorder %s6918_s28, %s6912_s23 }
 0x267   : > { %4291 = vperm.xlu1 %6721, %v6883_v59   ;;  %6406 = vmatmul.mubr.msk.bf16.gmra.mxu0 %vm5508_vm13, %v9322_v25  ;;  %v3485_v59 = vpop.permute.xlu0 %3484 }
 0x268   : > { %6482 = vmatpush3.bf16.msra.mxu1 %v6834_v21  ;;  %vm3507_vm10 = vcmp.eq.s32.totalorder %v7449_v16, %v3485_v59  ;;  %p6921_p8 = por %p6920_p6, %p6919_p3 }
 0x269   : > { %v3476_v38 = vpop.permute.xlu1 %3475  ;;  %6483 = vmatprep.subr.bf16.mxu1 %v6836_v44 }
 0x26a   : > { %vm3504_vm15 = vcmp.eq.s32.totalorder %v7449_v16, %v3476_v38  ;;  %v8531_v38 = vpop.f32.mrf.mxu0  ;;  %p6922_p9 = pnand %p6921_p8, %p6915_p1 }
 0x26b   : > { %4297 = vperm.xlu1 %6721, %v6884_v48   ;;  %vm5562_vm0 = vmpackc.low %vm3504_vm15, %vm3503_vm14  ;;  %9362 = vst [vmem:[#allocation26_spill] sm:$0xff] %v8531_v38  ;;  %v3494_v30 = vpop.permute.xlu0 %3493 }
 0x26c   : > { %6437 = vmatprep.mubr.msk.bf16.mxu1 %vm5562_vm0, %v9322_v25  ;;  %6484 = vmatpush3.bf16.msra.mxu1 %v6836_v44  ;;  %v6841_v44 = vld [vmem:[%s7273_s25 + $0x348] sm:$0xff]   ;;  %vm3510_vm13 = vcmp.eq.s32.totalorder %v7449_v16, %v3494_v30 }
 0x26d   : > { %v3479_v21 = vpop.permute.xlu1 %3478  ;;  %6485 = vmatprep.subr.bf16.mxu1 %v6838_v56 }
 0x26e   : > { %vm3505_vm2 = vcmp.eq.s32.totalorder %v7449_v16, %v3479_v21  ;;  %v8539_v21 = vpop.f32.mrf.mxu0 }
 0x26f   : > { %4300 = vperm.xlu1 %6721, %v6885_v0   ;;  %vm5564_vm3 = vmpackc.low %vm3506_vm1, %vm3505_vm2  ;;  %9363 = vst [vmem:[#allocation27_spill] sm:$0xff] %v8539_v21  ;;  %v3733_v24 = vpop.permute.xlu0 %3732 }
 0x270   : > { %6438 = vmatmul.mubr.msk.bf16.gmra.mxu1 %vm5564_vm3, %v9322_v25  ;;  %vm3777_vm0 = vcmp.eq.s32.totalorder %v7449_v16, %v3733_v24 }
 0x271   : > { %6486 = vmatpush3.bf16.msra.mxu1 %v6838_v56  ;;  %v8544_v56 = vpop.f32.mrf.mxu0 }
 0x272   : > { %v3204_v49 = vpop.permute.xlu1 %3203  ;;  %6487 = vmatprep.subr.bf16.mxu1 %v6840_v12  ;;  %9364 = vst [vmem:[#allocation28_spill] sm:$0xff] %v8544_v56 }
 0x273   : > { %6723 = vset.pattern.permute.xlu1 %v9343_v31  ;;  %vm3226_vm5 = vcmp.eq.s32.totalorder %v7449_v16, %v3204_v49  ;;  %v8551_v49 = vld [vmem:[%s7273_s25 + $0x3f8] sm:$0xff]   ;;  %v8553_v14 = vpop.f32.mrf.mxu0 }
 0x274   : > { %4575 = vperm.xlu1 %6723, %v8214_v17   ;;  %vm5510_vm6 = vmpackc.low %vm3227_vm4, %vm3226_vm5  ;;  %9365 = vst [vmem:[#allocation29_spill] sm:$0xff] %v8553_v14 }
 0x275   : > { %6409 = vmatprep.mubr.msk.bf16.mxu0 %vm5510_vm6, %v9322_v25  ;;  %6488 = vmatpush3.bf16.msra.mxu1 %v6840_v12  ;;  %v8561_v12 = vpop.permute.xlu0 %3744 }
 0x276   : > { %v3210_v0 = vpop.permute.xlu1 %3209  ;;  %6489 = vmatprep.subr.bf16.mxu1 %v6841_v44 }
 0x277   : > { %vm3228_vm7 = vcmp.eq.s32.totalorder %v7449_v16, %v3210_v0  ;;  %v8566_v0 = vpop.f32.mrf.mxu0 }
 0x278   : > { %4578 = vperm.xlu1 %6723, %v6884_v48   ;;  %9366 = vst [vmem:[#allocation30_spill] sm:$0xff] %v8566_v0 }
 0x279   : > { %6490 = vmatpush3.bf16.msra.mxu1 %v6841_v44  ;;  %v8576_v14 = vpop.f32.mrf.mxu0  ;;  %v8579_v56 = vpop.permute.xlu0 %3756 }
 0x27a   : > { %v3213_v20 = vpop.permute.xlu1 %3212  ;;  %6491 = vmatprep.subr.bf16.mxu1 %v6842_v45  ;;  %9367 = vst [vmem:[#allocation31_spill] sm:$0xff] %v8576_v14 }
 0x27b   : > { %vm3229_vm8 = vcmp.eq.s32.totalorder %v7449_v16, %v3213_v20  ;;  %v8548_v17 = vpop.f32.mrf.mxu1  ;;  %v8587_v30 = vpop.f32.mrf.mxu0 }
 0x27c   : > { %6724 = vset.pattern.permute.xlu1 %v9328_v40  ;;  %vm5512_vm9 = vmpackc.low %vm3229_vm8, %vm3228_vm7  ;;  %9368 = vst [vmem:[#allocation32_spill] sm:$0xff] %v8587_v30 }
 0x27d   : > { %4303 = vperm.xlu1 %6724, %v8256_v13   ;;  %v8557_v48 = vpop.f32.mrf.mxu1  ;;  %6410 = vmatmul.mubr.msk.bf16.gmra.mxu0 %vm5512_vm9, %v9322_v25  ;;  %v8599_v47 = vpop.f32.mrf.mxu0 }
 0x27e   : > { %6492 = vmatpush3.bf16.msra.mxu1 %v6842_v45  ;;  %9369 = vst [vmem:[#allocation33_spill] sm:$0xff] %v8599_v47  ;;  %v6844_v47 = vld [vmem:[%s7273_s25 + $0x3b0] sm:$0xff]  }
 0x27f   : > { %v3488_v20 = vpop.permute.xlu1 %3487  ;;  %v8563_v44 = vpop.f32.mrf.mxu1  ;;  %6541 = vmatprep.subr.bf16.mxu1 %v8551_v49 }
 0x280   : > { %vm3508_vm11 = vcmp.eq.s32.totalorder %v7449_v16, %v3488_v20 }
 0x281   : > { %4309 = vperm.xlu1 %6724, %v8273_v26   ;;  %vm5566_vm12 = vmpackc.low %vm3508_vm11, %vm3507_vm10  ;;  %v8570_v13 = vpop.f32.mrf.mxu1 }
 0x282   : > { %6441 = vmatprep.mubr.msk.bf16.mxu1 %vm5566_vm12, %v9322_v25  ;;  %vm3781_vm12 = vcmp.eq.s32.totalorder %v7449_v16, %v8561_v12 }
 0x283   : > { %v3491_v59 = vpop.permute.xlu1 %3490  ;;  %v8574_v45 = vpop.f32.mrf.mxu1 }
 0x284   : > { %vm3509_vm14 = vcmp.eq.s32.totalorder %v7449_v16, %v3491_v59 }
 0x285   : > { %4312 = vperm.xlu1 %6724, %v8295_v34   ;;  %vm5568_vm15 = vmpackc.low %vm3510_vm13, %vm3509_vm14  ;;  %v8582_v20 = vpop.f32.mrf.mxu1  ;;  %v8595_v34 = vpop.permute.xlu0 %3768 }
 0x286   : > { %6442 = vmatmul.mubr.msk.bf16.gmra.mxu1 %vm5568_vm15, %v9322_v25 }
 0x287   : > { %v8585_v0 = vpop.f32.mrf.mxu1 }
 0x289   : > { %6725 = vset.pattern.permute.xlu1 %v9343_v31  ;;  %v3730_v14 = vpop.permute.xlu1 %3729  ;;  %v8591_v32 = vpop.f32.mrf.mxu1 }
 0x28a   : > { %4587 = vperm.xlu1 %6725, %v8320_v18   ;;  %vm3776_vm1 = vcmp.eq.s32.totalorder %v7449_v16, %v3730_v14  ;;  %v8607_v18 = vpop.f32.mrf.mxu0  ;;  %v4011_v14 = vpop.permute.xlu0 %4010 }
 0x28b   : > { %vm5610_vm2 = vmpackc.low %vm3777_vm0, %vm3776_vm1  ;;  %v8597_v59 = vpop.f32.mrf.mxu1  ;;  %9371 = vst [vmem:[#allocation35_spill] sm:$0xff] %v8607_v18  ;;  %vm4057_vm6 = vcmp.eq.s32.totalorder %v7449_v16, %v4011_v14 }
 0x28c   : > { %6461 = vmatprep.mubr.msk.bf16.mxu0 %vm5610_vm2, %v9322_v25  ;;  %v8619_v18 = vpop.f32.mrf.mxu0 }
 0x28d   : > { %v3736_v24 = vpop.permute.xlu1 %3735  ;;  %v8602_v30 = vpop.f32.mrf.mxu1  ;;  %9374 = vst [vmem:[#allocation38_spill] sm:$0xff] %v8619_v18  ;;  %v6847_v18 = vld [vmem:[%s7273_s25 + $0x3a0] sm:$0xff]  }
 0x28e   : > { %4590 = vperm.xlu1 %6725, %v8273_v26   ;;  %vm3778_vm3 = vcmp.eq.s32.totalorder %v7449_v16, %v3736_v24  ;;  %v4020_v22 = vpop.permute.xlu0 %4019 }
 0x28f   : > { %v8605_v21 = vpop.f32.mrf.mxu1  ;;  %vm4060_vm9 = vcmp.eq.s32.totalorder %v7449_v16, %v4020_v22  ;;  %v6849_v22 = vld [vmem:[%s7273_s25 + $0x398] sm:$0xff]  }
 0x290   : > { %9370 = vst [vmem:[#allocation34_spill] sm:$0xff] %v8605_v21  ;;  %v6854_v21 = vld [vmem:[%s7273_s25 + $0x3d8] sm:$0xff]  }
 0x291   : > { %v3739_v27 = vpop.permute.xlu1 %3738  ;;  %v8609_v39 = vpop.f32.mrf.mxu1 }
 0x292   : > { %9372 = vst [vmem:[#allocation36_spill] sm:$0xff] %v8609_v39  ;;  %6726 = vset.pattern.permute.xlu1 %v9328_v40  ;;  %vm3779_vm4 = vcmp.eq.s32.totalorder %v7449_v16, %v3739_v27  ;;  %v6845_v27 = vld [vmem:[%s7273_s25 + $0x3a8] sm:$0xff]  }
 0x293   : > { %vm5612_vm5 = vmpackc.low %vm3779_vm4, %vm3778_vm3  ;;  %4315 = vperm.xlu1 %6726, %v8347_v10   ;;  %v8616_v26 = vpop.f32.mrf.mxu1 }
 0x294   : > { %9373 = vst [vmem:[#allocation37_spill] sm:$0xff] %v8616_v26  ;;  %6462 = vmatmul.mubr.msk.bf16.vlgmr.msra.gmra.mxu0 %vm5612_vm5, %v9322_v25  ;;  %v8630_v26 = vpop.f32.mrf.mxu0 }
 0x295   : > { %v8621_v38 = vpop.f32.mrf.mxu1  ;;  %6510 = vmatpush3.bf16.msra.mxu0 %v8491_v36 }
 0x296   : > { %9375 = vst [vmem:[#allocation39_spill] sm:$0xff] %v8621_v38  ;;  %v4014_v24 = vpop.permute.xlu1 %4013  ;;  %6511 = vmatprep.subr.bf16.mxu0 %v6844_v47  ;;  %v8642_v38 = vpop.f32.mrf.mxu0 }
 0x297   : > { %4321 = vperm.xlu1 %6726, %v8378_v61   ;;  %vm4058_vm7 = vcmp.eq.s32.totalorder %v7449_v16, %v4014_v24  ;;  %v8628_v10 = vpop.f32.mrf.mxu1 }
 0x298   : > { %9376 = vst [vmem:[#allocation40_spill] sm:$0xff] %v8628_v10  ;;  %vm5666_vm8 = vmpackc.low %vm4058_vm7, %vm4057_vm6  ;;  %v6848_v10 = vld [vmem:[%s7273_s25 + $0x3f0] sm:$0xff]   ;;  %v8655_v39 = vpop.f32.mrf.mxu0 }
 0x299   : > { %6493 = vmatprep.mubr.msk.bf16.mxu1 %vm5666_vm8, %v9322_v25  ;;  %v8633_v14 = vpop.f32.mrf.mxu1  ;;  %6512 = vmatpush3.bf16.msra.mxu0 %v6844_v47  ;;  %9378 = vst [vmem:[#allocation42_spill] sm:$0xff] %v8655_v39  ;;  %v6852_v39 = vld [vmem:[%s7273_s25 + $0x3e0] sm:$0xff]   ;;  %vm3785_vm8 = vcmp.eq.s32.totalorder %v7449_v16, %v8579_v56 }
 0x29a   : > { %9377 = vst [vmem:[#allocation41_spill] sm:$0xff] %v8633_v14  ;;  %v4017_v36 = vpop.permute.xlu1 %4016  ;;  %6513 = vmatprep.subr.bf16.mxu0 %v6845_v27  ;;  %v8666_v63 = vpop.f32.mrf.mxu0 }
 0x29b   : > { %4324 = vperm.xlu1 %6726, %v8364_v35   ;;  %vm4059_vm10 = vcmp.eq.s32.totalorder %v7449_v16, %v4017_v36  ;;  %v8639_v24 = vpop.f32.mrf.mxu1  ;;  %v6850_v36 = vld [vmem:[%s7273_s25 + $0x3e8] sm:$0xff]  }
 0x29c   : > { %vm5668_vm11 = vmpackc.low %vm4060_vm9, %vm4059_vm10  ;;  %v8675_v11 = vpop.f32.mrf.mxu0 }
 0x29d   : > { %6494 = vmatmul.mubr.msk.bf16.vlgmr.msra.gmra.mxu1 %vm5668_vm11, %v9322_v25  ;;  %v8645_v14 = vpop.f32.mrf.mxu1  ;;  %6514 = vmatpush3.bf16.msra.mxu0 %v6845_v27  ;;  %9379 = vst [vmem:[#allocation43_spill] sm:$0xff] %v8675_v11 }
 0x29e   : > { %6542 = vmatpush3.bf16.msra.mxu1 %v8551_v49  ;;  %6515 = vmatprep.subr.bf16.mxu0 %v6847_v18  ;;  %v6851_v49 = vld [vmem:[%s7273_s25 + $0x390] sm:$0xff]  }
 0x29f   : > { %6727 = vset.pattern.permute.xlu1 %v9343_v31  ;;  %v3742_v47 = vpop.permute.xlu1 %3741  ;;  %v8651_v35 = vpop.f32.mrf.mxu1  ;;  %6543 = vmatprep.subr.bf16.mxu1 %v6848_v10 }
 0x2a0   : > { %4599 = vperm.xlu1 %6727, %v8427_v6   ;;  %vm3780_vm13 = vcmp.eq.s32.totalorder %v7449_v16, %v3742_v47  ;;  %v4023_v47 = vpop.permute.xlu0 %4022 }
 0x2a1   : > { %vm5614_vm14 = vmpackc.low %vm3781_vm12, %vm3780_vm13  ;;  %v8659_v12 = vpop.f32.mrf.mxu1  ;;  %6516 = vmatpush3.bf16.msra.mxu0 %v6847_v18  ;;  %vm4061_vm2 = vcmp.eq.s32.totalorder %v7449_v16, %v4023_v47 }
 0x2a2   : > { %6465 = vmatprep.mubr.msk.bf16.mxu0 %vm5614_vm14, %v9322_v25  ;;  %6544 = vmatpush3.bf16.msra.mxu1 %v6848_v10 }
 0x2a3   : > { %v3748_v27 = vpop.permute.xlu1 %3747  ;;  %v8663_v15 = vpop.f32.mrf.mxu1  ;;  %6517 = vmatprep.subr.bf16.mxu0 %v6849_v22  ;;  %6545 = vmatprep.subr.bf16.mxu1 %v6850_v36 }
 0x2a4   : > { %4602 = vperm.xlu1 %6727, %v8378_v61   ;;  %vm3782_vm15 = vcmp.eq.s32.totalorder %v7449_v16, %v3748_v27  ;;  %v4032_v11 = vpop.permute.xlu0 %4031  ;;  %v8689_v27 = vpop.f32.mrf.mxu0 }
 0x2a5   : > { %v8669_v6 = vpop.f32.mrf.mxu1  ;;  %6518 = vmatpush3.bf16.msra.mxu0 %v6849_v22  ;;  %v6855_v22 = vld [vmem:[%s7273_s25 + $0x380] sm:$0xff]   ;;  %9380 = vst [vmem:[#allocation44_spill] sm:$0xff] %v8689_v27  ;;  %vm4064_vm5 = vcmp.eq.s32.totalorder %v7449_v16, %v4032_v11 }
 0x2a6   : > { %6546 = vmatpush3.bf16.msra.mxu1 %v6850_v36  ;;  %6519 = vmatprep.subr.bf16.mxu0 %v6851_v49  ;;  %v8700_v47 = vpop.f32.mrf.mxu0  ;;  %v6858_v11 = vld [vmem:[%s7273_s25 + $0x3c0] sm:$0xff]  }
 0x2a7   : > { %v3751_v18 = vpop.permute.xlu1 %3750  ;;  %v8671_v10 = vpop.f32.mrf.mxu1  ;;  %6547 = vmatprep.subr.bf16.mxu1 %v6852_v39  ;;  %9382 = vst [vmem:[#allocation46_spill] sm:$0xff] %v8700_v47 }
 0x2a8   : > { %6728 = vset.pattern.permute.xlu1 %v9328_v40  ;;  %vm3783_vm0 = vcmp.eq.s32.totalorder %v7449_v16, %v3751_v18  ;;  %v6856_v40 = vld [vmem:[%s7273_s25 + $0x3d0] sm:$0xff]  }
 0x2a9   : > { %vm5616_vm1 = vmpackc.low %vm3783_vm0, %vm3782_vm15  ;;  %4327 = vperm.xlu1 %6728, %v8387_v2   ;;  %v8681_v61 = vpop.f32.mrf.mxu1  ;;  %6520 = vmatpush3.bf16.msra.mxu0 %v6851_v49  ;;  %v6857_v49 = vld [vmem:[%s7273_s25 + $0x3c8] sm:$0xff]  }
 0x2aa   : > { %6466 = vmatmul.mubr.msk.bf16.gmra.mxu0 %vm5616_vm1, %v9322_v25  ;;  %6548 = vmatpush3.bf16.msra.mxu1 %v6852_v39 }
 0x2ab   : > { %v8685_v36 = vpop.f32.mrf.mxu1  ;;  %6521 = vmatprep.subr.bf16.mxu0 %v6853_v46  ;;  %6549 = vmatprep.subr.bf16.mxu1 %v6854_v21 }
 0x2ac   : > { %v4026_v18 = vpop.permute.xlu1 %4025 }
 0x2ad   : > { %4333 = vperm.xlu1 %6728, %v8465_v53   ;;  %vm4062_vm3 = vcmp.eq.s32.totalorder %v7449_v16, %v4026_v18  ;;  %v8693_v2 = vpop.f32.mrf.mxu1  ;;  %6522 = vmatpush3.bf16.msra.mxu0 %v6853_v46  ;;  %v8710_v18 = vpop.f32.mrf.mxu0 }
 0x2ae   : > { %vm5670_vm4 = vmpackc.low %vm4062_vm3, %vm4061_vm2  ;;  %6550 = vmatpush3.bf16.msra.mxu1 %v6854_v21  ;;  %6523 = vmatprep.subr.bf16.mxu0 %v6855_v22  ;;  %9385 = vst [vmem:[#allocation49_spill] sm:$0xff] %v8710_v18 }
 0x2af   : > { %6497 = vmatprep.mubr.msk.bf16.mxu1 %vm5670_vm4, %v9322_v25  ;;  %v8696_v39 = vpop.f32.mrf.mxu1  ;;  %6551 = vmatprep.subr.bf16.mxu1 %v6856_v40  ;;  %v8722_v18 = vpop.f32.mrf.mxu0  ;;  %vm3789_vm4 = vcmp.eq.s32.totalorder %v7449_v16, %v8595_v34  ;;  %v857_v34 = vadd.f32 %v8570_v13, %v8035_v52  ;;  %v870_v52 = vadd.f32 %v8582_v20, %v8062_v7 }
 0x2b0   : > { %9381 = vst [vmem:[#allocation45_spill] sm:$0xff] %v8696_v39  ;;  %v4029_v27 = vpop.permute.xlu1 %4028  ;;  %9388 = vst [vmem:[#allocation52_spill] sm:$0xff] %v8722_v18 }
 0x2b1   : > { %4336 = vperm.xlu1 %6728, %v8413_v1   ;;  %vm4063_vm6 = vcmp.eq.s32.totalorder %v7449_v16, %v4029_v27  ;;  %v8704_v46 = vpop.f32.mrf.mxu1  ;;  %6524 = vmatpush3.bf16.msra.mxu0 %v6855_v22  ;;  %v1182_v13 = vadd.f32 %v8262_v19, %v857_v34 }
 0x2b2   : > { %9383 = vst [vmem:[#allocation47_spill] sm:$0xff] %v8704_v46  ;;  %vm5672_vm7 = vmpackc.low %vm4064_vm5, %vm4063_vm6  ;;  %6552 = vmatpush3.bf16.msra.mxu1 %v6856_v40  ;;  %v4035_v40 = vpop.permute.xlu0 %4034 }
 0x2b3   : > { %6498 = vmatmul.mubr.msk.bf16.gmra.mxu1 %vm5672_vm7, %v9322_v25  ;;  %v8707_v21 = vpop.f32.mrf.mxu1  ;;  %6553 = vmatprep.subr.bf16.mxu1 %v6857_v49  ;;  %vm4065_vm14 = vcmp.eq.s32.totalorder %v7449_v16, %v4035_v40  ;;  %v1463_v20 = vadd.f32 %v8659_v12, %v1182_v13  ;;  %v1185_v12 = vadd.f32 %v8301_v62, %v870_v52  ;;  %v9402_v52 = vld [vmem:[#allocation25_spill] sm:$0xff] }
 0x2b4   : > { %9384 = vst [vmem:[#allocation48_spill] sm:$0xff] %v8707_v21 }
 0x2b5   : > { %6730 = vset.pattern.permute.xlu1 %v9343_v31  ;;  %v3754_v1 = vpop.permute.xlu1 %3753  ;;  %v8715_v27 = vpop.f32.mrf.mxu1 }
 0x2b6   : > { %9386 = vst [vmem:[#allocation50_spill] sm:$0xff] %v8715_v27  ;;  %4611 = vperm.xlu1 %6730, %v8494_v50   ;;  %vm3784_vm9 = vcmp.eq.s32.totalorder %v7449_v16, %v3754_v1  ;;  %6554 = vmatpush3.bf16.msra.mxu1 %v6857_v49  ;;  %v8729_v50 = vpop.f32.mrf.mxu0 }
 0x2b7   : > { %vm5618_vm10 = vmpackc.low %vm3785_vm8, %vm3784_vm9  ;;  %v8719_v22 = vpop.f32.mrf.mxu1  ;;  %6555 = vmatprep.subr.bf16.mxu1 %v6858_v11  ;;  %9390 = vst [vmem:[#allocation54_spill] sm:$0xff] %v8729_v50 }
 0x2b8   : > { %9387 = vst [vmem:[#allocation51_spill] sm:$0xff] %v8719_v22  ;;  %6469 = vmatprep.mubr.msk.bf16.mxu0 %vm5618_vm10, %v9322_v25  ;;  %v4044_v22 = vpop.permute.xlu0 %4043 }
 0x2b9   : > { %v8724_v56 = vpop.f32.mrf.mxu1  ;;  %vm4068_vm1 = vcmp.eq.s32.totalorder %v7449_v16, %v4044_v22 }
 0x2ba   : > { %9389 = vst [vmem:[#allocation53_spill] sm:$0xff] %v8724_v56  ;;  %4614 = vperm.xlu1 %6730, %v8465_v53   ;;  %v3760_v31 = vpop.permute.xlu1 %3759  ;;  %6556 = vmatpush3.bf16.msra.mxu1 %v6858_v11  ;;  %v8738_v53 = vpop.f32.mrf.mxu0 }
 0x2bb   : > { %vm3786_vm11 = vcmp.eq.s32.totalorder %v7449_v16, %v3760_v31  ;;  %9391 = vst [vmem:[#allocation55_spill] sm:$0xff] %v8738_v53 }
 0x2bc   : > { %v8727_v27 = vpop.f32.mrf.mxu1  ;;  %v8743_v50 = vpop.permute.xlu0 %4046 }
 0x2bd   : > { %vm4069_vm10 = vcmp.eq.s32.totalorder %v7449_v16, %v8743_v50 }
 0x2be   : > { %v3763_v49 = vpop.permute.xlu1 %3762  ;;  %v8731_v1 = vpop.f32.mrf.mxu1 }
 0x2bf   : > { %vm3787_vm12 = vcmp.eq.s32.totalorder %v7449_v16, %v3763_v49  ;;  %v8748_v49 = vpop.f32.mrf.mxu0 }
 0x2c0   : > { %vm5620_vm13 = vmpackc.low %vm3787_vm12, %vm3786_vm11  ;;  %v8735_v18 = vpop.f32.mrf.mxu1  ;;  %9392 = vst [vmem:[#allocation56_spill] sm:$0xff] %v8748_v49  ;;  %v8757_v47 = vpop.permute.xlu0 %4055  ;;  %v862_v49 = vadd.f32 %v8548_v17, %v7990_v8 }
 0x2c1   : > { %6470 = vmatmul.mubr.msk.bf16.gmra.mxu0 %vm5620_vm13, %v9322_v25  ;;  %vm4072_vm13 = vcmp.eq.s32.totalorder %v7449_v16, %v8757_v47 }
 0x2c2   : > { %v8740_v11 = vpop.f32.mrf.mxu1  ;;  %v1183_v8 = vadd.f32 %v8208_v58, %v862_v49 }
 0x2c3   : > { %v4038_v56 = vpop.permute.xlu1 %4037 }
 0x2c4   : > { %vm4066_vm15 = vcmp.eq.s32.totalorder %v7449_v16, %v4038_v56  ;;  %v8746_v31 = vpop.f32.mrf.mxu1  ;;  %v8759_v56 = vpop.f32.mrf.mxu0 }
 0x2c5   : > { %vm5674_vm0 = vmpackc.low %vm4066_vm15, %vm4065_vm14  ;;  %9394 = vst [vmem:[#allocation58_spill] sm:$0xff] %v8759_v56  ;;  %v8781_v17 = vpop.permute.xlu0 %4294 }
 0x2c6   : > { %6501 = vmatprep.mubr.msk.bf16.mxu1 %vm5674_vm0, %v9322_v25  ;;  %v8751_v21 = vpop.f32.mrf.mxu1  ;;  %vm4339_vm0 = vcmp.eq.s32.totalorder %v7449_v16, %v8781_v17 }
 0x2c7   : > { %v4041_v53 = vpop.permute.xlu1 %4040 }
 0x2c8   : > { %vm4067_vm2 = vcmp.eq.s32.totalorder %v7449_v16, %v4041_v53  ;;  %v8755_v40 = vpop.f32.mrf.mxu1  ;;  %v854_v53 = vadd.f32 %v8557_v48, %v8008_v5 }
 0x2c9   : > { %9393 = vst [vmem:[#allocation57_spill] sm:$0xff] %v8755_v40  ;;  %vm5676_vm3 = vmpackc.low %vm4068_vm1, %vm4067_vm2  ;;  %v8773_v40 = vpop.f32.mrf.mxu0 }
 0x2ca   : > { %6502 = vmatmul.mubr.msk.bf16.gmra.mxu1 %vm5676_vm3, %v9322_v25  ;;  %v8762_v46 = vpop.f32.mrf.mxu1  ;;  %9396 = vst [vmem:[#allocation60_spill] sm:$0xff] %v8773_v40  ;;  %v1181_v40 = vadd.f32 %v8229_v60, %v854_v53  ;;  %v1466_v53 = vadd.f32 %v8669_v6, %v1185_v12 }
 0x2cb   : > { %9395 = vst [vmem:[#allocation59_spill] sm:$0xff] %v8762_v46  ;;  %v865_v46 = vadd.f32 %v8563_v44, %v8019_v42  ;;  %v8791_v42 = vpop.f32.mrf.mxu0 }
 0x2cc   : > { %v3766_v22 = vpop.permute.xlu1 %3765  ;;  %v8768_v39 = vpop.f32.mrf.mxu1  ;;  %v1462_v44 = vadd.f32 %v8645_v14, %v1181_v40 }
 0x2cd   : > { %vm3788_vm5 = vcmp.eq.s32.totalorder %v7449_v16, %v3766_v22  ;;  %v1464_v22 = vadd.f32 %v8639_v24, %v1183_v8  ;;  %v1184_v49 = vadd.f32 %v8247_v55, %v865_v46  ;;  %v881_v55 = vadd.f32 %v8585_v0, %v8070_v28  ;;  %v8810_v14 = vpop.f32.mrf.mxu0 }
 0x2ce   : > { %vm5622_vm6 = vmpackc.low %vm3789_vm4, %vm3788_vm5  ;;  %v8775_v56 = vpop.f32.mrf.mxu1  ;;  %v873_v46 = vadd.f32 %v8591_v32, %v8085_v51 }
 0x2cf   : > { %9397 = vst [vmem:[#allocation61_spill] sm:$0xff] %v8775_v56  ;;  %6473 = vmatprep.mubr.msk.bf16.mxu0 %vm5622_vm6, %v9322_v25  ;;  %v878_v56 = vadd.f32 %v8574_v45, %v8043_v29  ;;  %v1465_v60 = vadd.f32 %v8651_v35, %v1184_v49  ;;  %v1745_v29 = vadd.f32 %v8473_v43, %v1464_v22  ;;  %v8806_v45 = vpop.permute.xlu0 %4306 }
 0x2d0   : > { %v3772_v5 = vpop.permute.xlu1 %3771  ;;  %v8785_v48 = vpop.f32.mrf.mxu1  ;;  %v1743_v35 = vadd.f32 %v8483_v33, %v1462_v44  ;;  %v1188_v51 = vadd.f32 %v8330_v3, %v881_v55  ;;  %v886_v3 = vadd.f32 %v8602_v30, %v8111_v9  ;;  %v9400_v30 = vld [vmem:[#allocation34_spill] sm:$0xff] }
 0x2d1   : > { %9398 = vst [vmem:[#allocation62_spill] sm:$0xff] %v8785_v48  ;;  %vm3790_vm7 = vcmp.eq.s32.totalorder %v7449_v16, %v3772_v5  ;;  %v1187_v7 = vadd.f32 %v8285_v57, %v878_v56  ;;  %v2026_v43 = vadd.f32 %v8727_v27, %v1745_v29  ;;  %v1746_v33 = vadd.f32 %v8502_v41, %v1465_v60  ;;  %v9404_v60 = vld [vmem:[#allocation11_spill] sm:$0xff]  ;;  %v9405_v29 = vld [vmem:[#allocation36_spill] sm:$0xff] }
 0x2d2   : > { %v8793_v58 = vpop.f32.mrf.mxu1  ;;  %v2024_v27 = vadd.f32 %v8731_v1, %v1743_v35  ;;  %v894_v56 = vadd.f32 %v8597_v59, %v8098_v37  ;;  %v1744_v1 = vadd.f32 %v8509_v54, %v1463_v20  ;;  %v1186_v59 = vadd.f32 %v8340_v23, %v873_v46  ;;  %v9399_v23 = vld [vmem:[#allocation15_spill] sm:$0xff]  ;;  %v9407_v46 = vld [vmem:[#allocation26_spill] sm:$0xff] }
 0x2d3   : > { %v1468_v28 = vadd.f32 %v8663_v15, %v1187_v7  ;;  %v2027_v62 = vadd.f32 %v8735_v18, %v1746_v33  ;;  %v2307_v37 = vadd.f32 %v8630_v26, %v2026_v43  ;;  %v8846_v41 = vpop.permute.xlu0 %4318  ;;  %v1469_v26 = vadd.f32 %v8671_v10, %v1188_v51  ;;  %v9408_v33 = vld [vmem:[#allocation17_spill] sm:$0xff] }
 0x2d4   : > { %v3775_v48 = vpop.permute.xlu1 %3774  ;;  %v8800_v24 = vpop.f32.mrf.mxu1  ;;  %v2025_v18 = vadd.f32 %v8740_v11, %v1744_v1  ;;  %v2305_v9 = vadd.f32 %v8642_v38, %v2024_v27  ;;  %v1467_v5 = vadd.f32 %v8681_v61, %v1186_v59  ;;  %v1747_v11 = vadd.f32 %v9402_v52, %v1466_v53  ;;  %v9403_v61 = vld [vmem:[#allocation42_spill] sm:$0xff]  ;;  %v9410_v53 = vld [vmem:[#allocation23_spill] sm:$0xff]  ;;  %v9412_v59 = vld [vmem:[#allocation57_spill] sm:$0xff] }
 0x2d5   : > { %vm3791_vm8 = vcmp.eq.s32.totalorder %v7449_v16, %v3775_v48  ;;  %v1749_v8 = vadd.f32 %v8518_v4, %v1468_v28  ;;  %v897_v4 = vadd.f32 %v9400_v30, %v9399_v23  ;;  %v9401_v48 = vld [vmem:[#allocation21_spill] sm:$0xff]  ;;  %v2308_v13 = vadd.f32 %v9403_v61, %v2027_v62  ;;  %v9411_v1 = vld [vmem:[#allocation27_spill] sm:$0xff]  ;;  %v9417_v30 = vld [vmem:[#allocation28_spill] sm:$0xff] }
 0x2d6   : > { %vm5624_vm9 = vmpackc.low %vm3791_vm8, %vm3790_vm7  ;;  %v8813_v19 = vpop.f32.mrf.mxu1  ;;  %v1191_v22 = vadd.f32 %v9401_v48, %v894_v56  ;;  %v889_v55 = vadd.f32 %v9405_v29, %v9404_v60  ;;  %v2028_v35 = vadd.f32 %v8751_v21, %v1747_v11  ;;  %v1750_v28 = vadd.f32 %v9407_v46, %v1469_v26  ;;  %v9413_v26 = vld [vmem:[#allocation43_spill] sm:$0xff]  ;;  %v9418_v48 = vld [vmem:[#allocation45_spill] sm:$0xff] }
 0x2d7   : > { %6474 = vmatmul.mubr.msk.bf16.gmra.mxu0 %vm5624_vm9, %v9322_v25  ;;  %v2030_v10 = vadd.f32 %v8746_v31, %v1749_v8  ;;  %v9406_v31 = vld [vmem:[#allocation14_spill] sm:$0xff]  ;;  %v2306_v27 = vadd.f32 %v8666_v63, %v2025_v18  ;;  %v1192_v62 = vadd.f32 %v9410_v53, %v897_v4  ;;  %v9422_v60 = vld [vmem:[#allocation40_spill] sm:$0xff]  ;;  %v9427_v53 = vld [vmem:[#allocation13_spill] sm:$0xff] }
 0x2d8   : > { %v8824_v57 = vpop.f32.mrf.mxu1  ;;  %v8826_v0 = vpop.f32.mrf.mxu0  ;;  %v1472_v7 = vadd.f32 %v8685_v36, %v1191_v22  ;;  %v1189_v20 = vadd.f32 %v9406_v31, %v886_v3  ;;  %v2031_v8 = vadd.f32 %v9412_v59, %v1750_v28  ;;  %v9425_v28 = vld [vmem:[#allocation29_spill] sm:$0xff] }
 0x2d9   : > { %v4050_v40 = vpop.permute.xlu1 %4049  ;;  %v8890_v36 = vpop.permute.xlu0 %4330  ;;  %v2311_v18 = vadd.f32 %v9413_v26, %v2030_v10  ;;  %v1473_v22 = vadd.f32 %v9418_v48, %v1192_v62  ;;  %v9428_v62 = vld [vmem:[#allocation41_spill] sm:$0xff]  ;;  %v9436_v48 = vld [vmem:[#allocation31_spill] sm:$0xff] }
 0x2da   : > { %vm4070_vm11 = vcmp.eq.s32.totalorder %v7449_v16, %v4050_v40  ;;  %v8835_v15 = vpop.f32.mrf.mxu1  ;;  %v8837_v32 = vpop.f32.mrf.mxu0  ;;  %v9409_v40 = vld [vmem:[#allocation37_spill] sm:$0xff]  ;;  %v1470_v51 = vadd.f32 %v8693_v2, %v1189_v20  ;;  %v1753_v4 = vadd.f32 %v9417_v30, %v1472_v7  ;;  %v9424_v7 = vld [vmem:[#allocation18_spill] sm:$0xff] }
 0x2db   : > { %vm5678_vm12 = vmpackc.low %vm4070_vm11, %vm4069_vm10  ;;  %v910_v56 = vadd.f32 %v9409_v40, %v9408_v33  ;;  %v9426_v40 = vld [vmem:[#allocation46_spill] sm:$0xff] }
 0x2dc   : > { %6505 = vmatprep.mubr.msk.bf16.mxu1 %vm5678_vm12, %v9322_v25  ;;  %v6303_v54 = vpop.f32.mrf.mxu1  ;;  %v8855_v6 = vpop.f32.mrf.mxu0  ;;  %v2034_v20 = vadd.f32 %v8768_v39, %v1753_v4  ;;  %v9435_v4 = vld [vmem:[#allocation22_spill] sm:$0xff]  ;;  %vm4343_vm12 = vcmp.eq.s32.totalorder %v7449_v16, %v8806_v45 }
 0x2dd   : > { %v4053_v50 = vpop.permute.xlu1 %4052  ;;  %v2588_v34 = vadd.f32 %v6303_v54, %v2307_v37  ;;  %v1748_v37 = vadd.f32 %v9411_v1, %v1467_v5  ;;  %v1195_v31 = vadd.f32 %v9424_v7, %v910_v56  ;;  %v905_v1 = vadd.f32 %v9428_v62, %v9427_v53  ;;  %v4573_v39 = vpop.permute.xlu0 %4572 }
 0x2de   : > { %vm4071_vm14 = vcmp.eq.s32.totalorder %v7449_v16, %v4053_v50  ;;  %v2523_v44 = vpop.f32.mrf.mxu1  ;;  %v8865_v49 = vpop.f32.mrf.mxu0  ;;  %v9414_v50 = vld [vmem:[#allocation12_spill] sm:$0xff]  ;;  %vm4619_vm6 = vcmp.eq.s32.totalorder %v7449_v16, %v4573_v39 }
 0x2df   : > { %vm5680_vm15 = vmpackc.low %vm4072_vm13, %vm4071_vm14  ;;  %2604 = vst [vmem:[%s8873_s3 + $0x20] sm:$0xff] %v2588_v34  ;;  %v2586_v38 = vadd.f32 %v2523_v44, %v2305_v9  ;;  %v9415_v34 = vld [vmem:[#allocation39_spill] sm:$0xff]  ;;  %v9416_v9 = vld [vmem:[#allocation16_spill] sm:$0xff] }
 0x2e0   : > { %6506 = vmatmul.mubr.msk.bf16.gmra.mxu1 %vm5680_vm15, %v9322_v25  ;;  %v6304_v47 = vpop.f32.mrf.mxu1  ;;  %v8884_v43 = vpop.f32.mrf.mxu0  ;;  %v902_v2 = vadd.f32 %v9415_v34, %v9414_v50  ;;  %v1190_v23 = vadd.f32 %v9416_v9, %v889_v55  ;;  %v9419_v44 = vld [vmem:[#allocation59_spill] sm:$0xff]  ;;  %v9433_v9 = vld [vmem:[#allocation49_spill] sm:$0xff] }
 0x2e1   : > { %2602 = vst [vmem:[%s8873_s3] sm:$0xff] %v2586_v38  ;;  %v2589_v12 = vadd.f32 %v6304_v47, %v2308_v13  ;;  %v2029_v52 = vadd.f32 %v9419_v44, %v1748_v37  ;;  %v9420_v38 = vld [vmem:[#allocation44_spill] sm:$0xff]  ;;  %v9421_v13 = vld [vmem:[#allocation19_spill] sm:$0xff] }
 0x2e2   : > { %v4292_v3 = vpop.permute.xlu1 %4291  ;;  %v2526_v21 = vpop.f32.mrf.mxu1  ;;  %v2309_v61 = vadd.f32 %v9420_v38, %v2028_v35  ;;  %v913_v29 = vadd.f32 %v9422_v60, %v9421_v13  ;;  %v9423_v55 = vld [vmem:[#allocation47_spill] sm:$0xff]  ;;  %v2312_v35 = vadd.f32 %v9426_v40, %v2031_v8  ;;  %v9429_v37 = vld [vmem:[#allocation48_spill] sm:$0xff]  ;;  %v9438_v13 = vld [vmem:[#allocation62_spill] sm:$0xff] }
 0x2e3   : > { %2605 = vst [vmem:[%s8873_s3 + $0x30] sm:$0xff] %v2589_v12  ;;  %vm4338_vm1 = vcmp.eq.s32.totalorder %v7449_v16, %v4292_v3  ;;  %v2587_v63 = vadd.f32 %v2526_v21, %v2306_v27  ;;  %v8900_v54 = vpop.f32.mrf.mxu0  ;;  %v1471_v17 = vadd.f32 %v9423_v55, %v1190_v23  ;;  %v1751_v12 = vadd.f32 %v9425_v28, %v1470_v51  ;;  %v9430_v21 = vld [vmem:[#allocation20_spill] sm:$0xff]  ;;  %v9434_v23 = vld [vmem:[#allocation50_spill] sm:$0xff] }
 0x2e4   : > { %vm5722_vm2 = vmpackc.low %vm4339_vm0, %vm4338_vm1  ;;  %v6307_v5 = vpop.f32.mrf.mxu1  ;;  %v1476_v3 = vadd.f32 %v9429_v37, %v1195_v31  ;;  %v1193_v56 = vadd.f32 %v9430_v21, %v902_v2  ;;  %v2310_v8 = vadd.f32 %v9433_v9, %v2029_v52  ;;  %v9437_v38 = vld [vmem:[#allocation52_spill] sm:$0xff]  ;;  %v9444_v37 = vld [vmem:[#allocation53_spill] sm:$0xff] }
 0x2e5   : > { %2603 = vst [vmem:[%s8873_s3 + $0x10] sm:$0xff] %v2587_v63  ;;  %v2592_v11 = vadd.f32 %v6307_v5, %v2311_v18  ;;  %6525 = vmatprep.mubr.msk.bf16.mxu0 %vm5722_vm2, %v9322_v25  ;;  %v8914_v10 = vpop.f32.mrf.mxu0  ;;  %v9431_v63 = vld [vmem:[#allocation61_spill] sm:$0xff]  ;;  %v9432_v18 = vld [vmem:[#allocation30_spill] sm:$0xff]  ;;  %v1196_v5 = vadd.f32 %v9435_v4, %v913_v29  ;;  %v1752_v44 = vadd.f32 %v9436_v48, %v1471_v17  ;;  %v9439_v55 = vld [vmem:[#allocation24_spill] sm:$0xff] }
 0x2e6   : > { %v4298_v47 = vpop.permute.xlu1 %4297  ;;  %v2539_v46 = vpop.f32.mrf.mxu1  ;;  %v2032_v26 = vadd.f32 %v9431_v63, %v1751_v12  ;;  %v1754_v51 = vadd.f32 %v9432_v18, %v1473_v22  ;;  %v1474_v30 = vadd.f32 %v9434_v23, %v1193_v56  ;;  %v1194_v7 = vadd.f32 %v9439_v55, %v905_v1  ;;  %v9440_v29 = vld [vmem:[#allocation32_spill] sm:$0xff]  ;;  %v9445_v63 = vld [vmem:[#allocation55_spill] sm:$0xff] }
 0x2e7   : > { %2608 = vst [vmem:[%s8873_s3 + $0x60] sm:$0xff] %v2592_v11  ;;  %v2590_v27 = vadd.f32 %v2539_v46, %v2309_v61  ;;  %v8924_v33 = vpop.f32.mrf.mxu0  ;;  %v2315_v61 = vadd.f32 %v9437_v38, %v2034_v20  ;;  %vm4340_vm3 = vcmp.eq.s32.totalorder %v7449_v16, %v4298_v47  ;;  %v1757_v31 = vadd.f32 %v9440_v29, %v1476_v3  ;;  %v9441_v46 = vld [vmem:[#allocation51_spill] sm:$0xff]  ;;  %v4582_v1 = vpop.permute.xlu0 %4581 }
 0x2e8   : > { %v6308_v59 = vpop.f32.mrf.mxu1  ;;  %v2035_v60 = vadd.f32 %v9438_v13, %v1754_v51  ;;  %v1477_v28 = vadd.f32 %v9441_v46, %v1196_v5  ;;  %v2033_v20 = vadd.f32 %v8793_v58, %v1752_v44  ;;  %v1475_v3 = vadd.f32 %v9444_v37, %v1194_v7  ;;  %v9448_v5 = vld [vmem:[#allocation38_spill] sm:$0xff] }
 0x2e9   : > { %2606 = vst [vmem:[%s8873_s3 + $0x40] sm:$0xff] %v2590_v27  ;;  %v2593_v50 = vadd.f32 %v6308_v59, %v2312_v35  ;;  %v8934_v34 = vpop.f32.mrf.mxu0  ;;  %v9442_v27 = vld [vmem:[#allocation54_spill] sm:$0xff]  ;;  %v9443_v35 = vld [vmem:[#allocation33_spill] sm:$0xff]  ;;  %v2038_v21 = vadd.f32 %v8800_v24, %v1757_v31  ;;  %vm4622_vm9 = vcmp.eq.s32.totalorder %v7449_v16, %v4582_v1 }
 0x2ea   : > { %v4301_v2 = vpop.permute.xlu1 %4300  ;;  %v2542_v11 = vpop.f32.mrf.mxu1  ;;  %v2313_v40 = vadd.f32 %v9442_v27, %v2032_v26  ;;  %v1755_v53 = vadd.f32 %v9443_v35, %v1474_v30  ;;  %v2316_v18 = vadd.f32 %v9445_v63, %v2035_v60  ;;  %v1756_v48 = vadd.f32 %v9448_v5, %v1475_v3 }
 0x2eb   : > { %2609 = vst [vmem:[%s8873_s3 + $0x70] sm:$0xff] %v2593_v50  ;;  %vm4341_vm4 = vcmp.eq.s32.totalorder %v7449_v16, %v4301_v2  ;;  %v2591_v22 = vadd.f32 %v2542_v11, %v2310_v8  ;;  %v8945_v52 = vpop.f32.mrf.mxu0  ;;  %v9446_v50 = vld [vmem:[#allocation35_spill] sm:$0xff]  ;;  %v9447_v8 = vld [vmem:[#allocation56_spill] sm:$0xff]  ;;  %v9449_v11 = vld [vmem:[#allocation58_spill] sm:$0xff] }
 0x2ec   : > { %vm5724_vm5 = vmpackc.low %vm4341_vm4, %vm4340_vm3  ;;  %v6311_v17 = vpop.f32.mrf.mxu1  ;;  %v2036_v51 = vadd.f32 %v8813_v19, %v1755_v53  ;;  %v1758_v39 = vadd.f32 %v9446_v50, %v1477_v28  ;;  %v2314_v23 = vadd.f32 %v9447_v8, %v2033_v20  ;;  %v2319_v38 = vadd.f32 %v9449_v11, %v2038_v21  ;;  %v4585_v53 = vpop.permute.xlu0 %4584 }
 0x2ed   : > { %2607 = vst [vmem:[%s8873_s3 + $0x50] sm:$0xff] %v2591_v22  ;;  %v2596_v12 = vadd.f32 %v6311_v17, %v2315_v61  ;;  %6526 = vmatmul.mubr.msk.bf16.vlgmr.msra.gmra.mxu0 %vm5724_vm5, %v9322_v25  ;;  %v8953_v47 = vpop.f32.mrf.mxu0  ;;  %v2037_v13 = vadd.f32 %v8835_v15, %v1756_v48  ;;  %vm4623_vm2 = vcmp.eq.s32.totalorder %v7449_v16, %v4585_v53 }
 0x2ee   : > { %v2555_v62 = vpop.f32.mrf.mxu1  ;;  %v2039_v4 = vadd.f32 %v8824_v57, %v1758_v39  ;;  %v9450_v57 = vld [vmem:[#allocation60_spill] sm:$0xff] }
 0x2ef   : > { %2612 = vst [vmem:[%s8873_s3 + $0xa0] sm:$0xff] %v2596_v12  ;;  %v4576_v58 = vpop.permute.xlu1 %4575  ;;  %v2594_v56 = vadd.f32 %v2555_v62, %v2313_v40  ;;  %v8961_v59 = vpop.f32.mrf.mxu0  ;;  %v2317_v22 = vadd.f32 %v9450_v57, %v2036_v51  ;;  %v2318_v28 = vadd.f32 %v8810_v14, %v2037_v13 }
 0x2f0   : > { %vm4620_vm7 = vcmp.eq.s32.totalorder %v7449_v16, %v4576_v58  ;;  %v6312_v26 = vpop.f32.mrf.mxu1  ;;  %v2320_v31 = vadd.f32 %v8791_v42, %v2039_v4  ;;  %v4594_v63 = vpop.permute.xlu0 %4593 }
 0x2f1   : > { %2610 = vst [vmem:[%s8873_s3 + $0x80] sm:$0xff] %v2594_v56  ;;  %vm5778_vm8 = vmpackc.low %vm4620_vm7, %vm4619_vm6  ;;  %v2597_v9 = vadd.f32 %v6312_v26, %v2316_v18  ;;  %v8968_v24 = vpop.f32.mrf.mxu0  ;;  %vm4626_vm5 = vcmp.eq.s32.totalorder %v7449_v16, %v4594_v63 }
 0x2f2   : > { %6557 = vmatprep.mubr.msk.bf16.mxu1 %vm5778_vm8, %v9322_v25  ;;  %v2558_v30 = vpop.f32.mrf.mxu1  ;;  %vm4347_vm8 = vcmp.eq.s32.totalorder %v7449_v16, %v8846_v41 }
 0x2f3   : > { %2613 = vst [vmem:[%s8873_s3 + $0xb0] sm:$0xff] %v2597_v9  ;;  %v4579_v19 = vpop.permute.xlu1 %4578  ;;  %v2595_v44 = vadd.f32 %v2558_v30, %v2314_v23  ;;  %v8976_v2 = vpop.f32.mrf.mxu0 }
 0x2f4   : > { %vm4621_vm10 = vcmp.eq.s32.totalorder %v7449_v16, %v4579_v19  ;;  %v6315_v61 = vpop.f32.mrf.mxu1 }
 0x2f5   : > { %2611 = vst [vmem:[%s8873_s3 + $0x90] sm:$0xff] %v2595_v44  ;;  %vm5780_vm11 = vmpackc.low %vm4622_vm9, %vm4621_vm10  ;;  %v2600_v60 = vadd.f32 %v6315_v61, %v2319_v38  ;;  %v8987_v7 = vpop.f32.mrf.mxu0 }
 0x2f6   : > { %6558 = vmatmul.mubr.msk.bf16.vlgmr.msra.gmra.mxu1 %vm5780_vm11, %v9322_v25  ;;  %v2571_v55 = vpop.f32.mrf.mxu1 }
 0x2f7   : > { %2616 = vst [vmem:[%s8873_s3 + $0xe0] sm:$0xff] %v2600_v60  ;;  %v2598_v29 = vadd.f32 %v2571_v55, %v2317_v22  ;;  %v8993_v12 = vpop.f32.mrf.mxu0 }
 0x2f8   : > { %v4304_v15 = vpop.permute.xlu1 %4303  ;;  %v6316_v17 = vpop.f32.mrf.mxu1 }
 0x2f9   : > { %2614 = vst [vmem:[%s8873_s3 + $0xc0] sm:$0xff] %v2598_v29  ;;  %vm4342_vm13 = vcmp.eq.s32.totalorder %v7449_v16, %v4304_v15  ;;  %v2601_v46 = vadd.f32 %v6316_v17, %v2320_v31 }
 0x2fa   : > { %vm5726_vm14 = vmpackc.low %vm4343_vm12, %vm4342_vm13  ;;  %v2574_v20 = vpop.f32.mrf.mxu1 }
 0x2fb   : > { %2617 = vst [vmem:[%s8873_s3 + $0xf0] sm:$0xff] %v2601_v46  ;;  %v2599_v45 = vadd.f32 %v2574_v20, %v2318_v28  ;;  %6529 = vmatprep.mubr.msk.bf16.mxu0 %vm5726_vm14, %v9322_v25 }
 0x2fc   : > { %v4310_v27 = vpop.permute.xlu1 %4309 }
 0x2fd   : > { %2615 = vst [vmem:[%s8873_s3 + $0xd0] sm:$0xff] %v2599_v45  ;;  %v6367_v40 = vpop.f32.mrf.mxu1  ;;  %v8998_v42 = vpop.f32.mrf.mxu0  ;;  %vm4344_vm15 = vcmp.eq.s32.totalorder %v7449_v16, %v4310_v27 }
 0x2fe   : > { %v9001_v35 = vadd.f32 %v6367_v40, %v8826_v0 }
 0x2ff   : > { %v3103_v62 = vpop.f32.mrf.mxu1  ;;  %v9003_v1 = vpop.f32.mrf.mxu0 }
 0x300   : > { %v9006_v14 = vadd.f32 %v3103_v62, %v8837_v32  ;;  %v4313_v37 = vpop.permute.xlu1 %4312 }
 0x301   : > { %vm4345_vm0 = vcmp.eq.s32.totalorder %v7449_v16, %v4313_v37  ;;  %v6368_v3 = vpop.f32.mrf.mxu1  ;;  %v9010_v21 = vpop.f32.mrf.mxu0 }
 0x302   : > { %vm5728_vm1 = vmpackc.low %vm4345_vm0, %vm4344_vm15  ;;  %v9013_v58 = vadd.f32 %v6368_v3, %v8855_v6 }
 0x303   : > { %v3106_v0 = vpop.f32.mrf.mxu1  ;;  %6530 = vmatmul.mubr.msk.bf16.gmra.mxu0 %vm5728_vm1, %v9322_v25  ;;  %v9016_v56 = vpop.f32.mrf.mxu0 }
 0x304   : > { %v9019_v32 = vadd.f32 %v3106_v0, %v8865_v49 }
 0x305   : > { %v4588_v18 = vpop.permute.xlu1 %4587  ;;  %v6371_v26 = vpop.f32.mrf.mxu1 }
 0x306   : > { %vm4624_vm3 = vcmp.eq.s32.totalorder %v7449_v16, %v4588_v18  ;;  %v3128_v51 = vadd.f32 %v6371_v26, %v8884_v43  ;;  %v6403_v50 = vpop.f32.mrf.mxu0 }
 0x307   : > { %vm5782_vm4 = vmpackc.low %vm4624_vm3, %vm4623_vm2  ;;  %v3119_v6 = vpop.f32.mrf.mxu1 }
 0x308   : > { %v3120_v39 = vadd.f32 %v3119_v6, %v8900_v54  ;;  %v9025_v9 = vadd.f32 %v6403_v50, %v3128_v51  ;;  %6561 = vmatprep.mubr.msk.bf16.mxu1 %vm5782_vm4, %v9322_v25  ;;  %v3384_v49 = vpop.f32.mrf.mxu0  ;;  %vm4351_vm4 = vcmp.eq.s32.totalorder %v7449_v16, %v8890_v36 }
 0x309   : > { %v4591_v8 = vpop.permute.xlu1 %4590  ;;  %v6372_v23 = vpop.f32.mrf.mxu1 }
 0x30a   : > { %vm4625_vm6 = vcmp.eq.s32.totalorder %v7449_v16, %v4591_v8  ;;  %v3131_v30 = vadd.f32 %v6372_v23, %v8914_v10  ;;  %v3435_v4 = vadd.f32 %v3384_v49, %v3120_v39  ;;  %v6404_v43 = vpop.f32.mrf.mxu0 }
 0x30b   : > { %vm5784_vm7 = vmpackc.low %vm4626_vm5, %vm4625_vm6  ;;  %v3122_v5 = vpop.f32.mrf.mxu1 }
 0x30c   : > { %v3123_v48 = vadd.f32 %v3122_v5, %v8924_v33  ;;  %v3438_v54 = vadd.f32 %v6404_v43, %v3131_v30  ;;  %6562 = vmatmul.mubr.msk.bf16.gmra.mxu1 %vm5784_vm7, %v9322_v25  ;;  %v3387_v19 = vpop.f32.mrf.mxu0 }
 0x30d   : > { %v6375_v44 = vpop.f32.mrf.mxu1 }
 0x30e   : > { %v3144_v11 = vadd.f32 %v6375_v44, %v8934_v34  ;;  %v3436_v38 = vadd.f32 %v3387_v19, %v3123_v48  ;;  %v4316_v61 = vpop.permute.xlu1 %4315 }
 0x30f   : > { %vm4346_vm9 = vcmp.eq.s32.totalorder %v7449_v16, %v4316_v61  ;;  %v3135_v10 = vpop.f32.mrf.mxu1 }
 0x310   : > { %vm5730_vm10 = vmpackc.low %vm4347_vm8, %vm4346_vm9  ;;  %v3136_v13 = vadd.f32 %v3135_v10, %v8945_v52  ;;  %v4597_v52 = vpop.permute.xlu0 %4596 }
 0x311   : > { %v6376_v60 = vpop.f32.mrf.mxu1  ;;  %6533 = vmatprep.mubr.msk.bf16.mxu0 %vm5730_vm10, %v9322_v25  ;;  %vm4627_vm14 = vcmp.eq.s32.totalorder %v7449_v16, %v4597_v52 }
 0x312   : > { %v3147_v33 = vadd.f32 %v6376_v60, %v8953_v47  ;;  %v4322_v57 = vpop.permute.xlu1 %4321 }
 0x313   : > { %v3138_v22 = vpop.f32.mrf.mxu1  ;;  %vm4348_vm11 = vcmp.eq.s32.totalorder %v7449_v16, %v4322_v57 }
 0x314   : > { %v3139_v34 = vadd.f32 %v3138_v22, %v8961_v59 }
 0x315   : > { %v6379_v55 = vpop.f32.mrf.mxu1 }
 0x316   : > { %v9042_v29 = vadd.f32 %v6379_v55, %v8968_v24  ;;  %v4325_v41 = vpop.permute.xlu1 %4324 }
 0x317   : > { %vm4349_vm12 = vcmp.eq.s32.totalorder %v7449_v16, %v4325_v41  ;;  %v3151_v31 = vpop.f32.mrf.mxu1 }
 0x318   : > { %vm5732_vm13 = vmpackc.low %vm4349_vm12, %vm4348_vm11  ;;  %v9047_v15 = vadd.f32 %v3151_v31, %v8976_v2  ;;  %v4606_v2 = vpop.permute.xlu0 %4605 }
 0x319   : > { %v6380_v47 = vpop.f32.mrf.mxu1  ;;  %6534 = vmatmul.mubr.msk.bf16.gmra.mxu0 %vm5732_vm13, %v9322_v25  ;;  %vm4630_vm1 = vcmp.eq.s32.totalorder %v7449_v16, %v4606_v2 }
 0x31a   : > { %v9051_v59 = vadd.f32 %v6380_v47, %v8987_v7 }
 0x31b   : > { %v4600_v17 = vpop.permute.xlu1 %4599  ;;  %v3154_v24 = vpop.f32.mrf.mxu1 }
 0x31c   : > { %vm4628_vm15 = vcmp.eq.s32.totalorder %v7449_v16, %v4600_v17  ;;  %v9056_v46 = vadd.f32 %v3154_v24, %v8993_v12  ;;  %v4609_v8 = vpop.permute.xlu0 %4608 }
 0x31d   : > { %vm5786_vm0 = vmpackc.low %vm4628_vm15, %vm4627_vm14  ;;  %v9058_v28 = vpop.f32.mrf.mxu1  ;;  %vm4631_vm10 = vcmp.eq.s32.totalorder %v7449_v16, %v4609_v8 }
 0x31e   : > { %6565 = vmatprep.mubr.msk.bf16.mxu1 %vm5786_vm0, %v9322_v25 }
 0x31f   : > { %v4603_v20 = vpop.permute.xlu1 %4602  ;;  %v9061_v45 = vpop.f32.mrf.mxu1 }
 0x320   : > { %vm4629_vm2 = vcmp.eq.s32.totalorder %v7449_v16, %v4603_v20 }
 0x321   : > { %vm5788_vm3 = vmpackc.low %vm4630_vm1, %vm4629_vm2  ;;  %v9065_v7 = vpop.f32.mrf.mxu1 }
 0x322   : > { %6566 = vmatmul.mubr.msk.bf16.gmra.mxu1 %vm5788_vm3, %v9322_v25 }
 0x323   : > { %v9068_v12 = vpop.f32.mrf.mxu1 }
 0x324   : > { %v4328_v27 = vpop.permute.xlu1 %4327 }
 0x325   : > { %vm4350_vm5 = vcmp.eq.s32.totalorder %v7449_v16, %v4328_v27  ;;  %v6435_v40 = vpop.f32.mrf.mxu1 }
 0x326   : > { %vm5734_vm6 = vmpackc.low %vm4351_vm4, %vm4350_vm5  ;;  %v9074_v53 = vadd.f32 %v6435_v40, %v9025_v9 }
 0x327   : > { %v3665_v62 = vpop.f32.mrf.mxu1  ;;  %6537 = vmatprep.mubr.msk.bf16.mxu0 %vm5734_vm6, %v9322_v25  ;;  %v6407_v37 = vpop.f32.mrf.mxu0 }
 0x328   : > { %v9077_v3 = vadd.f32 %v3665_v62, %v3435_v4  ;;  %v4334_v0 = vpop.permute.xlu1 %4333  ;;  %v3441_v63 = vadd.f32 %v6407_v37, %v3144_v11 }
 0x329   : > { %v6436_v18 = vpop.f32.mrf.mxu1  ;;  %v3400_v26 = vpop.f32.mrf.mxu0  ;;  %vm4352_vm7 = vcmp.eq.s32.totalorder %v7449_v16, %v4334_v0 }
 0x32a   : > { %v9079_v51 = vadd.f32 %v6436_v18, %v3438_v54  ;;  %v3439_v36 = vadd.f32 %v3400_v26, %v3136_v13  ;;  %v4618_v54 = vpop.permute.xlu0 %4617 }
 0x32b   : > { %v3668_v50 = vpop.f32.mrf.mxu1  ;;  %v6408_v6 = vpop.f32.mrf.mxu0  ;;  %vm4634_vm13 = vcmp.eq.s32.totalorder %v7449_v16, %v4618_v54 }
 0x32c   : > { %v9081_v39 = vadd.f32 %v3668_v50, %v3436_v38  ;;  %v4337_v49 = vpop.permute.xlu1 %4336  ;;  %v3442_v9 = vadd.f32 %v6408_v6, %v3147_v33 }
 0x32d   : > { %vm4353_vm8 = vcmp.eq.s32.totalorder %v7449_v16, %v4337_v49  ;;  %v3403_v23 = vpop.f32.mrf.mxu0 }
 0x32e   : > { %vm5736_vm9 = vmpackc.low %vm4353_vm8, %vm4352_vm7  ;;  %v3440_v30 = vadd.f32 %v3403_v23, %v3139_v34 }
 0x32f   : > { %6538 = vmatmul.mubr.msk.bf16.gmra.mxu0 %vm5736_vm9, %v9322_v25 }
 0x330   : > { %v6439_v4 = vpop.f32.mrf.mxu1 }
 0x331   : > { %v4612_v43 = vpop.permute.xlu1 %4611  ;;  %v9086_v5 = vadd.f32 %v6439_v4, %v3441_v63 }
 0x332   : > { %vm4632_vm11 = vcmp.eq.s32.totalorder %v7449_v16, %v4612_v43  ;;  %v3681_v48 = vpop.f32.mrf.mxu1 }
 0x333   : > { %vm5790_vm12 = vmpackc.low %vm4632_vm11, %vm4631_vm10  ;;  %v9090_v19 = vadd.f32 %v3681_v48, %v3439_v36 }
 0x334   : > { %6569 = vmatprep.mubr.msk.bf16.mxu1 %vm5790_vm12, %v9322_v25  ;;  %v6440_v44 = vpop.f32.mrf.mxu1 }
 0x335   : > { %v4615_v11 = vpop.permute.xlu1 %4614  ;;  %v9093_v38 = vadd.f32 %v6440_v44, %v3442_v9 }
 0x336   : > { %vm4633_vm14 = vcmp.eq.s32.totalorder %v7449_v16, %v4615_v11  ;;  %v3684_v61 = vpop.f32.mrf.mxu1 }
 0x337   : > { %vm5792_vm15 = vmpackc.low %vm4634_vm13, %vm4633_vm14  ;;  %v9097_v10 = vadd.f32 %v3684_v61, %v3440_v30 }
 0x338   : > { %6570 = vmatmul.mubr.msk.bf16.gmra.mxu1 %vm5792_vm15, %v9322_v25 }
 0x33d   : > { %v6411_v13 = vpop.f32.mrf.mxu0 }
 0x33e   : > { %v3445_v60 = vadd.f32 %v6411_v13, %v9042_v29 }
 0x33f   : > { %v3416_v33 = vpop.f32.mrf.mxu0 }
 0x340   : > { %v3443_v57 = vadd.f32 %v3416_v33, %v9047_v15 }
 0x341   : > { %v6412_v22 = vpop.f32.mrf.mxu0 }
 0x342   : > { %v3446_v34 = vadd.f32 %v6412_v22, %v9051_v59 }
 0x343   : > { %v3419_v55 = vpop.f32.mrf.mxu0 }
 0x344   : > { %v3444_v41 = vadd.f32 %v3419_v55, %v9056_v46 }
 0x346   : > { %v6443_v31 = vpop.f32.mrf.mxu1 }
 0x347   : > { %v3726_v16 = vadd.f32 %v6443_v31, %v3445_v60 }
 0x348   : > { %v3697_v52 = vpop.f32.mrf.mxu1 }
 0x349   : > { %v3724_v47 = vadd.f32 %v3697_v52, %v3443_v57 }
 0x34a   : > { %v6444_v17 = vpop.f32.mrf.mxu1 }
 0x34b   : > { %v3727_v24 = vadd.f32 %v6444_v17, %v3446_v34 }
 0x34c   : > { %v3700_v2 = vpop.f32.mrf.mxu1 }
 0x34d   : > { %v3725_v25 = vadd.f32 %v3700_v2, %v3444_v41  ;;  %v3431_v2 = vadd.f32 %v9003_v1, %v9006_v14 }
 0x354   : > { %v6463_v20 = vpop.f32.mrf.mxu0 }
 0x356   : > { %v3930_v27 = vpop.f32.mrf.mxu0 }
 0x358   : > { %v6464_v29 = vpop.f32.mrf.mxu0 }
 0x35a   : > { %v3933_v62 = vpop.f32.mrf.mxu0 }
 0x35d   : > { %v6495_v40 = vpop.f32.mrf.mxu1 }
 0x35f   : > { %v4211_v15 = vpop.f32.mrf.mxu1 }
 0x361   : > { %v6496_v59 = vpop.f32.mrf.mxu1 }
 0x363   : > { %v4214_v46 = vpop.f32.mrf.mxu1 }
 0x36a   : > { %v9104_v37 = vpop.f32.mrf.mxu0 }
 0x36c   : > { %v9106_v0 = vpop.f32.mrf.mxu0 }
 0x36e   : > { %v9108_v63 = vpop.f32.mrf.mxu0 }
 0x370   : > { %v9112_v26 = vpop.f32.mrf.mxu0 }
 0x373   : > { %v9110_v18 = vpop.f32.mrf.mxu1 }
 0x375   : > { %v9114_v36 = vpop.f32.mrf.mxu1 }
 0x377   : > { %v9118_v6 = vpop.f32.mrf.mxu1 }
 0x379   : > { %v9122_v9 = vpop.f32.mrf.mxu1 }
 0x381   : > { %v9116_v50 = vpop.f32.mrf.mxu0 }
 0x383   : > { %v9120_v49 = vpop.f32.mrf.mxu0 }
 0x385   : > { %v9124_v8 = vpop.f32.mrf.mxu0 }
 0x387   : > { %v9128_v30 = vpop.f32.mrf.mxu0 }
 0x38a   : > { %v9126_v23 = vpop.f32.mrf.mxu1 }
 0x38c   : > { %v9130_v4 = vpop.f32.mrf.mxu1 }
 0x38e   : > { %v9132_v44 = vpop.f32.mrf.mxu1 }
 0x390   : > { %v9134_v33 = vpop.f32.mrf.mxu1 }
 0x397   : > { %v6475_v43 = vpop.f32.mrf.mxu0 }
 0x398   : > { %v4007_v48 = vadd.f32 %v6475_v43, %v3726_v16 }
 0x399   : > { %v3978_v54 = vpop.f32.mrf.mxu0 }
 0x39a   : > { %v4005_v11 = vadd.f32 %v3978_v54, %v3724_v47  ;;  %v3433_v47 = vadd.f32 %v8998_v42, %v9001_v35  ;;  %v3712_v54 = vadd.f32 %v9061_v45, %v3431_v2  ;;  %v4000_v2 = vadd.f32 %v9108_v63, %v9079_v51 }
 0x39b   : > { %v6476_v61 = vpop.f32.mrf.mxu0 }
 0x39c   : > { %v4008_v13 = vadd.f32 %v6476_v61, %v3727_v24  ;;  %v3432_v61 = vadd.f32 %v9016_v56, %v9019_v32 }
 0x39d   : > { %v3981_v60 = vpop.f32.mrf.mxu0 }
 0x39e   : > { %v4006_v57 = vadd.f32 %v3981_v60, %v3725_v25  ;;  %v3714_v25 = vadd.f32 %v9058_v28, %v3433_v47  ;;  %v3993_v60 = vadd.f32 %v3930_v27, %v3712_v54  ;;  %v3713_v1 = vadd.f32 %v9068_v12, %v3432_v61 }
 0x39f   : > { %v3998_v54 = vadd.f32 %v9112_v26, %v9081_v39 }
 0x3a0   : > { %v6507_v22 = vpop.f32.mrf.mxu1  ;;  %v4274_v28 = vadd.f32 %v4211_v15, %v3993_v60 }
 0x3a1   : > { %v9136_v34 = vadd.f32 %v6507_v22, %v4007_v48  ;;  %v3434_v48 = vadd.f32 %v9010_v21, %v9013_v58  ;;  %v3994_v21 = vadd.f32 %v3933_v62, %v3713_v1 }
 0x3a2   : > { %v4259_v55 = vpop.f32.mrf.mxu1 }
 0x3a3   : > { %v9138_v41 = vadd.f32 %v4259_v55, %v4005_v11  ;;  %v3995_v11 = vadd.f32 %v6463_v20, %v3714_v25 }
 0x3a4   : > { %v6508_v31 = vpop.f32.mrf.mxu1 }
 0x3a5   : > { %v9140_v52 = vadd.f32 %v6508_v31, %v4008_v13  ;;  %v3715_v13 = vadd.f32 %v9065_v7, %v3434_v48  ;;  %v4276_v42 = vadd.f32 %v6495_v40, %v3995_v11  ;;  %v4275_v7 = vadd.f32 %v4214_v46, %v3994_v21 }
 0x3a6   : > { %v4262_v16 = vpop.f32.mrf.mxu1  ;;  %v3997_v46 = vadd.f32 %v9106_v0, %v9077_v3  ;;  %v4279_v11 = vadd.f32 %v9122_v9, %v3998_v54  ;;  %v4001_v9 = vadd.f32 %v9120_v49, %v9090_v19  ;;  %v4002_v21 = vadd.f32 %v9128_v30, %v9097_v10 }
 0x3a7   : > { %v9142_v17 = vadd.f32 %v4262_v16, %v4006_v57  ;;  %v3996_v14 = vadd.f32 %v6464_v29, %v3715_v13 }
 0x3a8   : > { %v4278_v25 = vadd.f32 %v9114_v36, %v3997_v46 }
 0x3a9   : > { %v4277_v58 = vadd.f32 %v6496_v59, %v3996_v14  ;;  %v3999_v59 = vadd.f32 %v9104_v37, %v9074_v53  ;;  %v4281_v53 = vadd.f32 %v9118_v6, %v4000_v2  ;;  %v4003_v6 = vadd.f32 %v9116_v50, %v9086_v5 }
 0x3aa   : > { %v4004_v14 = vadd.f32 %v9124_v8, %v9093_v38  ;;  %v4283_v38 = vadd.f32 %v9134_v33, %v4002_v21 }
 0x3ab   : > { %v4280_v47 = vadd.f32 %v9110_v18, %v3999_v59 }
 0x3ac   : > { %v4285_v5 = vadd.f32 %v9132_v44, %v4004_v14 }
 0x3ad   : > { %v6527_v24 = vpop.f32.mrf.mxu0 }
 0x3ae   : > { %v4557_v57 = vadd.f32 %v6527_v24, %v4276_v42 }
 0x3af   : > { %v4492_v43 = vpop.f32.mrf.mxu0 }
 0x3b0   : > { %v4555_v45 = vadd.f32 %v4492_v43, %v4274_v28  ;;  %v4282_v28 = vadd.f32 %v9130_v4, %v4001_v9 }
 0x3b1   : > { %v6528_v35 = vpop.f32.mrf.mxu0 }
 0x3b2   : > { %v4558_v27 = vadd.f32 %v6528_v35, %v4277_v58  ;;  %v4284_v35 = vadd.f32 %v9126_v23, %v4003_v6 }
 0x3b3   : > { %v4495_v56 = vpop.f32.mrf.mxu0 }
 0x3b4   : > { %v4556_v31 = vadd.f32 %v4495_v56, %v4275_v7 }
 0x3b6   : > { %v6559_v22 = vpop.f32.mrf.mxu1 }
 0x3b7   : > { %v4838_v20 = vadd.f32 %v6559_v22, %v4557_v57 }
 0x3b8   : > { %v4773_v32 = vpop.f32.mrf.mxu1 }
 0x3b9   : > { %4854 = vst [vmem:[%s8873_s3 + $0x28] sm:$0xff] %v4838_v20  ;;  %v4836_v40 = vadd.f32 %v4773_v32, %v4555_v45 }
 0x3ba   : > { %v6560_v55 = vpop.f32.mrf.mxu1 }
 0x3bb   : > { %4852 = vst [vmem:[%s8873_s3 + $0x8] sm:$0xff] %v4836_v40  ;;  %v4839_v12 = vadd.f32 %v6560_v55, %v4558_v27 }
 0x3bc   : > { %v4776_v29 = vpop.f32.mrf.mxu1 }
 0x3bd   : > { %4855 = vst [vmem:[%s8873_s3 + $0x38] sm:$0xff] %v4839_v12  ;;  %v4837_v15 = vadd.f32 %v4776_v29, %v4556_v31 }
 0x3bf   : > { %4853 = vst [vmem:[%s8873_s3 + $0x18] sm:$0xff] %v4837_v15 }
 0x3c3   : > { %v6531_v16 = vpop.f32.mrf.mxu0 }
 0x3c4   : > { %v4561_v43 = vadd.f32 %v6531_v16, %v4280_v47 }
 0x3c5   : > { %v4508_v62 = vpop.f32.mrf.mxu0 }
 0x3c6   : > { %v4559_v37 = vadd.f32 %v4508_v62, %v4278_v25 }
 0x3c7   : > { %v6532_v24 = vpop.f32.mrf.mxu0 }
 0x3c8   : > { %v4562_v61 = vadd.f32 %v6532_v24, %v4281_v53 }
 0x3c9   : > { %v4511_v0 = vpop.f32.mrf.mxu0 }
 0x3ca   : > { %v4560_v36 = vadd.f32 %v4511_v0, %v4279_v11 }
 0x3cc   : > { %v6563_v48 = vpop.f32.mrf.mxu1 }
 0x3cd   : > { %v4842_v3 = vadd.f32 %v6563_v48, %v4561_v43 }
 0x3ce   : > { %v4789_v18 = vpop.f32.mrf.mxu1 }
 0x3cf   : > { %4858 = vst [vmem:[%s8873_s3 + $0x68] sm:$0xff] %v4842_v3  ;;  %v4840_v51 = vadd.f32 %v4789_v18, %v4559_v37 }
 0x3d0   : > { %v6564_v63 = vpop.f32.mrf.mxu1 }
 0x3d1   : > { %4856 = vst [vmem:[%s8873_s3 + $0x48] sm:$0xff] %v4840_v51  ;;  %v4843_v13 = vadd.f32 %v6564_v63, %v4562_v61 }
 0x3d2   : > { %v4792_v60 = vpop.f32.mrf.mxu1 }
 0x3d3   : > { %4859 = vst [vmem:[%s8873_s3 + $0x78] sm:$0xff] %v4843_v13  ;;  %v4841_v42 = vadd.f32 %v4792_v60, %v4560_v36 }
 0x3d5   : > { %4857 = vst [vmem:[%s8873_s3 + $0x58] sm:$0xff] %v4841_v42 }
 0x3d9   : > { %v6535_v39 = vpop.f32.mrf.mxu0 }
 0x3da   : > { %v4565_v57 = vadd.f32 %v6535_v39, %v4284_v35 }
 0x3db   : > { %v4524_v26 = vpop.f32.mrf.mxu0 }
 0x3dc   : > { %v4563_v50 = vadd.f32 %v4524_v26, %v4282_v28 }
 0x3dd   : > { %v6536_v1 = vpop.f32.mrf.mxu0 }
 0x3de   : > { %v4566_v8 = vadd.f32 %v6536_v1, %v4285_v5 }
 0x3df   : > { %v4527_v49 = vpop.f32.mrf.mxu0 }
 0x3e0   : > { %v4564_v45 = vadd.f32 %v4527_v49, %v4283_v38 }
 0x3e2   : > { %v6567_v22 = vpop.f32.mrf.mxu1 }
 0x3e3   : > { %v4846_v19 = vadd.f32 %v6567_v22, %v4565_v57 }
 0x3e4   : > { %v4805_v23 = vpop.f32.mrf.mxu1 }
 0x3e5   : > { %4862 = vst [vmem:[%s8873_s3 + $0xa8] sm:$0xff] %v4846_v19  ;;  %v4844_v4 = vadd.f32 %v4805_v23, %v4563_v50 }
 0x3e6   : > { %v6568_v58 = vpop.f32.mrf.mxu1 }
 0x3e7   : > { %4860 = vst [vmem:[%s8873_s3 + $0x88] sm:$0xff] %v4844_v4  ;;  %v4847_v20 = vadd.f32 %v6568_v58, %v4566_v8 }
 0x3e8   : > { %v4808_v56 = vpop.f32.mrf.mxu1 }
 0x3e9   : > { %4863 = vst [vmem:[%s8873_s3 + $0xb8] sm:$0xff] %v4847_v20  ;;  %v4845_v10 = vadd.f32 %v4808_v56, %v4564_v45 }
 0x3eb   : > { %4861 = vst [vmem:[%s8873_s3 + $0x98] sm:$0xff] %v4845_v10 }
 0x3ef   : > { %v6539_v30 = vpop.f32.mrf.mxu0 }
 0x3f0   : > { %v4569_v33 = vadd.f32 %v6539_v30, %v9136_v34 }
 0x3f1   : > { %v4540_v44 = vpop.f32.mrf.mxu0 }
 0x3f2   : > { %v4567_v27 = vadd.f32 %v4540_v44, %v9138_v41 }
 0x3f3   : > { %v6540_v32 = vpop.f32.mrf.mxu0 }
 0x3f4   : > { %v4570_v12 = vadd.f32 %v6540_v32, %v9140_v52 }
 0x3f5   : > { %v4543_v55 = vpop.f32.mrf.mxu0 }
 0x3f6   : > { %v4568_v34 = vadd.f32 %v4543_v55, %v9142_v17 }
 0x3f8   : > { %v6571_v7 = vpop.f32.mrf.mxu1 }
 0x3f9   : > { %v4850_v40 = vadd.f32 %v6571_v7, %v4569_v33 }
 0x3fa   : > { %v4821_v31 = vpop.f32.mrf.mxu1 }
 0x3fb   : > { %4866 = vst [vmem:[%s8873_s3 + $0xe8] sm:$0xff] %v4850_v40  ;;  %v4848_v29 = vadd.f32 %v4821_v31, %v4567_v27 }
 0x3fc   : > { %v6572_v15 = vpop.f32.mrf.mxu1 }
 0x3fd   : > { %4864 = vst [vmem:[%s8873_s3 + $0xc8] sm:$0xff] %v4848_v29  ;;  %v4851_v16 = vadd.f32 %v6572_v15, %v4570_v12 }
 0x3fe   : > { %v4824_v41 = vpop.f32.mrf.mxu1 }
 0x3ff   : > { %4867 = vst [vmem:[%s8873_s3 + $0xf8] sm:$0xff] %v4851_v16  ;;  %v4849_v52 = vadd.f32 %v4824_v41, %v4568_v34 }
 0x401   : > { %4865 = vst [vmem:[%s8873_s3 + $0xd8] sm:$0xff] %v4849_v52 }
 0x402   : > { %6925 = shalt.err (!%p6922_p9)
}
 0x403   : > { %s6926_s22 = scalar_lea.hbm %s9204_s24, 4096  ;;  %s6930_s3 = scalar_lea.hbm %s9274_s2, 16384 }
 0x404   : > { %p6927_p10 = scmp.ne.s32.totalorder %s9204_s24, %s6926_s22  ;;  %p6931_p2 = scmp.lt.s32.totalorder %s9204_s24, %s9274_s2 }
 0x405   : > { %p6932_p5 = scmp.lt.s32.totalorder %s6930_s3, %s6926_s22 }
 0x406   : > { %p6928_p11 = pnand %p6927_p10, %p7166_p13 }
 0x407   : > { %p6933_p7 = por %p6932_p5, %p6931_p2 }
 0x408   : > { %p6929_p0 = pneg %p6928_p11 }
 0x40a   : > { %p6934_p12 = pnand %p6933_p7, %p6929_p0 }
 0x40c   : > { %6937 = shalt.err (!%p6934_p12)
}
 0x40d   : > { %s7047_s29 = smov 256   ;;  %s7048_s30 = smov 512  }
 0x40e   : > { %s7049_s16 = smov 16  }
 0x40f   : > { %6575 = dma.vmem_to_hbm [thread:$0]  (%p7166_p13), %s9206_s15, 4096, %s9204_s24, %s9212_s10, %s7047_s29, %s7048_s30, %s7049_s16  }
 0x410 PF: > { %p6581_p1 = scmp.ge.s32.totalorder %s7032_s19, 2  ;;  %s4900_s26 = sand.u32 1, %s6992_s9  }
 0x411   : > { %s4901_s23 = scalar_lea.sflag [#allocation5], %s4900_s26 }
 0x412   : > { %p6578_p3 = pnand %p6581_p1, %p7172_p4 }
 0x414   : > { %p6579_p6 = pneg %p6578_p3 }
 0x416   : > { %6987 = dma.done.wait (%p6579_p6), %s4901_s23, 4096  }
 0x417   : > { %6989 = vsyncadd (%p6579_p6), %s4901_s23, 4294963200  ;;  %s18_s19 = sadd.s32 1, %s7032_s19   ;;  %s9451_s6 = sld [smem:[#allocation9_spill]] }
 0x418   : > { %p15_p8 = scmp.ge.s32.totalorder %s18_s19, 6   ;;  %s9452_s24 = sld [smem:[#allocation10_spill]] }
 0x419   : > { %s9453_s9 = smov %s7008_s13  ;;  %s9454_s10 = smov %s7000_s11 }
 0x41a   : > { %s9455_s11 = smov %s7004_s12  ;;  %s9456_s12 = smov %s7158_s4 }
 0x41b   : > { %s9457_s13 = smov %s7012_s14  ;;  %s9458_s14 = smov %s7161_s5 }
 0x41c   : > { %s9459_s15 = smov %s7024_s17  ;;  %s9460_s16 = smov %s7028_s18 }
 0x41d   : > { %s9461_s17 = smov %s9451_s6  ;;  %17 = sbr.rel (!%p15_p8) target bundleno = 11 (0xb), region = 121 }
 0x41e   : > { %s9462_s18 = smov %s9452_s24 }
 0x422   :  { %4906 = vsyncpa [#allocation4], 1 }
 0x423   :  { %4908 = vsyncpa [#allocation4 + $0x1], 1 }
 0x424   :  { %4909 = vsyncpa [#allocation5], 1 }
 0x425   :  { %4911 = vsyncpa [#allocation5 + $0x1], 1 }

</bundles_post_ra>
